<compile_context>
chip_gen: v5e
topology: v5e:2x2
jax: 0.10.0
libtpu: 0.0.40
codegen_flags: <defaults>
</compile_context>

<pallas_src>
import functools
import math

import jax
import jax.numpy as jnp
from jax.experimental import pallas as pl
from jax.experimental.pallas import tpu as pltpu

# ---------------- model config (small, synthetic) ----------------
HIDDEN = 196            # real hidden size (forced by classifier Linear(196, num_out))
NUM_HEADS = 4
HEAD_DIM = HIDDEN // NUM_HEADS        # 49
INTERMEDIATE = 256
NUM_LAYERS = 2
VOCAB = 100
MAX_POS = 32
NUM_OUT = 3
LN_EPS = 1e-12

# lane-friendly padded sizes used inside the kernel (padded slots are exact zeros)
H_PAD = 256                    # hidden 196 -> 256 (2 x 128 lanes)
DH_PAD = 128                   # per-head 49 -> 128 (lane-aligned head slices)
QW = NUM_HEADS * DH_PAD        # 512 columns per Q / K / V block
C_PAD = 128                    # classes 3 -> 128


def _gelu_tanh(x):
    # TODO(synk): HF ELECTRA default hidden_act is exact (erf) GELU; using the tanh
    # approximation here for Mosaic-safe elementwise lowering.
    c = math.sqrt(2.0 / math.pi)
    return 0.5 * x * (1.0 + jnp.tanh(c * (x + 0.044715 * x * x * x)))


# ---------------- single fused Pallas kernel (grid axis = layer) ----------------
def _encoder_kernel(x_ref, mask_ref, emb_g_ref, emb_b_ref,
                    wqkv_ref, bqkv_ref, wo_ref, bo_ref, ln1g_ref, ln1b_ref,
                    w1_ref, b1_ref, w2_ref, b2_ref, ln2g_ref, ln2b_ref,
                    wc_ref, bc_ref,
                    out_ref, xres_ref, *, batch, seq):
    l = pl.program_id(0)
    feat_mask = jax.lax.broadcasted_iota(jnp.int32, (1, H_PAD), 1) < HIDDEN

    def layer_norm(x, g, b):
        # statistics over the REAL 196 features only (pad cols of x are zero by construction)
        mean = jnp.sum(x, axis=-1, keepdims=True) * (1.0 / HIDDEN)
        cen = jnp.where(feat_mask, x - mean, 0.0)
        var = jnp.sum(cen * cen, axis=-1, keepdims=True) * (1.0 / HIDDEN)
        return cen * jax.lax.rsqrt(var + LN_EPS) * g + b

    # ---- embedding LayerNorm seeds the residual stream (first grid step only) ----
    @pl.when(l == 0)
    def _():
        xres_ref[...] = layer_norm(x_ref[...], emb_g_ref[...], emb_b_ref[...])

    x = xres_ref[...]                       # (B*S, H_PAD) f32, carried across layers
    mask_bias = mask_ref[...]               # (B, S) additive key bias

    # ---- fused QKV projection (bf16 x bf16 -> f32; 1/sqrt(head_dim) folded into Q) ----
    qkv = jnp.dot(x.astype(jnp.bfloat16), wqkv_ref[...],
                  preferred_element_type=jnp.float32) + bqkv_ref[...]
    q = qkv[:, 0:QW]
    k = qkv[:, QW:2 * QW]
    v = qkv[:, 2 * QW:3 * QW]

    # ---- multi-head attention, fully unrolled; context accumulated in registers ----
    ctx_rows = []
    for b in range(batch):
        bias_b = mask_bias[b:b + 1, :]                     # (1, S)
        r0 = b * seq
        head_ctx = []
        for h in range(NUM_HEADS):
            c0 = h * DH_PAD                                # 128-lane aligned slices
            qh = q[r0:r0 + seq, c0:c0 + DH_PAD]
            kh = k[r0:r0 + seq, c0:c0 + DH_PAD]
            vh = v[r0:r0 + seq, c0:c0 + DH_PAD]
            # Q.K^T without an explicit transpose (NT dimension numbers)
            s = jax.lax.dot_general(qh, kh, (((1,), (1,)), ((), ())),
                                    preferred_element_type=jnp.float32) + bias_b
            s = s - jnp.max(s, axis=-1, keepdims=True)
            p = jnp.exp(s)
            p = p * pl.reciprocal(jnp.sum(p, axis=-1, keepdims=True), approx=True)
            head_ctx.append(jnp.dot(p, vh, preferred_element_type=jnp.float32))
        ctx_rows.append(jnp.concatenate(head_ctx, axis=-1))   # (S, QW)
    ctx = jnp.concatenate(ctx_rows, axis=0)                   # (B*S, QW)

    attn = jnp.dot(ctx.astype(jnp.bfloat16), wo_ref[...],
                   preferred_element_type=jnp.float32) + bo_ref[...]
    x = layer_norm(attn + x, ln1g_ref[...], ln1b_ref[...])

    # ---- feed-forward ----
    hmid = jnp.dot(x.astype(jnp.bfloat16), w1_ref[...],
                   preferred_element_type=jnp.float32) + b1_ref[...]
    hmid = _gelu_tanh(hmid)
    ffn = jnp.dot(hmid.astype(jnp.bfloat16), w2_ref[...],
                  preferred_element_type=jnp.float32) + b2_ref[...]
    x = layer_norm(ffn + x, ln2g_ref[...], ln2b_ref[...])
    xres_ref[...] = x

    # ---- tail (last layer only): classifier on ALL rows + softmax over real classes ----
    @pl.when(l == NUM_LAYERS - 1)
    def _():
        logits = jnp.dot(x.astype(jnp.bfloat16), wc_ref[...],
                         preferred_element_type=jnp.float32) + bc_ref[...]
        cls_mask = jax.lax.broadcasted_iota(jnp.int32, (1, C_PAD), 1) < NUM_OUT
        logits = jnp.where(cls_mask, logits, -1e30)
        logits = logits - jnp.max(logits, axis=-1, keepdims=True)
        e = jnp.exp(logits)
        out_ref[...] = e / jnp.sum(e, axis=-1, keepdims=True)   # exact div for the output


# ---------------- forward pass (ELECTRAClass.forward) ----------------
def electra_class_forward(params, input_ids, attention_mask, token_type_ids):
    # NB: like the PyTorch module, token_type_ids is accepted but not forwarded to the
    # encoder (encoder uses its default, i.e. all-zeros token types).
    del token_type_ids
    B, S = input_ids.shape

    # embedding gathers are XLA glue; tables are pre-padded -> activation pad cols are zero
    we = params["word_emb"][input_ids].astype(jnp.float32)        # (B, S, H_PAD)
    pe = params["pos_emb"][jnp.arange(S)].astype(jnp.float32)     # (S, H_PAD)
    te = params["type_emb"][0].astype(jnp.float32)                # (H_PAD,) token_type = 0
    x = (we + pe[None] + te[None, None]).reshape(B * S, H_PAD)

    mask_bias = (1.0 - attention_mask.astype(jnp.float32)) * -1e9   # (B, S)

    def const_spec(a):
        nd = a.ndim
        return pl.BlockSpec(a.shape, lambda l, _n=nd: (0,) * _n)

    def layer_spec(a):
        # stacked (L, R, C) -> per-layer (R, C) block, double-buffered across grid steps
        nd = a.ndim - 1
        return pl.BlockSpec((None,) + a.shape[1:],
                            lambda l, _n=nd: (l,) + (0,) * _n)

    args = (x, mask_bias,
            params["emb_ln_g"], params["emb_ln_b"],
            params["wqkv"], params["bqkv"], params["wo"], params["bo"],
            params["ln1_g"], params["ln1_b"],
            params["w1"], params["b1"], params["w2"], params["b2"],
            params["ln2_g"], params["ln2_b"],
            params["wc"], params["bc"])

    in_specs = [
        const_spec(x), const_spec(mask_bias),
        const_spec(params["emb_ln_g"]), const_spec(params["emb_ln_b"]),
        layer_spec(params["wqkv"]), layer_spec(params["bqkv"]),
        layer_spec(params["wo"]), layer_spec(params["bo"]),
        layer_spec(params["ln1_g"]), layer_spec(params["ln1_b"]),
        layer_spec(params["w1"]), layer_spec(params["b1"]),
        layer_spec(params["w2"]), layer_spec(params["b2"]),
        layer_spec(params["ln2_g"]), layer_spec(params["ln2_b"]),
        const_spec(params["wc"]), const_spec(params["bc"]),
    ]

    out_pad = pl.pallas_call(
        functools.partial(_encoder_kernel, batch=B, seq=S),
        out_shape=jax.ShapeDtypeStruct((B * S, C_PAD), jnp.float32),
        grid=(NUM_LAYERS,),
        in_specs=in_specs,
        out_specs=pl.BlockSpec((B * S, C_PAD), lambda l: (0, 0)),
        scratch_shapes=[pltpu.VMEM((B * S, H_PAD), jnp.float32)],   # residual carried across layers
        compiler_params=pltpu.CompilerParams(dimension_semantics=("arbitrary",)),
    )(*args)

    # select CLS rows (row 0 of each sequence) and the real classes in the wrapper
    return out_pad.reshape(B, S, C_PAD)[:, 0, :NUM_OUT]


# ---------------- parameter init (deterministic, synthetic, pre-padded, bf16 weights) ----------------
def init_params(key):
    std = 0.02
    keys = iter(jax.random.split(key, 8 + NUM_LAYERS * 10))
    bf16 = jnp.bfloat16

    def nrm(shape):
        return (std * jax.random.normal(next(keys), shape)).astype(jnp.float32)

    def pad2(w, rows, cols):
        out = jnp.zeros((rows, cols), jnp.float32)
        return out.at[:w.shape[0], :w.shape[1]].set(w)

    def pad_vec(v, n):
        out = jnp.zeros((n,), jnp.float32)
        return out.at[:v.shape[0]].set(v)

    def head_cols(w):
        # (H, H) -> (H_PAD, QW): head h real cols [h*49, h*49+49) -> padded [h*128, h*128+49)
        w3 = w.reshape(HIDDEN, NUM_HEADS, HEAD_DIM)
        out = jnp.zeros((H_PAD, NUM_HEADS, DH_PAD), jnp.float32)
        out = out.at[:HIDDEN, :, :HEAD_DIM].set(w3)
        return out.reshape(H_PAD, QW)

    def head_bias(b):
        b2 = b.reshape(NUM_HEADS, HEAD_DIM)
        out = jnp.zeros((NUM_HEADS, DH_PAD), jnp.float32)
        out = out.at[:, :HEAD_DIM].set(b2)
        return out.reshape(QW)

    def head_rows(w):
        # (H, H) -> (QW, H_PAD): head h real rows -> padded rows [h*128, h*128+49)
        w3 = w.reshape(NUM_HEADS, HEAD_DIM, HIDDEN)
        out = jnp.zeros((NUM_HEADS, DH_PAD, H_PAD), jnp.float32)
        out = out.at[:, :HEAD_DIM, :HIDDEN].set(w3)
        return out.reshape(QW, H_PAD)

    scale = 1.0 / math.sqrt(HEAD_DIM)

    params = {
        "word_emb": pad2(nrm((VOCAB, HIDDEN)), VOCAB, H_PAD).astype(bf16),
        "pos_emb": pad2(nrm((MAX_POS, HIDDEN)), MAX_POS, H_PAD).astype(bf16),
        "type_emb": pad2(nrm((2, HIDDEN)), 2, H_PAD).astype(bf16),
        "emb_ln_g": pad_vec(jnp.ones((HIDDEN,), jnp.float32), H_PAD).reshape(1, H_PAD),
        "emb_ln_b": jnp.zeros((1, H_PAD), jnp.float32),
        "wc": pad2(nrm((HIDDEN, NUM_OUT)), H_PAD, C_PAD).astype(bf16),
        "bc": jnp.zeros((1, C_PAD), jnp.float32),
    }

    wqkv, bqkv, wo, bo, ln1g, ln1b = [], [], [], [], [], []
    w1, b1, w2, b2, ln2g, ln2b = [], [], [], [], [], []
    for _ in range(NUM_LAYERS):
        wq, wk, wv = nrm((HIDDEN, HIDDEN)), nrm((HIDDEN, HIDDEN)), nrm((HIDDEN, HIDDEN))
        bq = jnp.zeros((HIDDEN,), jnp.float32)
        bk = jnp.zeros((HIDDEN,), jnp.float32)
        bv = jnp.zeros((HIDDEN,), jnp.float32)
        # fold 1/sqrt(head_dim) into Q; fuse Q|K|V into one (H_PAD, 3*QW) bf16 weight
        wqkv.append(jnp.concatenate(
            [head_cols(wq * scale), head_cols(wk), head_cols(wv)], axis=1).astype(bf16))
        bqkv.append(jnp.concatenate(
            [head_bias(bq * scale), head_bias(bk), head_bias(bv)]).reshape(1, 3 * QW))
        wo.append(head_rows(nrm((HIDDEN, HIDDEN))).astype(bf16))
        bo.append(jnp.zeros((1, H_PAD), jnp.float32))
        ln1g.append(pad_vec(jnp.ones((HIDDEN,), jnp.float32), H_PAD).reshape(1, H_PAD))
        ln1b.append(jnp.zeros((1, H_PAD), jnp.float32))
        w1.append(pad2(nrm((HIDDEN, INTERMEDIATE)), H_PAD, INTERMEDIATE).astype(bf16))
        b1.append(jnp.zeros((1, INTERMEDIATE), jnp.float32))
        w2.append(pad2(nrm((INTERMEDIATE, HIDDEN)), INTERMEDIATE, H_PAD).astype(bf16))
        b2.append(jnp.zeros((1, H_PAD), jnp.float32))
        ln2g.append(pad_vec(jnp.ones((HIDDEN,), jnp.float32), H_PAD).reshape(1, H_PAD))
        ln2b.append(jnp.zeros((1, H_PAD), jnp.float32))

    for name, lst in [("wqkv", wqkv), ("bqkv", bqkv), ("wo", wo), ("bo", bo),
                      ("ln1_g", ln1g), ("ln1_b", ln1b), ("w1", w1), ("b1", b1),
                      ("w2", w2), ("b2", b2), ("ln2_g", ln2g), ("ln2_b", ln2b)]:
        params[name] = jnp.stack(lst)
    return params


# ---------------- main ----------------
if __name__ == "__main__":
    B, S = 2, 8
    key = jax.random.PRNGKey(0)
    k_param, k_ids = jax.random.split(key)

    params = init_params(k_param)
    input_ids = jax.random.randint(k_ids, (B, S), 0, VOCAB, dtype=jnp.int32)
    attention_mask = jnp.ones((B, S), jnp.int32).at[1, 6:].set(0)   # pad tail of sample 1
    token_type_ids = jnp.zeros((B, S), jnp.int32)

    out = jax.jit(electra_class_forward)(params, input_ids, attention_mask, token_type_ids)
    out = jax.block_until_ready(out)

    assert out.shape == (B, NUM_OUT)
    assert bool(jnp.all(jnp.isfinite(out)))
    # rows should sum to 1 (softmax over classes)
    assert bool(jnp.allclose(jnp.sum(out, axis=1), 1.0, atol=1e-4))
    print("KERNEL_OK")
</pallas_src>

<mosaic_0001>
module attributes {stable_mosaic.version = 11 : i64} {
  func.func @_encoder_kernel(%arg0: i32, %arg1: memref<16x256xf32, #tpu.memory_space<vmem>>, %arg2: memref<2x8xf32, #tpu.memory_space<vmem>>, %arg3: memref<1x256xf32, #tpu.memory_space<vmem>>, %arg4: memref<1x256xf32, #tpu.memory_space<vmem>>, %arg5: memref<1x256x1536xbf16, #tpu.memory_space<vmem>>, %arg6: memref<1x1x1536xf32, #tpu.memory_space<vmem>>, %arg7: memref<1x512x256xbf16, #tpu.memory_space<vmem>>, %arg8: memref<1x1x256xf32, #tpu.memory_space<vmem>>, %arg9: memref<1x1x256xf32, #tpu.memory_space<vmem>>, %arg10: memref<1x1x256xf32, #tpu.memory_space<vmem>>, %arg11: memref<1x256x256xbf16, #tpu.memory_space<vmem>>, %arg12: memref<1x1x256xf32, #tpu.memory_space<vmem>>, %arg13: memref<1x256x256xbf16, #tpu.memory_space<vmem>>, %arg14: memref<1x1x256xf32, #tpu.memory_space<vmem>>, %arg15: memref<1x1x256xf32, #tpu.memory_space<vmem>>, %arg16: memref<1x1x256xf32, #tpu.memory_space<vmem>>, %arg17: memref<256x128xbf16, #tpu.memory_space<vmem>>, %arg18: memref<1x128xf32, #tpu.memory_space<vmem>>, %arg19: memref<16x128xf32, #tpu.memory_space<vmem>>, %arg20: memref<16x256xf32, #tpu.memory_space<vmem>>) attributes {dimension_semantics = [#tpu.dimension_semantics<arbitrary>], iteration_bounds = array<i64: 2>, scalar_prefetch = 0 : i64, scratch_operands = 1 : i64, tpu.core_type = #tpu.core_type<tc>, window_params = [{pipeline_mode = #tpu.pipeline_mode<synchronous>, transform_indices = @transform_0, window_bounds = array<i64: 16, 256>}, {pipeline_mode = #tpu.pipeline_mode<synchronous>, transform_indices = @transform_1, window_bounds = array<i64: 2, 8>}, {pipeline_mode = #tpu.pipeline_mode<synchronous>, transform_indices = @transform_2, window_bounds = array<i64: 1, 256>}, {pipeline_mode = #tpu.pipeline_mode<synchronous>, transform_indices = @transform_3, window_bounds = array<i64: 1, 256>}, {transform_indices = @transform_4, window_bounds = array<i64: 1, 256, 1536>}, {transform_indices = @transform_5, window_bounds = array<i64: 1, 1, 1536>}, {transform_indices = @transform_6, window_bounds = array<i64: 1, 512, 256>}, {transform_indices = @transform_7, window_bounds = array<i64: 1, 1, 256>}, {transform_indices = @transform_8, window_bounds = array<i64: 1, 1, 256>}, {transform_indices = @transform_9, window_bounds = array<i64: 1, 1, 256>}, {transform_indices = @transform_10, window_bounds = array<i64: 1, 256, 256>}, {transform_indices = @transform_11, window_bounds = array<i64: 1, 1, 256>}, {transform_indices = @transform_12, window_bounds = array<i64: 1, 256, 256>}, {transform_indices = @transform_13, window_bounds = array<i64: 1, 1, 256>}, {transform_indices = @transform_14, window_bounds = array<i64: 1, 1, 256>}, {transform_indices = @transform_15, window_bounds = array<i64: 1, 1, 256>}, {pipeline_mode = #tpu.pipeline_mode<synchronous>, transform_indices = @transform_16, window_bounds = array<i64: 256, 128>}, {pipeline_mode = #tpu.pipeline_mode<synchronous>, transform_indices = @transform_17, window_bounds = array<i64: 1, 128>}, {pipeline_mode = #tpu.pipeline_mode<synchronous>, transform_indices = @transform_18, window_bounds = array<i64: 16, 128>}]} {
    %0 = tpu.iota {dimensions = array<i32: 1>} : vector<1x256xi32>
    %c196_i32 = arith.constant 196 : i32
    %1 = vector.broadcast %c196_i32 : i32 to vector<1x256xi32>
    %2 = arith.cmpi slt, %0, %1 : vector<1x256xi32>
    %c0_i32 = arith.constant 0 : i32
    %3 = arith.cmpi eq, %arg0, %c0_i32 : i32
    %4 = arith.extui %3 : i1 to i32
    %c0_i32_0 = arith.constant 0 : i32
    %5 = arith.cmpi ne, %4, %c0_i32_0 : i32
    scf.if %5 {
      %c0_94 = arith.constant 0 : index
      %c0_95 = arith.constant 0 : index
      %259 = vector.load %arg1[%c0_94, %c0_95] : memref<16x256xf32, #tpu.memory_space<vmem>>, vector<16x256xf32>
      %c0_96 = arith.constant 0 : index
      %c0_97 = arith.constant 0 : index
      %260 = vector.load %arg3[%c0_96, %c0_97] : memref<1x256xf32, #tpu.memory_space<vmem>>, vector<1x256xf32>
      %c0_98 = arith.constant 0 : index
      %c0_99 = arith.constant 0 : index
      %261 = vector.load %arg4[%c0_98, %c0_99] : memref<1x256xf32, #tpu.memory_space<vmem>>, vector<1x256xf32>
      %cst_100 = arith.constant dense<0.000000e+00> : vector<16xf32>
      %262 = vector.multi_reduction <add>, %259, %cst_100 [1] : vector<16x256xf32> to vector<16xf32>
      %263 = vector.shape_cast %262 : vector<16xf32> to vector<16x1xf32>
      %cst_101 = arith.constant 0.00510204071 : f32
      %264 = vector.broadcast %cst_101 : f32 to vector<16x1xf32>
      %265 = arith.mulf %263, %264 : vector<16x1xf32>
      %266 = vector.broadcast %265 : vector<16x1xf32> to vector<16x256xf32>
      %267 = arith.subf %259, %266 : vector<16x256xf32>
      %cst_102 = arith.constant 0.000000e+00 : f32
      %268 = vector.shape_cast %2 : vector<1x256xi1> to vector<1x256xi1>
      %269 = vector.broadcast %268 : vector<1x256xi1> to vector<16x256xi1>
      %270 = vector.broadcast %cst_102 : f32 to vector<16x256xf32>
      %271 = arith.select %269, %267, %270 : vector<16x256xi1>, vector<16x256xf32>
      %272 = arith.mulf %271, %271 : vector<16x256xf32>
      %cst_103 = arith.constant dense<0.000000e+00> : vector<16xf32>
      %273 = vector.multi_reduction <add>, %272, %cst_103 [1] : vector<16x256xf32> to vector<16xf32>
      %274 = vector.shape_cast %273 : vector<16xf32> to vector<16x1xf32>
      %cst_104 = arith.constant 0.00510204071 : f32
      %275 = vector.broadcast %cst_104 : f32 to vector<16x1xf32>
      %276 = arith.mulf %274, %275 : vector<16x1xf32>
      %cst_105 = arith.constant 9.99999996E-13 : f32
      %277 = vector.broadcast %cst_105 : f32 to vector<16x1xf32>
      %278 = arith.addf %276, %277 : vector<16x1xf32>
      %279 = math.rsqrt %278 : vector<16x1xf32>
      %280 = vector.broadcast %279 : vector<16x1xf32> to vector<16x256xf32>
      %281 = arith.mulf %271, %280 : vector<16x256xf32>
      %282 = vector.broadcast %260 : vector<1x256xf32> to vector<16x256xf32>
      %283 = arith.mulf %281, %282 : vector<16x256xf32>
      %284 = vector.broadcast %261 : vector<1x256xf32> to vector<16x256xf32>
      %285 = arith.addf %283, %284 : vector<16x256xf32>
      %c0_106 = arith.constant 0 : index
      %c0_107 = arith.constant 0 : index
      %286 = vector.load %arg20[%c0_106, %c0_107] : memref<16x256xf32, #tpu.memory_space<vmem>>, vector<16x256xf32>
      tpu.vector_store %arg20[%c0_106, %c0_107], %285 {strides = array<i32>} : memref<16x256xf32, #tpu.memory_space<vmem>>, vector<16x256xf32>,
    } else {
    }
    %c0 = arith.constant 0 : index
    %c0_1 = arith.constant 0 : index
    %6 = vector.load %arg20[%c0, %c0_1] : memref<16x256xf32, #tpu.memory_space<vmem>>, vector<16x256xf32>
    %c0_2 = arith.constant 0 : index
    %c0_3 = arith.constant 0 : index
    %7 = vector.load %arg2[%c0_2, %c0_3] : memref<2x8xf32, #tpu.memory_space<vmem>>, vector<2x8xf32>
    %8 = arith.truncf %6 : vector<16x256xf32> to vector<16x256xbf16>
    %c0_4 = arith.constant 0 : index
    %c0_5 = arith.constant 0 : index
    %c0_6 = arith.constant 0 : index
    %9 = vector.load %arg5[%c0_4, %c0_5, %c0_6] : memref<1x256x1536xbf16, #tpu.memory_space<vmem>>, vector<1x256x1536xbf16>
    %10 = vector.shape_cast %9 : vector<1x256x1536xbf16> to vector<256x1536xbf16>
    %cst = arith.constant dense<0.000000e+00> : vector<16x1536xf32>
    %11 = tpu.matmul %8, %10, %cst {dimension_numbers = #tpu.dot_dimension_numbers<[1], [0], [0], [1], [0, 0, 1, 1], [], []>} : vector<16x256xbf16>, vector<256x1536xbf16>, vector<16x1536xf32> -> vector<16x1536xf32>
    %c0_7 = arith.constant 0 : index
    %c0_8 = arith.constant 0 : index
    %c0_9 = arith.constant 0 : index
    %12 = vector.load %arg6[%c0_7, %c0_8, %c0_9] : memref<1x1x1536xf32, #tpu.memory_space<vmem>>, vector<1x1x1536xf32>
    %13 = vector.shape_cast %12 : vector<1x1x1536xf32> to vector<1x1536xf32>
    %14 = vector.broadcast %13 : vector<1x1536xf32> to vector<16x1536xf32>
    %15 = arith.addf %11, %14 : vector<16x1536xf32>
    %16 = vector.extract_strided_slice %15 {offsets = [0, 0], sizes = [16, 512], strides = [1, 1]} : vector<16x1536xf32> to vector<16x512xf32>
    %17 = vector.extract_strided_slice %15 {offsets = [0, 512], sizes = [16, 512], strides = [1, 1]} : vector<16x1536xf32> to vector<16x512xf32>
    %18 = vector.extract_strided_slice %15 {offsets = [0, 1024], sizes = [16, 512], strides = [1, 1]} : vector<16x1536xf32> to vector<16x512xf32>
    %19 = vector.extract_strided_slice %7 {offsets = [0, 0], sizes = [1, 8], strides = [1, 1]} : vector<2x8xf32> to vector<1x8xf32>
    %20 = vector.extract_strided_slice %16 {offsets = [0, 0], sizes = [8, 128], strides = [1, 1]} : vector<16x512xf32> to vector<8x128xf32>
    %21 = vector.extract_strided_slice %17 {offsets = [0, 0], sizes = [8, 128], strides = [1, 1]} : vector<16x512xf32> to vector<8x128xf32>
    %22 = vector.extract_strided_slice %18 {offsets = [0, 0], sizes = [8, 128], strides = [1, 1]} : vector<16x512xf32> to vector<8x128xf32>
    %cst_10 = arith.constant dense<0.000000e+00> : vector<8x8xf32>
    %23 = tpu.matmul %20, %21, %cst_10 {dimension_numbers = #tpu.dot_dimension_numbers<[1], [1], [0], [0], [0, 0, 1, 0], [], []>} : vector<8x128xf32>, vector<8x128xf32>, vector<8x8xf32> -> vector<8x8xf32>
    %24 = vector.broadcast %19 : vector<1x8xf32> to vector<8x8xf32>
    %25 = arith.addf %23, %24 : vector<8x8xf32>
    %cst_11 = arith.constant dense<0xFF800000> : vector<8xf32>
    %26 = vector.multi_reduction <maximumf>, %25, %cst_11 [1] : vector<8x8xf32> to vector<8xf32>
    %27 = vector.shape_cast %26 : vector<8xf32> to vector<8x1xf32>
    %28 = vector.broadcast %27 : vector<8x1xf32> to vector<8x8xf32>
    %29 = arith.subf %25, %28 : vector<8x8xf32>
    %30 = math.exp %29 : vector<8x8xf32>
    %cst_12 = arith.constant dense<0.000000e+00> : vector<8xf32>
    %31 = vector.multi_reduction <add>, %30, %cst_12 [1] : vector<8x8xf32> to vector<8xf32>
    %32 = vector.shape_cast %31 : vector<8xf32> to vector<8x1xf32>
    %33 = tpu.reciprocal %32 {approx = true} : vector<8x1xf32> -> vector<8x1xf32>
    %34 = vector.broadcast %33 : vector<8x1xf32> to vector<8x8xf32>
    %35 = arith.mulf %30, %34 : vector<8x8xf32>
    %cst_13 = arith.constant dense<0.000000e+00> : vector<8x128xf32>
    %36 = tpu.matmul %35, %22, %cst_13 {dimension_numbers = #tpu.dot_dimension_numbers<[1], [0], [0], [1], [0, 0, 1, 1], [], []>} : vector<8x8xf32>, vector<8x128xf32>, vector<8x128xf32> -> vector<8x128xf32>
    %37 = vector.extract_strided_slice %16 {offsets = [0, 128], sizes = [8, 128], strides = [1, 1]} : vector<16x512xf32> to vector<8x128xf32>
    %38 = vector.extract_strided_slice %17 {offsets = [0, 128], sizes = [8, 128], strides = [1, 1]} : vector<16x512xf32> to vector<8x128xf32>
    %39 = vector.extract_strided_slice %18 {offsets = [0, 128], sizes = [8, 128], strides = [1, 1]} : vector<16x512xf32> to vector<8x128xf32>
    %cst_14 = arith.constant dense<0.000000e+00> : vector<8x8xf32>
    %40 = tpu.matmul %37, %38, %cst_14 {dimension_numbers = #tpu.dot_dimension_numbers<[1], [1], [0], [0], [0, 0, 1, 0], [], []>} : vector<8x128xf32>, vector<8x128xf32>, vector<8x8xf32> -> vector<8x8xf32>
    %41 = vector.broadcast %19 : vector<1x8xf32> to vector<8x8xf32>
    %42 = arith.addf %40, %41 : vector<8x8xf32>
    %cst_15 = arith.constant dense<0xFF800000> : vector<8xf32>
    %43 = vector.multi_reduction <maximumf>, %42, %cst_15 [1] : vector<8x8xf32> to vector<8xf32>
    %44 = vector.shape_cast %43 : vector<8xf32> to vector<8x1xf32>
    %45 = vector.broadcast %44 : vector<8x1xf32> to vector<8x8xf32>
    %46 = arith.subf %42, %45 : vector<8x8xf32>
    %47 = math.exp %46 : vector<8x8xf32>
    %cst_16 = arith.constant dense<0.000000e+00> : vector<8xf32>
    %48 = vector.multi_reduction <add>, %47, %cst_16 [1] : vector<8x8xf32> to vector<8xf32>
    %49 = vector.shape_cast %48 : vector<8xf32> to vector<8x1xf32>
    %50 = tpu.reciprocal %49 {approx = true} : vector<8x1xf32> -> vector<8x1xf32>
    %51 = vector.broadcast %50 : vector<8x1xf32> to vector<8x8xf32>
    %52 = arith.mulf %47, %51 : vector<8x8xf32>
    %cst_17 = arith.constant dense<0.000000e+00> : vector<8x128xf32>
    %53 = tpu.matmul %52, %39, %cst_17 {dimension_numbers = #tpu.dot_dimension_numbers<[1], [0], [0], [1], [0, 0, 1, 1], [], []>} : vector<8x8xf32>, vector<8x128xf32>, vector<8x128xf32> -> vector<8x128xf32>
    %54 = vector.extract_strided_slice %16 {offsets = [0, 256], sizes = [8, 128], strides = [1, 1]} : vector<16x512xf32> to vector<8x128xf32>
    %55 = vector.extract_strided_slice %17 {offsets = [0, 256], sizes = [8, 128], strides = [1, 1]} : vector<16x512xf32> to vector<8x128xf32>
    %56 = vector.extract_strided_slice %18 {offsets = [0, 256], sizes = [8, 128], strides = [1, 1]} : vector<16x512xf32> to vector<8x128xf32>
    %cst_18 = arith.constant dense<0.000000e+00> : vector<8x8xf32>
    %57 = tpu.matmul %54, %55, %cst_18 {dimension_numbers = #tpu.dot_dimension_numbers<[1], [1], [0], [0], [0, 0, 1, 0], [], []>} : vector<8x128xf32>, vector<8x128xf32>, vector<8x8xf32> -> vector<8x8xf32>
    %58 = vector.broadcast %19 : vector<1x8xf32> to vector<8x8xf32>
    %59 = arith.addf %57, %58 : vector<8x8xf32>
    %cst_19 = arith.constant dense<0xFF800000> : vector<8xf32>
    %60 = vector.multi_reduction <maximumf>, %59, %cst_19 [1] : vector<8x8xf32> to vector<8xf32>
    %61 = vector.shape_cast %60 : vector<8xf32> to vector<8x1xf32>
    %62 = vector.broadcast %61 : vector<8x1xf32> to vector<8x8xf32>
    %63 = arith.subf %59, %62 : vector<8x8xf32>
    %64 = math.exp %63 : vector<8x8xf32>
    %cst_20 = arith.constant dense<0.000000e+00> : vector<8xf32>
    %65 = vector.multi_reduction <add>, %64, %cst_20 [1] : vector<8x8xf32> to vector<8xf32>
    %66 = vector.shape_cast %65 : vector<8xf32> to vector<8x1xf32>
    %67 = tpu.reciprocal %66 {approx = true} : vector<8x1xf32> -> vector<8x1xf32>
    %68 = vector.broadcast %67 : vector<8x1xf32> to vector<8x8xf32>
    %69 = arith.mulf %64, %68 : vector<8x8xf32>
    %cst_21 = arith.constant dense<0.000000e+00> : vector<8x128xf32>
    %70 = tpu.matmul %69, %56, %cst_21 {dimension_numbers = #tpu.dot_dimension_numbers<[1], [0], [0], [1], [0, 0, 1, 1], [], []>} : vector<8x8xf32>, vector<8x128xf32>, vector<8x128xf32> -> vector<8x128xf32>
    %71 = vector.extract_strided_slice %16 {offsets = [0, 384], sizes = [8, 128], strides = [1, 1]} : vector<16x512xf32> to vector<8x128xf32>
    %72 = vector.extract_strided_slice %17 {offsets = [0, 384], sizes = [8, 128], strides = [1, 1]} : vector<16x512xf32> to vector<8x128xf32>
    %73 = vector.extract_strided_slice %18 {offsets = [0, 384], sizes = [8, 128], strides = [1, 1]} : vector<16x512xf32> to vector<8x128xf32>
    %cst_22 = arith.constant dense<0.000000e+00> : vector<8x8xf32>
    %74 = tpu.matmul %71, %72, %cst_22 {dimension_numbers = #tpu.dot_dimension_numbers<[1], [1], [0], [0], [0, 0, 1, 0], [], []>} : vector<8x128xf32>, vector<8x128xf32>, vector<8x8xf32> -> vector<8x8xf32>
    %75 = vector.broadcast %19 : vector<1x8xf32> to vector<8x8xf32>
    %76 = arith.addf %74, %75 : vector<8x8xf32>
    %cst_23 = arith.constant dense<0xFF800000> : vector<8xf32>
    %77 = vector.multi_reduction <maximumf>, %76, %cst_23 [1] : vector<8x8xf32> to vector<8xf32>
    %78 = vector.shape_cast %77 : vector<8xf32> to vector<8x1xf32>
    %79 = vector.broadcast %78 : vector<8x1xf32> to vector<8x8xf32>
    %80 = arith.subf %76, %79 : vector<8x8xf32>
    %81 = math.exp %80 : vector<8x8xf32>
    %cst_24 = arith.constant dense<0.000000e+00> : vector<8xf32>
    %82 = vector.multi_reduction <add>, %81, %cst_24 [1] : vector<8x8xf32> to vector<8xf32>
    %83 = vector.shape_cast %82 : vector<8xf32> to vector<8x1xf32>
    %84 = tpu.reciprocal %83 {approx = true} : vector<8x1xf32> -> vector<8x1xf32>
    %85 = vector.broadcast %84 : vector<8x1xf32> to vector<8x8xf32>
    %86 = arith.mulf %81, %85 : vector<8x8xf32>
    %cst_25 = arith.constant dense<0.000000e+00> : vector<8x128xf32>
    %87 = tpu.matmul %86, %73, %cst_25 {dimension_numbers = #tpu.dot_dimension_numbers<[1], [0], [0], [1], [0, 0, 1, 1], [], []>} : vector<8x8xf32>, vector<8x128xf32>, vector<8x128xf32> -> vector<8x128xf32>
    %88 = tpu.concatenate %36, %53, %70, %87 in 1 : vector<8x128xf32>, vector<8x128xf32>, vector<8x128xf32>, vector<8x128xf32> -> vector<8x512xf32>
    %89 = vector.extract_strided_slice %7 {offsets = [1, 0], sizes = [1, 8], strides = [1, 1]} : vector<2x8xf32> to vector<1x8xf32>
    %90 = vector.extract_strided_slice %16 {offsets = [8, 0], sizes = [8, 128], strides = [1, 1]} : vector<16x512xf32> to vector<8x128xf32>
    %91 = vector.extract_strided_slice %17 {offsets = [8, 0], sizes = [8, 128], strides = [1, 1]} : vector<16x512xf32> to vector<8x128xf32>
    %92 = vector.extract_strided_slice %18 {offsets = [8, 0], sizes = [8, 128], strides = [1, 1]} : vector<16x512xf32> to vector<8x128xf32>
    %cst_26 = arith.constant dense<0.000000e+00> : vector<8x8xf32>
    %93 = tpu.matmul %90, %91, %cst_26 {dimension_numbers = #tpu.dot_dimension_numbers<[1], [1], [0], [0], [0, 0, 1, 0], [], []>} : vector<8x128xf32>, vector<8x128xf32>, vector<8x8xf32> -> vector<8x8xf32>
    %94 = vector.broadcast %89 : vector<1x8xf32> to vector<8x8xf32>
    %95 = arith.addf %93, %94 : vector<8x8xf32>
    %cst_27 = arith.constant dense<0xFF800000> : vector<8xf32>
    %96 = vector.multi_reduction <maximumf>, %95, %cst_27 [1] : vector<8x8xf32> to vector<8xf32>
    %97 = vector.shape_cast %96 : vector<8xf32> to vector<8x1xf32>
    %98 = vector.broadcast %97 : vector<8x1xf32> to vector<8x8xf32>
    %99 = arith.subf %95, %98 : vector<8x8xf32>
    %100 = math.exp %99 : vector<8x8xf32>
    %cst_28 = arith.constant dense<0.000000e+00> : vector<8xf32>
    %101 = vector.multi_reduction <add>, %100, %cst_28 [1] : vector<8x8xf32> to vector<8xf32>
    %102 = vector.shape_cast %101 : vector<8xf32> to vector<8x1xf32>
    %103 = tpu.reciprocal %102 {approx = true} : vector<8x1xf32> -> vector<8x1xf32>
    %104 = vector.broadcast %103 : vector<8x1xf32> to vector<8x8xf32>
    %105 = arith.mulf %100, %104 : vector<8x8xf32>
    %cst_29 = arith.constant dense<0.000000e+00> : vector<8x128xf32>
    %106 = tpu.matmul %105, %92, %cst_29 {dimension_numbers = #tpu.dot_dimension_numbers<[1], [0], [0], [1], [0, 0, 1, 1], [], []>} : vector<8x8xf32>, vector<8x128xf32>, vector<8x128xf32> -> vector<8x128xf32>
    %107 = vector.extract_strided_slice %16 {offsets = [8, 128], sizes = [8, 128], strides = [1, 1]} : vector<16x512xf32> to vector<8x128xf32>
    %108 = vector.extract_strided_slice %17 {offsets = [8, 128], sizes = [8, 128], strides = [1, 1]} : vector<16x512xf32> to vector<8x128xf32>
    %109 = vector.extract_strided_slice %18 {offsets = [8, 128], sizes = [8, 128], strides = [1, 1]} : vector<16x512xf32> to vector<8x128xf32>
    %cst_30 = arith.constant dense<0.000000e+00> : vector<8x8xf32>
    %110 = tpu.matmul %107, %108, %cst_30 {dimension_numbers = #tpu.dot_dimension_numbers<[1], [1], [0], [0], [0, 0, 1, 0], [], []>} : vector<8x128xf32>, vector<8x128xf32>, vector<8x8xf32> -> vector<8x8xf32>
    %111 = vector.broadcast %89 : vector<1x8xf32> to vector<8x8xf32>
    %112 = arith.addf %110, %111 : vector<8x8xf32>
    %cst_31 = arith.constant dense<0xFF800000> : vector<8xf32>
    %113 = vector.multi_reduction <maximumf>, %112, %cst_31 [1] : vector<8x8xf32> to vector<8xf32>
    %114 = vector.shape_cast %113 : vector<8xf32> to vector<8x1xf32>
    %115 = vector.broadcast %114 : vector<8x1xf32> to vector<8x8xf32>
    %116 = arith.subf %112, %115 : vector<8x8xf32>
    %117 = math.exp %116 : vector<8x8xf32>
    %cst_32 = arith.constant dense<0.000000e+00> : vector<8xf32>
    %118 = vector.multi_reduction <add>, %117, %cst_32 [1] : vector<8x8xf32> to vector<8xf32>
    %119 = vector.shape_cast %118 : vector<8xf32> to vector<8x1xf32>
    %120 = tpu.reciprocal %119 {approx = true} : vector<8x1xf32> -> vector<8x1xf32>
    %121 = vector.broadcast %120 : vector<8x1xf32> to vector<8x8xf32>
    %122 = arith.mulf %117, %121 : vector<8x8xf32>
    %cst_33 = arith.constant dense<0.000000e+00> : vector<8x128xf32>
    %123 = tpu.matmul %122, %109, %cst_33 {dimension_numbers = #tpu.dot_dimension_numbers<[1], [0], [0], [1], [0, 0, 1, 1], [], []>} : vector<8x8xf32>, vector<8x128xf32>, vector<8x128xf32> -> vector<8x128xf32>
    %124 = vector.extract_strided_slice %16 {offsets = [8, 256], sizes = [8, 128], strides = [1, 1]} : vector<16x512xf32> to vector<8x128xf32>
    %125 = vector.extract_strided_slice %17 {offsets = [8, 256], sizes = [8, 128], strides = [1, 1]} : vector<16x512xf32> to vector<8x128xf32>
    %126 = vector.extract_strided_slice %18 {offsets = [8, 256], sizes = [8, 128], strides = [1, 1]} : vector<16x512xf32> to vector<8x128xf32>
    %cst_34 = arith.constant dense<0.000000e+00> : vector<8x8xf32>
    %127 = tpu.matmul %124, %125, %cst_34 {dimension_numbers = #tpu.dot_dimension_numbers<[1], [1], [0], [0], [0, 0, 1, 0], [], []>} : vector<8x128xf32>, vector<8x128xf32>, vector<8x8xf32> -> vector<8x8xf32>
    %128 = vector.broadcast %89 : vector<1x8xf32> to vector<8x8xf32>
    %129 = arith.addf %127, %128 : vector<8x8xf32>
    %cst_35 = arith.constant dense<0xFF800000> : vector<8xf32>
    %130 = vector.multi_reduction <maximumf>, %129, %cst_35 [1] : vector<8x8xf32> to vector<8xf32>
    %131 = vector.shape_cast %130 : vector<8xf32> to vector<8x1xf32>
    %132 = vector.broadcast %131 : vector<8x1xf32> to vector<8x8xf32>
    %133 = arith.subf %129, %132 : vector<8x8xf32>
    %134 = math.exp %133 : vector<8x8xf32>
    %cst_36 = arith.constant dense<0.000000e+00> : vector<8xf32>
    %135 = vector.multi_reduction <add>, %134, %cst_36 [1] : vector<8x8xf32> to vector<8xf32>
    %136 = vector.shape_cast %135 : vector<8xf32> to vector<8x1xf32>
    %137 = tpu.reciprocal %136 {approx = true} : vector<8x1xf32> -> vector<8x1xf32>
    %138 = vector.broadcast %137 : vector<8x1xf32> to vector<8x8xf32>
    %139 = arith.mulf %134, %138 : vector<8x8xf32>
    %cst_37 = arith.constant dense<0.000000e+00> : vector<8x128xf32>
    %140 = tpu.matmul %139, %126, %cst_37 {dimension_numbers = #tpu.dot_dimension_numbers<[1], [0], [0], [1], [0, 0, 1, 1], [], []>} : vector<8x8xf32>, vector<8x128xf32>, vector<8x128xf32> -> vector<8x128xf32>
    %141 = vector.extract_strided_slice %16 {offsets = [8, 384], sizes = [8, 128], strides = [1, 1]} : vector<16x512xf32> to vector<8x128xf32>
    %142 = vector.extract_strided_slice %17 {offsets = [8, 384], sizes = [8, 128], strides = [1, 1]} : vector<16x512xf32> to vector<8x128xf32>
    %143 = vector.extract_strided_slice %18 {offsets = [8, 384], sizes = [8, 128], strides = [1, 1]} : vector<16x512xf32> to vector<8x128xf32>
    %cst_38 = arith.constant dense<0.000000e+00> : vector<8x8xf32>
    %144 = tpu.matmul %141, %142, %cst_38 {dimension_numbers = #tpu.dot_dimension_numbers<[1], [1], [0], [0], [0, 0, 1, 0], [], []>} : vector<8x128xf32>, vector<8x128xf32>, vector<8x8xf32> -> vector<8x8xf32>
    %145 = vector.broadcast %89 : vector<1x8xf32> to vector<8x8xf32>
    %146 = arith.addf %144, %145 : vector<8x8xf32>
    %cst_39 = arith.constant dense<0xFF800000> : vector<8xf32>
    %147 = vector.multi_reduction <maximumf>, %146, %cst_39 [1] : vector<8x8xf32> to vector<8xf32>
    %148 = vector.shape_cast %147 : vector<8xf32> to vector<8x1xf32>
    %149 = vector.broadcast %148 : vector<8x1xf32> to vector<8x8xf32>
    %150 = arith.subf %146, %149 : vector<8x8xf32>
    %151 = math.exp %150 : vector<8x8xf32>
    %cst_40 = arith.constant dense<0.000000e+00> : vector<8xf32>
    %152 = vector.multi_reduction <add>, %151, %cst_40 [1] : vector<8x8xf32> to vector<8xf32>
    %153 = vector.shape_cast %152 : vector<8xf32> to vector<8x1xf32>
    %154 = tpu.reciprocal %153 {approx = true} : vector<8x1xf32> -> vector<8x1xf32>
    %155 = vector.broadcast %154 : vector<8x1xf32> to vector<8x8xf32>
    %156 = arith.mulf %151, %155 : vector<8x8xf32>
    %cst_41 = arith.constant dense<0.000000e+00> : vector<8x128xf32>
    %157 = tpu.matmul %156, %143, %cst_41 {dimension_numbers = #tpu.dot_dimension_numbers<[1], [0], [0], [1], [0, 0, 1, 1], [], []>} : vector<8x8xf32>, vector<8x128xf32>, vector<8x128xf32> -> vector<8x128xf32>
    %158 = tpu.concatenate %106, %123, %140, %157 in 1 : vector<8x128xf32>, vector<8x128xf32>, vector<8x128xf32>, vector<8x128xf32> -> vector<8x512xf32>
    %159 = tpu.concatenate %88, %158 in 0 : vector<8x512xf32>, vector<8x512xf32> -> vector<16x512xf32>
    %160 = arith.truncf %159 : vector<16x512xf32> to vector<16x512xbf16>
    %c0_42 = arith.constant 0 : index
    %c0_43 = arith.constant 0 : index
    %c0_44 = arith.constant 0 : index
    %161 = vector.load %arg7[%c0_42, %c0_43, %c0_44] : memref<1x512x256xbf16, #tpu.memory_space<vmem>>, vector<1x512x256xbf16>
    %162 = vector.shape_cast %161 : vector<1x512x256xbf16> to vector<512x256xbf16>
    %cst_45 = arith.constant dense<0.000000e+00> : vector<16x256xf32>
    %163 = tpu.matmul %160, %162, %cst_45 {dimension_numbers = #tpu.dot_dimension_numbers<[1], [0], [0], [1], [0, 0, 1, 1], [], []>} : vector<16x512xbf16>, vector<512x256xbf16>, vector<16x256xf32> -> vector<16x256xf32>
    %c0_46 = arith.constant 0 : index
    %c0_47 = arith.constant 0 : index
    %c0_48 = arith.constant 0 : index
    %164 = vector.load %arg8[%c0_46, %c0_47, %c0_48] : memref<1x1x256xf32, #tpu.memory_space<vmem>>, vector<1x1x256xf32>
    %165 = vector.shape_cast %164 : vector<1x1x256xf32> to vector<1x256xf32>
    %166 = vector.broadcast %165 : vector<1x256xf32> to vector<16x256xf32>
    %167 = arith.addf %163, %166 : vector<16x256xf32>
    %168 = arith.addf %167, %6 : vector<16x256xf32>
    %c0_49 = arith.constant 0 : index
    %c0_50 = arith.constant 0 : index
    %c0_51 = arith.constant 0 : index
    %169 = vector.load %arg9[%c0_49, %c0_50, %c0_51] : memref<1x1x256xf32, #tpu.memory_space<vmem>>, vector<1x1x256xf32>
    %170 = vector.shape_cast %169 : vector<1x1x256xf32> to vector<1x256xf32>
    %c0_52 = arith.constant 0 : index
    %c0_53 = arith.constant 0 : index
    %c0_54 = arith.constant 0 : index
    %171 = vector.load %arg10[%c0_52, %c0_53, %c0_54] : memref<1x1x256xf32, #tpu.memory_space<vmem>>, vector<1x1x256xf32>
    %172 = vector.shape_cast %171 : vector<1x1x256xf32> to vector<1x256xf32>
    %cst_55 = arith.constant dense<0.000000e+00> : vector<16xf32>
    %173 = vector.multi_reduction <add>, %168, %cst_55 [1] : vector<16x256xf32> to vector<16xf32>
    %174 = vector.shape_cast %173 : vector<16xf32> to vector<16x1xf32>
    %cst_56 = arith.constant 0.00510204071 : f32
    %175 = vector.broadcast %cst_56 : f32 to vector<16x1xf32>
    %176 = arith.mulf %174, %175 : vector<16x1xf32>
    %177 = vector.broadcast %176 : vector<16x1xf32> to vector<16x256xf32>
    %178 = arith.subf %168, %177 : vector<16x256xf32>
    %cst_57 = arith.constant 0.000000e+00 : f32
    %179 = vector.shape_cast %2 : vector<1x256xi1> to vector<1x256xi1>
    %180 = vector.broadcast %179 : vector<1x256xi1> to vector<16x256xi1>
    %181 = vector.broadcast %cst_57 : f32 to vector<16x256xf32>
    %182 = arith.select %180, %178, %181 : vector<16x256xi1>, vector<16x256xf32>
    %183 = arith.mulf %182, %182 : vector<16x256xf32>
    %cst_58 = arith.constant dense<0.000000e+00> : vector<16xf32>
    %184 = vector.multi_reduction <add>, %183, %cst_58 [1] : vector<16x256xf32> to vector<16xf32>
    %185 = vector.shape_cast %184 : vector<16xf32> to vector<16x1xf32>
    %cst_59 = arith.constant 0.00510204071 : f32
    %186 = vector.broadcast %cst_59 : f32 to vector<16x1xf32>
    %187 = arith.mulf %185, %186 : vector<16x1xf32>
    %cst_60 = arith.constant 9.99999996E-13 : f32
    %188 = vector.broadcast %cst_60 : f32 to vector<16x1xf32>
    %189 = arith.addf %187, %188 : vector<16x1xf32>
    %190 = math.rsqrt %189 : vector<16x1xf32>
    %191 = vector.broadcast %190 : vector<16x1xf32> to vector<16x256xf32>
    %192 = arith.mulf %182, %191 : vector<16x256xf32>
    %193 = vector.broadcast %170 : vector<1x256xf32> to vector<16x256xf32>
    %194 = arith.mulf %192, %193 : vector<16x256xf32>
    %195 = vector.broadcast %172 : vector<1x256xf32> to vector<16x256xf32>
    %196 = arith.addf %194, %195 : vector<16x256xf32>
    %197 = arith.truncf %196 : vector<16x256xf32> to vector<16x256xbf16>
    %c0_61 = arith.constant 0 : index
    %c0_62 = arith.constant 0 : index
    %c0_63 = arith.constant 0 : index
    %198 = vector.load %arg11[%c0_61, %c0_62, %c0_63] : memref<1x256x256xbf16, #tpu.memory_space<vmem>>, vector<1x256x256xbf16>
    %199 = vector.shape_cast %198 : vector<1x256x256xbf16> to vector<256x256xbf16>
    %cst_64 = arith.constant dense<0.000000e+00> : vector<16x256xf32>
    %200 = tpu.matmul %197, %199, %cst_64 {dimension_numbers = #tpu.dot_dimension_numbers<[1], [0], [0], [1], [0, 0, 1, 1], [], []>} : vector<16x256xbf16>, vector<256x256xbf16>, vector<16x256xf32> -> vector<16x256xf32>
    %c0_65 = arith.constant 0 : index
    %c0_66 = arith.constant 0 : index
    %c0_67 = arith.constant 0 : index
    %201 = vector.load %arg12[%c0_65, %c0_66, %c0_67] : memref<1x1x256xf32, #tpu.memory_space<vmem>>, vector<1x1x256xf32>
    %202 = vector.shape_cast %201 : vector<1x1x256xf32> to vector<1x256xf32>
    %203 = vector.broadcast %202 : vector<1x256xf32> to vector<16x256xf32>
    %204 = arith.addf %200, %203 : vector<16x256xf32>
    %cst_68 = arith.constant 5.000000e-01 : f32
    %205 = vector.broadcast %cst_68 : f32 to vector<16x256xf32>
    %206 = arith.mulf %205, %204 : vector<16x256xf32>
    %cst_69 = arith.constant 4.471500e-02 : f32
    %207 = vector.broadcast %cst_69 : f32 to vector<16x256xf32>
    %208 = arith.mulf %207, %204 : vector<16x256xf32>
    %209 = arith.mulf %208, %204 : vector<16x256xf32>
    %210 = arith.mulf %209, %204 : vector<16x256xf32>
    %211 = arith.addf %204, %210 : vector<16x256xf32>
    %cst_70 = arith.constant 0.797884583 : f32
    %212 = vector.broadcast %cst_70 : f32 to vector<16x256xf32>
    %213 = arith.mulf %212, %211 : vector<16x256xf32>
    %214 = math.tanh %213 : vector<16x256xf32>
    %cst_71 = arith.constant 1.000000e+00 : f32
    %215 = vector.broadcast %cst_71 : f32 to vector<16x256xf32>
    %216 = arith.addf %215, %214 : vector<16x256xf32>
    %217 = arith.mulf %206, %216 : vector<16x256xf32>
    %218 = arith.truncf %217 : vector<16x256xf32> to vector<16x256xbf16>
    %c0_72 = arith.constant 0 : index
    %c0_73 = arith.constant 0 : index
    %c0_74 = arith.constant 0 : index
    %219 = vector.load %arg13[%c0_72, %c0_73, %c0_74] : memref<1x256x256xbf16, #tpu.memory_space<vmem>>, vector<1x256x256xbf16>
    %220 = vector.shape_cast %219 : vector<1x256x256xbf16> to vector<256x256xbf16>
    %cst_75 = arith.constant dense<0.000000e+00> : vector<16x256xf32>
    %221 = tpu.matmul %218, %220, %cst_75 {dimension_numbers = #tpu.dot_dimension_numbers<[1], [0], [0], [1], [0, 0, 1, 1], [], []>} : vector<16x256xbf16>, vector<256x256xbf16>, vector<16x256xf32> -> vector<16x256xf32>
    %c0_76 = arith.constant 0 : index
    %c0_77 = arith.constant 0 : index
    %c0_78 = arith.constant 0 : index
    %222 = vector.load %arg14[%c0_76, %c0_77, %c0_78] : memref<1x1x256xf32, #tpu.memory_space<vmem>>, vector<1x1x256xf32>
    %223 = vector.shape_cast %222 : vector<1x1x256xf32> to vector<1x256xf32>
    %224 = vector.broadcast %223 : vector<1x256xf32> to vector<16x256xf32>
    %225 = arith.addf %221, %224 : vector<16x256xf32>
    %226 = arith.addf %225, %196 : vector<16x256xf32>
    %c0_79 = arith.constant 0 : index
    %c0_80 = arith.constant 0 : index
    %c0_81 = arith.constant 0 : index
    %227 = vector.load %arg15[%c0_79, %c0_80, %c0_81] : memref<1x1x256xf32, #tpu.memory_space<vmem>>, vector<1x1x256xf32>
    %228 = vector.shape_cast %227 : vector<1x1x256xf32> to vector<1x256xf32>
    %c0_82 = arith.constant 0 : index
    %c0_83 = arith.constant 0 : index
    %c0_84 = arith.constant 0 : index
    %229 = vector.load %arg16[%c0_82, %c0_83, %c0_84] : memref<1x1x256xf32, #tpu.memory_space<vmem>>, vector<1x1x256xf32>
    %230 = vector.shape_cast %229 : vector<1x1x256xf32> to vector<1x256xf32>
    %cst_85 = arith.constant dense<0.000000e+00> : vector<16xf32>
    %231 = vector.multi_reduction <add>, %226, %cst_85 [1] : vector<16x256xf32> to vector<16xf32>
    %232 = vector.shape_cast %231 : vector<16xf32> to vector<16x1xf32>
    %cst_86 = arith.constant 0.00510204071 : f32
    %233 = vector.broadcast %cst_86 : f32 to vector<16x1xf32>
    %234 = arith.mulf %232, %233 : vector<16x1xf32>
    %235 = vector.broadcast %234 : vector<16x1xf32> to vector<16x256xf32>
    %236 = arith.subf %226, %235 : vector<16x256xf32>
    %cst_87 = arith.constant 0.000000e+00 : f32
    %237 = vector.shape_cast %2 : vector<1x256xi1> to vector<1x256xi1>
    %238 = vector.broadcast %237 : vector<1x256xi1> to vector<16x256xi1>
    %239 = vector.broadcast %cst_87 : f32 to vector<16x256xf32>
    %240 = arith.select %238, %236, %239 : vector<16x256xi1>, vector<16x256xf32>
    %241 = arith.mulf %240, %240 : vector<16x256xf32>
    %cst_88 = arith.constant dense<0.000000e+00> : vector<16xf32>
    %242 = vector.multi_reduction <add>, %241, %cst_88 [1] : vector<16x256xf32> to vector<16xf32>
    %243 = vector.shape_cast %242 : vector<16xf32> to vector<16x1xf32>
    %cst_89 = arith.constant 0.00510204071 : f32
    %244 = vector.broadcast %cst_89 : f32 to vector<16x1xf32>
    %245 = arith.mulf %243, %244 : vector<16x1xf32>
    %cst_90 = arith.constant 9.99999996E-13 : f32
    %246 = vector.broadcast %cst_90 : f32 to vector<16x1xf32>
    %247 = arith.addf %245, %246 : vector<16x1xf32>
    %248 = math.rsqrt %247 : vector<16x1xf32>
    %249 = vector.broadcast %248 : vector<16x1xf32> to vector<16x256xf32>
    %250 = arith.mulf %240, %249 : vector<16x256xf32>
    %251 = vector.broadcast %228 : vector<1x256xf32> to vector<16x256xf32>
    %252 = arith.mulf %250, %251 : vector<16x256xf32>
    %253 = vector.broadcast %230 : vector<1x256xf32> to vector<16x256xf32>
    %254 = arith.addf %252, %253 : vector<16x256xf32>
    %c0_91 = arith.constant 0 : index
    %c0_92 = arith.constant 0 : index
    %255 = vector.load %arg20[%c0_91, %c0_92] : memref<16x256xf32, #tpu.memory_space<vmem>>, vector<16x256xf32>
    tpu.vector_store %arg20[%c0_91, %c0_92], %254 {strides = array<i32>} : memref<16x256xf32, #tpu.memory_space<vmem>>, vector<16x256xf32>,
    %c1_i32 = arith.constant 1 : i32
    %256 = arith.cmpi eq, %arg0, %c1_i32 : i32
    %257 = arith.extui %256 : i1 to i32
    %c0_i32_93 = arith.constant 0 : i32
    %258 = arith.cmpi ne, %257, %c0_i32_93 : i32
    scf.if %258 {
      %259 = arith.truncf %254 : vector<16x256xf32> to vector<16x256xbf16>
      %c0_94 = arith.constant 0 : index
      %c0_95 = arith.constant 0 : index
      %260 = vector.load %arg17[%c0_94, %c0_95] : memref<256x128xbf16, #tpu.memory_space<vmem>>, vector<256x128xbf16>
      %cst_96 = arith.constant dense<0.000000e+00> : vector<16x128xf32>
      %261 = tpu.matmul %259, %260, %cst_96 {dimension_numbers = #tpu.dot_dimension_numbers<[1], [0], [0], [1], [0, 0, 1, 1], [], []>} : vector<16x256xbf16>, vector<256x128xbf16>, vector<16x128xf32> -> vector<16x128xf32>
      %c0_97 = arith.constant 0 : index
      %c0_98 = arith.constant 0 : index
      %262 = vector.load %arg18[%c0_97, %c0_98] : memref<1x128xf32, #tpu.memory_space<vmem>>, vector<1x128xf32>
      %263 = vector.broadcast %262 : vector<1x128xf32> to vector<16x128xf32>
      %264 = arith.addf %261, %263 : vector<16x128xf32>
      %265 = tpu.iota {dimensions = array<i32: 1>} : vector<1x128xi32>
      %c3_i32 = arith.constant 3 : i32
      %266 = vector.broadcast %c3_i32 : i32 to vector<1x128xi32>
      %267 = arith.cmpi slt, %265, %266 : vector<1x128xi32>
      %cst_99 = arith.constant -1.000000e+30 : f32
      %268 = vector.shape_cast %267 : vector<1x128xi1> to vector<1x128xi1>
      %269 = vector.broadcast %268 : vector<1x128xi1> to vector<16x128xi1>
      %270 = vector.broadcast %cst_99 : f32 to vector<16x128xf32>
      %271 = arith.select %269, %264, %270 : vector<16x128xi1>, vector<16x128xf32>
      %cst_100 = arith.constant dense<0xFF800000> : vector<16xf32>
      %272 = vector.multi_reduction <maximumf>, %271, %cst_100 [1] : vector<16x128xf32> to vector<16xf32>
      %273 = vector.shape_cast %272 : vector<16xf32> to vector<16x1xf32>
      %274 = vector.broadcast %273 : vector<16x1xf32> to vector<16x128xf32>
      %275 = arith.subf %271, %274 : vector<16x128xf32>
      %276 = math.exp %275 : vector<16x128xf32>
      %cst_101 = arith.constant dense<0.000000e+00> : vector<16xf32>
      %277 = vector.multi_reduction <add>, %276, %cst_101 [1] : vector<16x128xf32> to vector<16xf32>
      %278 = vector.shape_cast %277 : vector<16xf32> to vector<16x1xf32>
      %279 = vector.broadcast %278 : vector<16x1xf32> to vector<16x128xf32>
      %280 = arith.divf %276, %279 : vector<16x128xf32>
      %c0_102 = arith.constant 0 : index
      %c0_103 = arith.constant 0 : index
      %281 = vector.load %arg19[%c0_102, %c0_103] : memref<16x128xf32, #tpu.memory_space<vmem>>, vector<16x128xf32>
      tpu.vector_store %arg19[%c0_102, %c0_103], %280 {strides = array<i32>} : memref<16x128xf32, #tpu.memory_space<vmem>>, vector<16x128xf32>,
    } else {
    }
    return
  }
  func.func @transform_0(%arg0: i32) -> (i32, i32) {
    %c0_i32 = arith.constant 0 : i32
    %c0_i32_0 = arith.constant 0 : i32
    %c0_i32_1 = arith.constant 0 : i32
    return %c0_i32, %c0_i32_0 : i32, i32
  }
  func.func @transform_1(%arg0: i32) -> (i32, i32) {
    %c0_i32 = arith.constant 0 : i32
    %c0_i32_0 = arith.constant 0 : i32
    %c0_i32_1 = arith.constant 0 : i32
    return %c0_i32, %c0_i32_0 : i32, i32
  }
  func.func @transform_2(%arg0: i32) -> (i32, i32) {
    %c0_i32 = arith.constant 0 : i32
    %c0_i32_0 = arith.constant 0 : i32
    %c0_i32_1 = arith.constant 0 : i32
    return %c0_i32, %c0_i32_0 : i32, i32
  }
  func.func @transform_3(%arg0: i32) -> (i32, i32) {
    %c0_i32 = arith.constant 0 : i32
    %c0_i32_0 = arith.constant 0 : i32
    %c0_i32_1 = arith.constant 0 : i32
    return %c0_i32, %c0_i32_0 : i32, i32
  }
  func.func @transform_4(%arg0: i32) -> (i32, i32, i32) {
    %c0_i32 = arith.constant 0 : i32
    %c0_i32_0 = arith.constant 0 : i32
    %c0_i32_1 = arith.constant 0 : i32
    return %arg0, %c0_i32, %c0_i32_0 : i32, i32, i32
  }
  func.func @transform_5(%arg0: i32) -> (i32, i32, i32) {
    %c0_i32 = arith.constant 0 : i32
    %c0_i32_0 = arith.constant 0 : i32
    %c0_i32_1 = arith.constant 0 : i32
    return %arg0, %c0_i32, %c0_i32_0 : i32, i32, i32
  }
  func.func @transform_6(%arg0: i32) -> (i32, i32, i32) {
    %c0_i32 = arith.constant 0 : i32
    %c0_i32_0 = arith.constant 0 : i32
    %c0_i32_1 = arith.constant 0 : i32
    return %arg0, %c0_i32, %c0_i32_0 : i32, i32, i32
  }
  func.func @transform_7(%arg0: i32) -> (i32, i32, i32) {
    %c0_i32 = arith.constant 0 : i32
    %c0_i32_0 = arith.constant 0 : i32
    %c0_i32_1 = arith.constant 0 : i32
    return %arg0, %c0_i32, %c0_i32_0 : i32, i32, i32
  }
  func.func @transform_8(%arg0: i32) -> (i32, i32, i32) {
    %c0_i32 = arith.constant 0 : i32
    %c0_i32_0 = arith.constant 0 : i32
    %c0_i32_1 = arith.constant 0 : i32
    return %arg0, %c0_i32, %c0_i32_0 : i32, i32, i32
  }
  func.func @transform_9(%arg0: i32) -> (i32, i32, i32) {
    %c0_i32 = arith.constant 0 : i32
    %c0_i32_0 = arith.constant 0 : i32
    %c0_i32_1 = arith.constant 0 : i32
    return %arg0, %c0_i32, %c0_i32_0 : i32, i32, i32
  }
  func.func @transform_10(%arg0: i32) -> (i32, i32, i32) {
    %c0_i32 = arith.constant 0 : i32
    %c0_i32_0 = arith.constant 0 : i32
    %c0_i32_1 = arith.constant 0 : i32
    return %arg0, %c0_i32, %c0_i32_0 : i32, i32, i32
  }
  func.func @transform_11(%arg0: i32) -> (i32, i32, i32) {
    %c0_i32 = arith.constant 0 : i32
    %c0_i32_0 = arith.constant 0 : i32
    %c0_i32_1 = arith.constant 0 : i32
    return %arg0, %c0_i32, %c0_i32_0 : i32, i32, i32
  }
  func.func @transform_12(%arg0: i32) -> (i32, i32, i32) {
    %c0_i32 = arith.constant 0 : i32
    %c0_i32_0 = arith.constant 0 : i32
    %c0_i32_1 = arith.constant 0 : i32
    return %arg0, %c0_i32, %c0_i32_0 : i32, i32, i32
  }
  func.func @transform_13(%arg0: i32) -> (i32, i32, i32) {
    %c0_i32 = arith.constant 0 : i32
    %c0_i32_0 = arith.constant 0 : i32
    %c0_i32_1 = arith.constant 0 : i32
    return %arg0, %c0_i32, %c0_i32_0 : i32, i32, i32
  }
  func.func @transform_14(%arg0: i32) -> (i32, i32, i32) {
    %c0_i32 = arith.constant 0 : i32
    %c0_i32_0 = arith.constant 0 : i32
    %c0_i32_1 = arith.constant 0 : i32
    return %arg0, %c0_i32, %c0_i32_0 : i32, i32, i32
  }
  func.func @transform_15(%arg0: i32) -> (i32, i32, i32) {
    %c0_i32 = arith.constant 0 : i32
    %c0_i32_0 = arith.constant 0 : i32
    %c0_i32_1 = arith.constant 0 : i32
    return %arg0, %c0_i32, %c0_i32_0 : i32, i32, i32
  }
  func.func @transform_16(%arg0: i32) -> (i32, i32) {
    %c0_i32 = arith.constant 0 : i32
    %c0_i32_0 = arith.constant 0 : i32
    %c0_i32_1 = arith.constant 0 : i32
    return %c0_i32, %c0_i32_0 : i32, i32
  }
  func.func @transform_17(%arg0: i32) -> (i32, i32) {
    %c0_i32 = arith.constant 0 : i32
    %c0_i32_0 = arith.constant 0 : i32
    %c0_i32_1 = arith.constant 0 : i32
    return %c0_i32, %c0_i32_0 : i32, i32
  }
  func.func @transform_18(%arg0: i32) -> (i32, i32) {
    %c0_i32 = arith.constant 0 : i32
    %c0_i32_0 = arith.constant 0 : i32
    %c0_i32_1 = arith.constant 0 : i32
    return %c0_i32, %c0_i32_0 : i32, i32
  }
}

</mosaic_0001>

<bundles_post_ra>
// kernel: electra_class_forward.1
= control target key start
LH: loop header
LB: loop body
LE: loop exit
PB: predicated region body
PF: predicated region fallthrough
CT: control target
= control target key end

     0   :  { %s8566_s0 = inlined_call_operand.vmem [shape: f32[16,256], index: 0, kind: input, shape index: {}]   ;;  %s8567_s1 = inlined_call_operand.vmem [shape: f32[2,8], index: 1, kind: input, shape index: {}]   ;;  %s8568_s2 = inlined_call_operand.hbm [shape: f32[1,256], index: 2, kind: input, shape index: {}]   ;;  %s8569_s3 = inlined_call_operand.hbm [shape: f32[1,256], index: 3, kind: input, shape index: {}]   ;;  %s8570_s4 = inlined_call_operand.hbm [shape: bf16[2,256,1536], index: 4, kind: input, shape index: {}]   ;;  %s8571_s5 = inlined_call_operand.hbm [shape: f32[2,1,1536], index: 5, kind: input, shape index: {}]   ;;  %s8572_s6 = inlined_call_operand.hbm [shape: bf16[2,512,256], index: 6, kind: input, shape index: {}]   ;;  %s8573_s7 = inlined_call_operand.hbm [shape: f32[2,1,256], index: 7, kind: input, shape index: {}]   ;;  %s8574_s8 = inlined_call_operand.hbm [shape: f32[2,1,256], index: 8, kind: input, shape index: {}]   ;;  %s8575_s9 = inlined_call_operand.hbm [shape: f32[2,1,256], index: 9, kind: input, shape index: {}]   ;;  %s8576_s10 = inlined_call_operand.hbm [shape: bf16[2,256,256], index: 10, kind: input, shape index: {}]   ;;  %s8577_s11 = inlined_call_operand.hbm [shape: f32[2,1,256], index: 11, kind: input, shape index: {}]   ;;  %s8578_s12 = inlined_call_operand.hbm [shape: bf16[2,256,256], index: 12, kind: input, shape index: {}]   ;;  %s8579_s13 = inlined_call_operand.hbm [shape: f32[2,1,256], index: 13, kind: input, shape index: {}]   ;;  %s8580_s14 = inlined_call_operand.hbm [shape: f32[2,1,256], index: 14, kind: input, shape index: {}]   ;;  %s8581_s15 = inlined_call_operand.hbm [shape: f32[2,1,256], index: 15, kind: input, shape index: {}]   ;;  %s8582_s16 = inlined_call_operand.hbm [shape: bf16[256,128], index: 16, kind: input, shape index: {}]   ;;  %s8583_s17 = inlined_call_operand.hbm [shape: f32[1,128], index: 17, kind: input, shape index: {}]   ;;  %s8584_s18 = inlined_call_operand.vmem [shape: f32[16,128], index: 18, kind: output, shape index: {}]  }
   0x1   :  { %8603 = sst [smem:[#allocation33_spill]] %s8566_s0 }
   0x2   :  { %8604 = sst [smem:[#allocation34_spill]] %s8567_s1 }
   0x3   :  { %8605 = sst [smem:[#allocation35_spill]] %s8568_s2 }
   0x4   :  { %8606 = sst [smem:[#allocation36_spill]] %s8569_s3 }
   0x5   :  { %8607 = sst [smem:[#allocation37_spill]] %s8570_s4 }
   0x6   :  { %8608 = sst [smem:[#allocation38_spill]] %s8571_s5 }
   0x7   :  { %8609 = sst [smem:[#allocation39_spill]] %s8580_s14 }
   0x8   :  { %8610 = sst [smem:[#allocation40_spill]] %s8581_s15 }
   0x9   :  { %8611 = sst [smem:[#allocation41_spill]] %s8582_s16 }
   0xa   :  { %8612 = sst [smem:[#allocation42_spill]] %s8584_s18 }
   0xb   :  { %23 = vsyncpa [#allocation4], 0 }
   0xc   :  { %24 = vsyncpa [#allocation6], 0 }
   0xd   :  { %25 = vsyncpa [#allocation21], 0  ;;  %s7359_s27 = smov 0   ;;  %s7361_s28 = smov 0  }
   0xe   :  { %s7363_s29 = smov 0   ;;  %s7365_s30 = smov 0  }
   0xf LB: > { %8613 = sst [smem:[#allocation27_spill]] %s7244_s28  ;;  %s7378_s0 = sadd.s32 4294967295, %s7252_s30   ;;  %s7252_s30 = sphi %s7365_s30, %s8648_s30   ;;  %s7248_s29 = sphi %s7363_s29, %s8652_s29   ;;  %s7244_s28 = sphi %s7361_s28, %s8651_s28   ;;  %s7240_s27 = sphi %s7359_s27, %s8649_s27  }
  0x10   : > { %8614 = sst [smem:[#allocation28_spill]] %s7378_s0  ;;  %s7381_s19 = sadd.s32 1, %s7252_s30  }
  0x11   : > { %8615 = sst [smem:[#allocation29_spill]] %s7381_s19  ;;  %s119_s1 = ssub.s32 %s7252_s30, %s7381_s19 }
  0x12   : > { %s122_s20 = sadd.s32 1, %s7248_s29  ;;  %p120_p0 = scmp.eq.s32.totalorder %s119_s1, 0 }
  0x13   : > { %p129_p1 = scmp.ne.s32.totalorder %s7248_s29, %s7244_s28  ;;  %p130_p2 = scmp.eq.s32.totalorder %s7252_s30, 0 }
  0x14   : > { %p135_p3 = scmp.ne.s32.totalorder %s7244_s28, %s7240_s27  ;;  %p136_p5 = scmp.eq.s32.totalorder %s7378_s0, 0 }
  0x15   : > { %s7391_s21 = scalar_select %p120_p0, %s7248_s29, %s122_s20  }
  0x16   : > { %p7393_p4 = por %p130_p2, %p129_p1  ;;  %p4832_p6 = scmp.ge.s32.totalorder %s7252_s30, 1 }
  0x17   : > { %8616 = sst [smem:[#allocation30_spill]] %s7391_s21  ;;  %p495_p7 = scmp.lt.s32.totalorder %s7252_s30, 3 }
  0x18   : > { %p7402_p8 = por %p136_p5, %p135_p3  ;;  %p4833_p9 = scmp.ne.s32.totalorder %s7378_s0, 0 }
  0x19   : > { %p7407_p10 = pnand %p4832_p6, %p495_p7  ;;  %s8622_s3 = sld [smem:[#allocation36_spill]] }
  0x1a   : > { %s8618_s2 = scalar_select %p7402_p8, 1, 0 }
  0x1b   : > { %s8620_s23 = scalar_select %p7407_p10, 1, 0 }
  0x1c   : > { %8619 = sst [smem:[#allocation31_spill]] %s8618_s2  ;;  %p6618_p11 = pneg %p7407_p10 }
  0x1d   : > { %8621 = sst [smem:[#allocation32_spill]] %s8620_s23  ;;  %s7254_s27 = smov [#allocation5]  }
  0x1e   : > { %s527_s1 = sshll.u32 %s7254_s27, 4  ;;  %s8623_s19 = sld [smem:[#allocation35_spill]]  ;;  %s528_s1 = int_to_ptr.vmem [resolvable:$true] %s527_s1 }
  0x1f   : > { %s525_s26 = sshll.u32 %s8622_s3, 4  ;;  %p7421_p12 = pnand %p6618_p11, %p136_p5  ;;  %s526_s26 = int_to_ptr.hbm [resolvable:$true] %s525_s26 }
  0x20   : > { %s8625_s16 = sld [smem:[#allocation41_spill]]  ;;  %s7255_s28 = smov [#allocation3]  }
  0x21   : > { %s515_s27 = sshll.u32 %s7255_s28, 4  ;;  %s551_s23 = sshll.u32 %s8583_s17, 4  ;;  %s516_s27 = int_to_ptr.vmem [resolvable:$true] %s515_s27  ;;  %s552_s23 = int_to_ptr.hbm [resolvable:$true] %s551_s23 }
  0x22   : > { %6624 = dma.hbm_to_vmem [thread:$0]  (!%p7421_p12), %s526_s26, 32, %s528_s1, [#allocation6]  }
  0x23   : > { %s7257_s15 = smov 64   ;;  %s7258_s14 = smov 4  }
  0x24   : > { %s513_s18 = sshll.u32 %s8623_s19, 4  ;;  %s7256_s19 = smov [#allocation19]   ;;  %s514_s18 = int_to_ptr.hbm [resolvable:$true] %s513_s18 }
  0x25   : > { %6621 = dma.hbm_to_vmem [thread:$0]  (!%p7421_p12), %s514_s18, 32, %s516_s27, [#allocation4]  }
  0x26   : > { %s536_s3 = sshll.u32 %s8625_s16, 4  ;;  %s538_s21 = sshll.u32 %s7256_s19, 4  ;;  %s537_s3 = int_to_ptr.hbm [resolvable:$true] %s536_s3  ;;  %s539_s21 = int_to_ptr.vmem [resolvable:$true] %s538_s21 }
  0x27   : > { %6627 = dma.hbm_to_vmem [thread:$0]  (!%p7421_p12), %s537_s3, 2048, %s539_s21, [#allocation6], %s7257_s15, %s7257_s15, %s7258_s14  }
  0x28   : > { %s7259_s28 = smov [#allocation20]   ;;  %p4837_p13 = scmp.ge.s32.totalorder %s7252_s30, 2 }
  0x29   : > { %s553_s24 = sshll.u32 %s7259_s28, 4  ;;  %s564_s18 = sand.u32 (!%p4837_p13), 1, %s7252_s30   ;;  %s554_s24 = int_to_ptr.vmem [resolvable:$true] %s553_s24 }
  0x2a   : > { %6630 = dma.hbm_to_vmem [thread:$0]  (!%p7421_p12), %s552_s23, 16, %s554_s24, [#allocation21]  }
  0x2b   : > { %560 = sbr.rel (%p4837_p13) target bundleno = 244 (0xf4), region = 40  ;;  %s7442_s0 = sand.u32 (!%p4837_p13), 1, %s7248_s29  }
  0x2c   : > { %s6572_s26 = smul.u32 (!%p4837_p13), 1536, %s7442_s0  ;;  %s8626_s4 = sld [smem:[#allocation37_spill]] (!%p4837_p13) }
  0x2d   : > { %s6573_s3 = smul.u32 (!%p4837_p13), 1536, %s7252_s30  ;;  %s7450_s19 = scalar_lea.sflag (!%p4837_p13), [#allocation4], %s564_s18 }
  0x2e   : > { %s568_s2 = scalar_lea.vmem (!%p4837_p13), [#allocation7], %s6572_s26  ;;  %s6574_s27 = smul.u32 (!%p4837_p13), 12, %s7442_s0 }
  0x2f   : > { %s576_s23 = sshll.u32 (!%p4837_p13), %s568_s2, 4  ;;  %s577_s23 = int_to_ptr.vmem [resolvable:$true] %s576_s23 }
  0x32   : > { %s573_s1 = scalar_lea.hbm %s8626_s4, %s6573_s3  ;;  %s6872_s14 = scalar_lea.hbm %s8626_s4, 3072 }
  0x33   : > { %s574_s25 = sshll.u32 %s573_s1, 4  ;;  %s575_s25 = int_to_ptr.hbm [resolvable:$true] %s574_s25 }
  0x34   : > { %s6866_s21 = sshra.s32 %s575_s25, 4  ;;  %s6867_s21 = int_to_ptr.hbm [resolvable:$true] %s6866_s21 }
  0x35   : > { %s6868_s20 = scalar_lea.hbm %s6867_s21, 1536  ;;  %p6873_p3 = scmp.lt.s32.totalorder %s6867_s21, %s8626_s4 }
  0x36   : > { %p6869_p0 = scmp.ne.s32.totalorder %s6867_s21, %s6868_s20  ;;  %p6874_p6 = scmp.lt.s32.totalorder %s6872_s14, %s6868_s20 }
  0x38   : > { %p6870_p1 = pnand %p6869_p0, %p7393_p4  ;;  %p6875_p7 = por %p6874_p6, %p6873_p3 }
  0x3a   : > { %p6871_p2 = pneg %p6870_p1 }
  0x3c   : > { %p6876_p11 = pnand %p6875_p7, %p6871_p2 }
  0x3e   : > { %6879 = shalt.err (!%p6876_p11)
}
  0x3f   : > { %s7260_s18 = smov 768   ;;  %s7261_s15 = smov 48  }
  0x40   : > { %6586 = dma.hbm_to_vmem [thread:$0]  (%p7393_p4), %s575_s25, 24576, %s577_s23, %s7450_s19, %s7260_s18, %s7260_s18, %s7261_s15  }
  0x41   : > { %s6575_s1 = smul.u32 12, %s7252_s30  ;;  %s590_s2 = scalar_lea.vmem [#allocation8], %s6574_s27 }
  0x42   : > { %s598_s28 = sshll.u32 %s590_s2, 4  ;;  %s4839_s24 = sshll.u32 %s7442_s0, 9  ;;  %s599_s28 = int_to_ptr.vmem [resolvable:$true] %s598_s28 }
  0x43   : > { %s8627_s5 = sld [smem:[#allocation38_spill]]  ;;  %s6233_s26 = sshll.u32 %s7252_s30, 9 }
  0x49   : > { %s594_s20 = scalar_lea.hbm %s8627_s5, %s6575_s1  ;;  %s6900_s27 = scalar_lea.hbm %s8627_s5, 24 }
  0x4a   : > { %s596_s14 = sshll.u32 %s594_s20, 4  ;;  %s597_s14 = int_to_ptr.hbm [resolvable:$true] %s596_s14 }
  0x4b   : > { %s6894_s4 = sshra.s32 %s597_s14, 4  ;;  %s6895_s4 = int_to_ptr.hbm [resolvable:$true] %s6894_s4 }
  0x4c   : > { %s6896_s16 = scalar_lea.hbm %s6895_s4, 12  ;;  %p6901_p1 = scmp.lt.s32.totalorder %s6895_s4, %s8627_s5 }
  0x4d   : > { %p6897_p12 = scmp.ne.s32.totalorder %s6895_s4, %s6896_s16  ;;  %p6902_p2 = scmp.lt.s32.totalorder %s6900_s27, %s6896_s16 }
  0x4f   : > { %p6898_p13 = pnand %p6897_p12, %p7393_p4  ;;  %p6903_p3 = por %p6902_p2, %p6901_p1 }
  0x51   : > { %p6899_p0 = pneg %p6898_p13 }
  0x53   : > { %p6904_p6 = pnand %p6903_p3, %p6899_p0 }
  0x55   : > { %6907 = shalt.err (!%p6904_p6)
}
  0x56   : > { %6587 = dma.hbm_to_vmem [thread:$0]  (%p7393_p4), %s597_s14, 192, %s599_s28, %s7450_s19  }
  0x57   : > { %s614_s3 = scalar_lea.hbm %s8572_s6, %s6233_s26  ;;  %s609_s21 = scalar_lea.vmem [#allocation9], %s4839_s24 }
  0x58   : > { %s617_s20 = sshll.u32 %s609_s21, 4  ;;  %s615_s23 = sshll.u32 %s614_s3, 4  ;;  %s618_s20 = int_to_ptr.vmem [resolvable:$true] %s617_s20  ;;  %s616_s23 = int_to_ptr.hbm [resolvable:$true] %s615_s23 }
  0x59   : > { %s7484_s4 = sshll.u32 %s7442_s0, 1  ;;  %s6922_s16 = sshra.s32 %s616_s23, 4  ;;  %s6923_s16 = int_to_ptr.hbm [resolvable:$true] %s6922_s16 }
  0x5a   : > { %s6924_s25 = scalar_lea.hbm %s6923_s16, 512  ;;  %s6928_s14 = scalar_lea.hbm %s8572_s6, 1024 }
  0x5b   : > { %p6925_p7 = scmp.ne.s32.totalorder %s6923_s16, %s6924_s25  ;;  %p6929_p13 = scmp.lt.s32.totalorder %s6923_s16, %s8572_s6 }
  0x5c   : > { %p6930_p0 = scmp.lt.s32.totalorder %s6928_s14, %s6924_s25 }
  0x5d   : > { %p6926_p11 = pnand %p6925_p7, %p7393_p4 }
  0x5e   : > { %p6931_p1 = por %p6930_p0, %p6929_p13 }
  0x5f   : > { %p6927_p12 = pneg %p6926_p11 }
  0x61   : > { %p6932_p2 = pnand %p6931_p1, %p6927_p12 }
  0x63   : > { %6935 = shalt.err (!%p6932_p2)
}
  0x64   : > { %s8597_s24 = smov 128   ;;  %s8599_s15 = smov 8  }
  0x65   : > { %6588 = dma.hbm_to_vmem [thread:$0]  (%p7393_p4), %s616_s23, 8192, %s618_s20, %s7450_s19, %s8597_s24, %s8597_s24, %s8599_s15  }
  0x66   : > { %s7501_s1 = sshll.u32 %s7252_s30, 1  ;;  %s631_s16 = scalar_lea.vmem [#allocation10], %s7484_s4 }
  0x67   : > { %s635_s21 = scalar_lea.hbm %s8573_s7, %s7501_s1  ;;  %s639_s25 = sshll.u32 %s631_s16, 4  ;;  %s640_s25 = int_to_ptr.vmem [resolvable:$true] %s639_s25 }
  0x68   : > { %s637_s27 = sshll.u32 %s635_s21, 4  ;;  %s6956_s18 = scalar_lea.hbm %s8573_s7, 4  ;;  %s638_s27 = int_to_ptr.hbm [resolvable:$true] %s637_s27 }
  0x69   : > { %s6950_s28 = sshra.s32 %s638_s27, 4  ;;  %s6951_s28 = int_to_ptr.hbm [resolvable:$true] %s6950_s28 }
  0x6a   : > { %s6952_s14 = scalar_lea.hbm %s6951_s28, 2  ;;  %p6957_p11 = scmp.lt.s32.totalorder %s6951_s28, %s8573_s7 }
  0x6b   : > { %p6953_p3 = scmp.ne.s32.totalorder %s6951_s28, %s6952_s14  ;;  %p6958_p12 = scmp.lt.s32.totalorder %s6956_s18, %s6952_s14 }
  0x6d   : > { %p6954_p6 = pnand %p6953_p3, %p7393_p4  ;;  %p6959_p13 = por %p6958_p12, %p6957_p11 }
  0x6f   : > { %p6955_p7 = pneg %p6954_p6 }
  0x71   : > { %p6960_p0 = pnand %p6959_p13, %p6955_p7 }
  0x73   : > { %6963 = shalt.err (!%p6960_p0)
}
  0x74   : > { %6589 = dma.hbm_to_vmem [thread:$0]  (%p7393_p4), %s638_s27, 32, %s640_s25, %s7450_s19  }
  0x75   : > { %s654_s21 = scalar_lea.hbm %s8574_s8, %s7501_s1  ;;  %s650_s16 = scalar_lea.vmem [#allocation11], %s7484_s4 }
  0x76   : > { %s658_s20 = sshll.u32 %s650_s16, 4  ;;  %s656_s23 = sshll.u32 %s654_s21, 4  ;;  %s659_s20 = int_to_ptr.vmem [resolvable:$true] %s658_s20  ;;  %s657_s23 = int_to_ptr.hbm [resolvable:$true] %s656_s23 }
  0x77   : > { %s6978_s24 = sshra.s32 %s657_s23, 4  ;;  %s6984_s25 = scalar_lea.hbm %s8574_s8, 4  ;;  %s6979_s24 = int_to_ptr.hbm [resolvable:$true] %s6978_s24 }
  0x78   : > { %s6980_s28 = scalar_lea.hbm %s6979_s24, 2  ;;  %p6985_p6 = scmp.lt.s32.totalorder %s6979_s24, %s8574_s8 }
  0x79   : > { %p6981_p1 = scmp.ne.s32.totalorder %s6979_s24, %s6980_s28  ;;  %p6986_p7 = scmp.lt.s32.totalorder %s6984_s25, %s6980_s28 }
  0x7b   : > { %p6982_p2 = pnand %p6981_p1, %p7393_p4  ;;  %p6987_p11 = por %p6986_p7, %p6985_p6 }
  0x7d   : > { %p6983_p3 = pneg %p6982_p2 }
  0x7f   : > { %p6988_p12 = pnand %p6987_p11, %p6983_p3 }
  0x81   : > { %6991 = shalt.err (!%p6988_p12)
}
  0x82   : > { %6590 = dma.hbm_to_vmem [thread:$0]  (%p7393_p4), %s657_s23, 32, %s659_s20, %s7450_s19  }
  0x83   : > { %s673_s21 = scalar_lea.hbm %s8575_s9, %s7501_s1  ;;  %s669_s16 = scalar_lea.vmem [#allocation12], %s7484_s4 }
  0x84   : > { %s677_s14 = sshll.u32 %s669_s16, 4  ;;  %s675_s18 = sshll.u32 %s673_s21, 4  ;;  %s678_s14 = int_to_ptr.vmem [resolvable:$true] %s677_s14  ;;  %s676_s18 = int_to_ptr.hbm [resolvable:$true] %s675_s18 }
  0x85   : > { %s8601_s24 = sshll.u32 %s7442_s0, 8  ;;  %s7006_s28 = sshra.s32 %s676_s18, 4  ;;  %s7007_s28 = int_to_ptr.hbm [resolvable:$true] %s7006_s28 }
  0x86   : > { %s7008_s25 = scalar_lea.hbm %s7007_s28, 2  ;;  %s7012_s20 = scalar_lea.hbm %s8575_s9, 4 }
  0x87   : > { %p7009_p13 = scmp.ne.s32.totalorder %s7007_s28, %s7008_s25  ;;  %p7013_p2 = scmp.lt.s32.totalorder %s7007_s28, %s8575_s9 }
  0x88   : > { %p7014_p3 = scmp.lt.s32.totalorder %s7012_s20, %s7008_s25 }
  0x89   : > { %p7010_p0 = pnand %p7009_p13, %p7393_p4 }
  0x8a   : > { %p7015_p6 = por %p7014_p3, %p7013_p2 }
  0x8b   : > { %p7011_p1 = pneg %p7010_p0 }
  0x8d   : > { %p7016_p7 = pnand %p7015_p6, %p7011_p1 }
  0x8f   : > { %7019 = shalt.err (!%p7016_p7)
}
  0x90   : > { %6591 = dma.hbm_to_vmem [thread:$0]  (%p7393_p4), %s676_s18, 32, %s678_s14, %s7450_s19  }
  0x91   : > { %s8602_s3 = sshll.u32 %s7252_s30, 8  ;;  %s688_s28 = scalar_lea.vmem [#allocation13], %s8601_s24 }
  0x92   : > { %s693_s27 = scalar_lea.hbm %s8576_s10, %s8602_s3  ;;  %s696_s25 = sshll.u32 %s688_s28, 4  ;;  %s697_s25 = int_to_ptr.vmem [resolvable:$true] %s696_s25 }
  0x93   : > { %s694_s26 = sshll.u32 %s693_s27, 4  ;;  %s7040_s2 = scalar_lea.hbm %s8576_s10, 512  ;;  %s695_s26 = int_to_ptr.hbm [resolvable:$true] %s694_s26 }
  0x94   : > { %s7034_s20 = sshra.s32 %s695_s26, 4  ;;  %s7035_s20 = int_to_ptr.hbm [resolvable:$true] %s7034_s20 }
  0x95   : > { %s7036_s23 = scalar_lea.hbm %s7035_s20, 256  ;;  %p7041_p0 = scmp.lt.s32.totalorder %s7035_s20, %s8576_s10 }
  0x96   : > { %p7037_p11 = scmp.ne.s32.totalorder %s7035_s20, %s7036_s23  ;;  %p7042_p1 = scmp.lt.s32.totalorder %s7040_s2, %s7036_s23 }
  0x98   : > { %p7038_p12 = pnand %p7037_p11, %p7393_p4  ;;  %p7043_p2 = por %p7042_p1, %p7041_p0 }
  0x9a   : > { %p7039_p13 = pneg %p7038_p12 }
  0x9c   : > { %p7044_p3 = pnand %p7043_p2, %p7039_p13 }
  0x9e   : > { %7047 = shalt.err (!%p7044_p3)
}
  0x9f   : > { %s8628_s16 = smov 8   ;;  %s8629_s27 = smov 128  }
  0xa0   : > { %6592 = dma.hbm_to_vmem [thread:$0]  (%p7393_p4), %s695_s26, 4096, %s697_s25, %s7450_s19, %s8629_s27, %s8629_s27, %s8628_s16  }
  0xa1   : > { %s714_s18 = scalar_lea.hbm %s8577_s11, %s7501_s1  ;;  %s710_s15 = scalar_lea.vmem [#allocation14], %s7484_s4 }
  0xa2   : > { %s718_s20 = sshll.u32 %s710_s15, 4  ;;  %s716_s23 = sshll.u32 %s714_s18, 4  ;;  %s719_s20 = int_to_ptr.vmem [resolvable:$true] %s718_s20  ;;  %s717_s23 = int_to_ptr.hbm [resolvable:$true] %s716_s23 }
  0xa3   : > { %s7062_s2 = sshra.s32 %s717_s23, 4  ;;  %s7068_s25 = scalar_lea.hbm %s8577_s11, 4  ;;  %s7063_s2 = int_to_ptr.hbm [resolvable:$true] %s7062_s2 }
  0xa4   : > { %s7064_s21 = scalar_lea.hbm %s7063_s2, 2  ;;  %p7069_p12 = scmp.lt.s32.totalorder %s7063_s2, %s8577_s11 }
  0xa5   : > { %p7065_p6 = scmp.ne.s32.totalorder %s7063_s2, %s7064_s21  ;;  %p7070_p13 = scmp.lt.s32.totalorder %s7068_s25, %s7064_s21 }
  0xa7   : > { %p7066_p7 = pnand %p7065_p6, %p7393_p4  ;;  %p7071_p0 = por %p7070_p13, %p7069_p12 }
  0xa9   : > { %p7067_p11 = pneg %p7066_p7 }
  0xab   : > { %p7072_p1 = pnand %p7071_p0, %p7067_p11 }
  0xad   : > { %7075 = shalt.err (!%p7072_p1)
}
  0xae   : > { %6593 = dma.hbm_to_vmem [thread:$0]  (%p7393_p4), %s717_s23, 32, %s719_s20, %s7450_s19  }
  0xaf   : > { %s8630_s28 = sshll.u32 %s7252_s30, 8  ;;  %s8631_s3 = sshll.u32 %s7442_s0, 8 }
  0xb0   : > { %s734_s24 = scalar_lea.hbm %s8578_s12, %s8630_s28  ;;  %s729_s15 = scalar_lea.vmem [#allocation15], %s8631_s3 }
  0xb1   : > { %s737_s5 = sshll.u32 %s729_s15, 4  ;;  %s735_s2 = sshll.u32 %s734_s24, 4  ;;  %s738_s5 = int_to_ptr.vmem [resolvable:$true] %s737_s5  ;;  %s736_s2 = int_to_ptr.hbm [resolvable:$true] %s735_s2 }
  0xb2   : > { %s7090_s21 = sshra.s32 %s736_s2, 4  ;;  %s7096_s30 = scalar_lea.hbm %s8578_s12, 512  ;;  %s7091_s21 = int_to_ptr.hbm [resolvable:$true] %s7090_s21 }
  0xb3   : > { %s7092_s25 = scalar_lea.hbm %s7091_s21, 256  ;;  %p7097_p7 = scmp.lt.s32.totalorder %s7091_s21, %s8578_s12 }
  0xb4   : > { %p7093_p2 = scmp.ne.s32.totalorder %s7091_s21, %s7092_s25  ;;  %p7098_p11 = scmp.lt.s32.totalorder %s7096_s30, %s7092_s25 }
  0xb6   : > { %p7094_p3 = pnand %p7093_p2, %p7393_p4  ;;  %p7099_p12 = por %p7098_p11, %p7097_p7 }
  0xb8   : > { %p7095_p6 = pneg %p7094_p3 }
  0xba   : > { %p7100_p13 = pnand %p7099_p12, %p7095_p6 }
  0xbc   : > { %7103 = shalt.err (!%p7100_p13)
}
  0xbd   : > { %6594 = dma.hbm_to_vmem [thread:$0]  (%p7393_p4), %s736_s2, 4096, %s738_s5, %s7450_s19, %s8629_s27, %s8629_s27, %s8628_s16  }
  0xbe   : > { %s755_s18 = scalar_lea.hbm %s8579_s13, %s7501_s1  ;;  %s751_s24 = scalar_lea.vmem [#allocation16], %s7484_s4 }
  0xbf   : > { %s759_s3 = sshll.u32 %s751_s24, 4  ;;  %s757_s15 = sshll.u32 %s755_s18, 4  ;;  %s760_s3 = int_to_ptr.vmem [resolvable:$true] %s759_s3  ;;  %s758_s15 = int_to_ptr.hbm [resolvable:$true] %s757_s15 }
  0xc0   : > { %s7118_s21 = sshra.s32 %s758_s15, 4  ;;  %s7124_s16 = scalar_lea.hbm %s8579_s13, 4  ;;  %s7119_s21 = int_to_ptr.hbm [resolvable:$true] %s7118_s21 }
  0xc1   : > { %s7120_s25 = scalar_lea.hbm %s7119_s21, 2  ;;  %p7125_p3 = scmp.lt.s32.totalorder %s7119_s21, %s8579_s13 }
  0xc2   : > { %p7121_p0 = scmp.ne.s32.totalorder %s7119_s21, %s7120_s25  ;;  %p7126_p6 = scmp.lt.s32.totalorder %s7124_s16, %s7120_s25 }
  0xc4   : > { %p7122_p1 = pnand %p7121_p0, %p7393_p4  ;;  %p7127_p7 = por %p7126_p6, %p7125_p3 }
  0xc6   : > { %p7123_p2 = pneg %p7122_p1 }
  0xc8   : > { %p7128_p11 = pnand %p7127_p7, %p7123_p2 }
  0xca   : > { %7131 = shalt.err (!%p7128_p11)
}
  0xcb   : > { %6595 = dma.hbm_to_vmem [thread:$0]  (%p7393_p4), %s758_s15, 32, %s760_s3, %s7450_s19  }
  0xcc   : > { %s8632_s23 = sld [smem:[#allocation39_spill]]  ;;  %s770_s0 = scalar_lea.vmem [#allocation17], %s7484_s4 }
  0xcd   : > { %s778_s28 = sshll.u32 %s770_s0, 4  ;;  %s779_s28 = int_to_ptr.vmem [resolvable:$true] %s778_s28 }
  0xd2   : > { %s774_s14 = scalar_lea.hbm %s8632_s23, %s7501_s1  ;;  %s7152_s3 = scalar_lea.hbm %s8632_s23, 4 }
  0xd3   : > { %s776_s18 = sshll.u32 %s774_s14, 4  ;;  %s777_s18 = int_to_ptr.hbm [resolvable:$true] %s776_s18 }
  0xd4   : > { %s7146_s24 = sshra.s32 %s777_s18, 4  ;;  %s7147_s24 = int_to_ptr.hbm [resolvable:$true] %s7146_s24 }
  0xd5   : > { %s7148_s21 = scalar_lea.hbm %s7147_s24, 2  ;;  %p7153_p1 = scmp.lt.s32.totalorder %s7147_s24, %s8632_s23 }
  0xd6   : > { %p7149_p12 = scmp.ne.s32.totalorder %s7147_s24, %s7148_s21  ;;  %p7154_p2 = scmp.lt.s32.totalorder %s7152_s3, %s7148_s21 }
  0xd8   : > { %p7150_p13 = pnand %p7149_p12, %p7393_p4  ;;  %p7155_p3 = por %p7154_p2, %p7153_p1 }
  0xda   : > { %p7151_p0 = pneg %p7150_p13 }
  0xdc   : > { %p7156_p6 = pnand %p7155_p3, %p7151_p0 }
  0xde   : > { %7159 = shalt.err (!%p7156_p6)
}
  0xdf   : > { %6596 = dma.hbm_to_vmem [thread:$0]  (%p7393_p4), %s777_s18, 32, %s779_s28, %s7450_s19  }
  0xe0   : > { %s8633_s5 = sld [smem:[#allocation40_spill]]  ;;  %s789_s30 = scalar_lea.vmem [#allocation18], %s7484_s4 }
  0xe1   : > { %s797_s14 = sshll.u32 %s789_s30, 4  ;;  %s798_s14 = int_to_ptr.vmem [resolvable:$true] %s797_s14 }
  0xe6   : > { %s793_s2 = scalar_lea.hbm %s8633_s5, %s7501_s1  ;;  %s7180_s28 = scalar_lea.hbm %s8633_s5, 4 }
  0xe7   : > { %s795_s0 = sshll.u32 %s793_s2, 4  ;;  %s796_s0 = int_to_ptr.hbm [resolvable:$true] %s795_s0 }
  0xe8   : > { %s7174_s24 = sshra.s32 %s796_s0, 4  ;;  %s7175_s24 = int_to_ptr.hbm [resolvable:$true] %s7174_s24 }
  0xe9   : > { %s7176_s21 = scalar_lea.hbm %s7175_s24, 2  ;;  %p7181_p13 = scmp.lt.s32.totalorder %s7175_s24, %s8633_s5 }
  0xea   : > { %p7177_p7 = scmp.ne.s32.totalorder %s7175_s24, %s7176_s21  ;;  %p7182_p0 = scmp.lt.s32.totalorder %s7180_s28, %s7176_s21 }
  0xec   : > { %p7178_p11 = pnand %p7177_p7, %p7393_p4  ;;  %p7183_p1 = por %p7182_p0, %p7181_p13 }
  0xee   : > { %p7179_p12 = pneg %p7178_p11 }
  0xf0   : > { %p7184_p2 = pnand %p7183_p1, %p7179_p12 }
  0xf2   : > { %7187 = shalt.err (!%p7184_p2)
}
  0xf3   : > { %6597 = dma.hbm_to_vmem [thread:$0]  (%p7393_p4), %s796_s0, 32, %s798_s14, %s7450_s19  }
  0xf4 PF: > { %806 = sbr.rel (%p7407_p10) target bundleno = 2825 (0xb09), region = 92  ;;  %s8635_s1 = sld [smem:[#allocation28_spill]] (!%p7407_p10) }
  0xf9   : > { %7219 = dma.done.wait (%p136_p5), [#allocation4], 32  }
  0xfa   : > { %7221 = vsyncadd (%p136_p5), [#allocation4], 4294967264 }
  0xfb   : > { %7223 = dma.done.wait (%p136_p5), [#allocation6], 32  }
  0xfc   : > { %7225 = vsyncadd (%p136_p5), [#allocation6], 4294967264  ;;  %s8636_s22 = sld [smem:[#allocation27_spill]]  ;;  %s818_s19 = sand.u32 1, %s8635_s1  }
  0xfd   : > { %s819_s27 = scalar_lea.sflag [#allocation4], %s818_s19 }
 0x102   : > { %s820_s20 = sand.u32 1, %s8636_s22  }
 0x103   : > { %s6576_s16 = smul.u32 1536, %s820_s20 }
 0x105   : > { %s7671_s2 = scalar_lea.vmem [#allocation7], %s6576_s16 }
 0x106   : > { %7227 = dma.done.wait (%p7402_p8), %s819_s27, 41376  }
 0x107   : > { %7229 = vsyncadd (%p7402_p8), %s819_s27, 4294925920  ;;  %s6577_s30 = smul.u32 12, %s820_s20  ;;  %s4865_s14 = sshll.u32 %s820_s20, 9 }
 0x108   : > { %s7677_s0 = sshll.u32 %s820_s20, 1  ;;  %s4869_s24 = sshll.u32 %s820_s20, 8 }
 0x109   : > { %s7679_s21 = scalar_lea.vmem [#allocation8], %s6577_s30  ;;  %s7681_s25 = scalar_lea.vmem [#allocation9], %s4865_s14 }
 0x10a   : > { %s852_s26 = scalar_lea.vmem [#allocation10], %s7677_s0  ;;  %s862_s28 = scalar_lea.vmem [#allocation11], %s7677_s0 }
 0x10b   : > { %s7686_s3 = scalar_lea.vmem [#allocation13], %s4869_s24  ;;  %s7689_s22 = scalar_lea.vmem [#allocation15], %s4869_s24 }
 0x10c   : > { %7231 = dma.done.wait (%p136_p5), [#allocation6], 2048  }
 0x10d   : > { %7233 = vsyncadd (%p136_p5), [#allocation6], 4294965248 }
 0x10e   : > { %7235 = dma.done.wait (%p136_p5), [#allocation21], 16  }
 0x10f   : > { %7237 = vsyncadd (%p136_p5), [#allocation21], 4294967280  ;;  %v1046_v0 = vlaneseq  ;;  %s8638_s30 = sld [smem:[#allocation33_spill]] (!%p4833_p9) }
 0x111   : > { %v7702_v1 = vand.u32 127, %v1046_v0  ;;  %1054 = sbr.rel (%p4833_p9) target bundleno = 560 (0x230), region = 160 }
 0x113   : > { %v7705_v2 = vadd.s32 128, %v7702_v1 }
 0x115   : > { %vm1050_vm0 = vcmp.lt.s32.totalorder %v7705_v2, 196  ;;  %s8639_s14 = smov (!%p4833_p9), %s8638_s30 }
 0x116   : > { %v1055_v3 = vld [vmem:[%s8638_s30] sm:$0xff]  ;;  %v1056_v4 = vld [vmem:[%s8639_s14 + $0x8] sm:$0xff]  ;;  %v1057_v6 = vld [vmem:[%s8639_s14 + $0x10] sm:$0xff] }
 0x117   : > { %v1061_v5 = vadd.f32 %v1056_v4, %v1055_v3  ;;  %v1058_v7 = vld [vmem:[%s8639_s14 + $0x18] sm:$0xff]  ;;  %v1059_v35 = vld [vmem:[#allocation3] sm:$0x3]  ;;  %v1060_v38 = vld [vmem:[#allocation5] sm:$0x3] }
 0x118   : > { %v1064_v8 = vadd.f32 %v1058_v7, %v1057_v6  ;;  %v1120_v41 = vperm.slane %v1059_v35, 0  ;;  %v1121_v42 = vperm.slane %v1059_v35, 1  ;;  %v1129_v45 = vperm.slane %v1060_v38, 0 }
 0x119   : > { %1062 = vadd.xlane.f32.xlu0 %v1061_v5  ;;  %v1130_v46 = vperm.slane %v1060_v38, 1 }
 0x121   : > { %1065 = vadd.xlane.f32.xlu0 %v1064_v8 }
 0x18c   : > { %v1063_v9 = vpop.xlane.xlu0 %1062 }
 0x18d   : > { %v1067_v10 = vmul.f32 0.0051020407, %v1063_v9 }
 0x18f   : > { %v1069_v11 = vsub.f32 %v1055_v3, %v1067_v10  ;;  %v1070_v12 = vsub.f32 %v1056_v4, %v1067_v10 }
 0x191   : > { %v1078_v13 = vsel %vm1050_vm0, %v1070_v12, 0.0  ;;  %v1081_v14 = vmul.f32 %v1069_v11, %v1069_v11 }
 0x192   : > { %v1082_v15 = vmul.f32 %v1078_v13, %v1078_v13 }
 0x194   : > { %v1066_v16 = vpop.xlane.xlu0 %1065  ;;  %v1085_v17 = vadd.f32 %v1082_v15, %v1081_v14 }
 0x195   : > { %v1068_v18 = vmul.f32 0.0051020407, %v1066_v16 }
 0x196   : > { %1086 = vadd.xlane.f32.xlu1 %v1085_v17 }
 0x197   : > { %v1071_v19 = vsub.f32 %v1057_v6, %v1068_v18  ;;  %v1072_v20 = vsub.f32 %v1058_v7, %v1068_v18 }
 0x199   : > { %v1080_v21 = vsel %vm1050_vm0, %v1072_v20, 0.0  ;;  %v1083_v22 = vmul.f32 %v1071_v19, %v1071_v19 }
 0x19a   : > { %v1084_v23 = vmul.f32 %v1080_v21, %v1080_v21 }
 0x19c   : > { %v1088_v24 = vadd.f32 %v1084_v23, %v1083_v22 }
 0x19e   : > { %1089 = vadd.xlane.f32.xlu1 %v1088_v24 }
 0x209   : > { %v1087_v25 = vpop.xlane.xlu1 %1086 }
 0x20a   : > { %v1091_v26 = vmul.f32 0.0051020407, %v1087_v25 }
 0x20c   : > { %v1093_v27 = vadd.f32 1e-12, %v1091_v26 }
 0x20e   : > { %6681 = vrsqrt.f32 %v1093_v27  ;;  %vm1101_vm2 = vweird.f32 %v1093_v27 }
 0x211   : > { %v1090_v28 = vpop.xlane.xlu1 %1089 }
 0x212   : > { %v1092_v29 = vmul.f32 0.0051020407, %v1090_v28 }
 0x214   : > { %v6682_v30 = vpop.eup %6681  ;;  %v1094_v31 = vadd.f32 1e-12, %v1092_v29 }
 0x215   : > { %v1096_v32 = vmul.f32 %v6682_v30, %v1093_v27  ;;  %vm1102_vm1 = vweird.f32 %v6682_v30 }
 0x216   : > { %6683 = vrsqrt.f32 %v1094_v31  ;;  %vm1103_vm3 = vmor %vm1101_vm2, %vm1102_vm1  ;;  %vm1111_vm5 = vweird.f32 %v1094_v31 }
 0x217   : > { %v1097_v33 = vmul.f32 %v6682_v30, %v1096_v32 }
 0x219   : > { %v1098_v34 = vmul.f32 0.5, %v1097_v33 }
 0x21b   : > { %v1099_v36 = vsub.f32 1.5, %v1098_v34 }
 0x21c   : > { %v6684_v37 = vpop.eup %6683 }
 0x21d   : > { %v1100_v39 = vmul.f32 %v6682_v30, %v1099_v36  ;;  %v1106_v40 = vmul.f32 %v6684_v37, %v1094_v31  ;;  %vm1112_vm4 = vweird.f32 %v6684_v37 }
 0x21e   : > { %vm1113_vm6 = vmor %vm1111_vm5, %vm1112_vm4 }
 0x21f   : > { %v1104_v43 = vsel %vm1103_vm3, %v6682_v30, %v1100_v39  ;;  %v1107_v44 = vmul.f32 %v6684_v37, %v1106_v40 }
 0x220   : > { %v1115_v47 = vmul.f32 %v1104_v43, %v1069_v11  ;;  %v1116_v48 = vmul.f32 %v1104_v43, %v1078_v13 }
 0x221   : > { %v1108_v49 = vmul.f32 0.5, %v1107_v44 }
 0x222   : > { %v1124_v50 = vmul.f32 %v1120_v41, %v1115_v47  ;;  %v1125_v51 = vmul.f32 %v1121_v42, %v1116_v48 }
 0x223   : > { %v1109_v52 = vsub.f32 1.5, %v1108_v49 }
 0x224   : > { %v1133_v53 = vadd.f32 %v1129_v45, %v1124_v50  ;;  %v1134_v54 = vadd.f32 %v1130_v46, %v1125_v51 }
 0x225   : > { %v1110_v55 = vmul.f32 %v6684_v37, %v1109_v52 }
 0x226   : > { %1137 = vst [vmem:[#allocation2 + $0x10] sm:$0xff] %v1133_v53 }
 0x227   : > { %1138 = vst [vmem:[#allocation2] sm:$0xff] %v1134_v54  ;;  %v1114_v56 = vsel %vm1113_vm6, %v6684_v37, %v1110_v55 }
 0x228   : > { %v1117_v57 = vmul.f32 %v1114_v56, %v1071_v19  ;;  %v1118_v58 = vmul.f32 %v1114_v56, %v1080_v21 }
 0x22a   : > { %v1126_v59 = vmul.f32 %v1120_v41, %v1117_v57  ;;  %v1127_v60 = vmul.f32 %v1121_v42, %v1118_v58 }
 0x22c   : > { %v1135_v61 = vadd.f32 %v1129_v45, %v1126_v59  ;;  %v1136_v62 = vadd.f32 %v1130_v46, %v1127_v60 }
 0x22e   : > { %1139 = vst [vmem:[#allocation2 + $0x18] sm:$0xff] %v1135_v61 }
 0x22f   : > { %1140 = vst [vmem:[#allocation2 + $0x8] sm:$0xff] %v1136_v62 }
 0x230 PF: > { %v5216_v63 = vld [vmem:[%s7671_s2 + $0x2a0] sm:$0xf]  ;;  %v6326_v0 = vld [vmem:[%s7671_s2 + $0x2cc] sm:$0xf0]  ;;  %v6320_v3 = vld [vmem:[%s7671_s2 + $0x2a4] sm:$0xf] }
 0x231   : > { %v5217_v4 = vor.u32 %v6326_v0, %v5216_v63  ;;  %v5218_v5 = vld [vmem:[%s7671_s2 + $0x2d0] sm:$0xf0]  ;;  %v6416_v6 = vld [vmem:[%s7671_s2 + $0x5a4] sm:$0xf]  ;;  %v5600_v10 = vld [vmem:[%s7671_s2 + $0x5a0] sm:$0xf] }
 0x232   : > { %v5602_v7 = vld [vmem:[%s7671_s2 + $0x5d0] sm:$0xf0]  ;;  %v5221_v8 = vor.u32 %v6320_v3, %v5218_v5  ;;  %v6422_v11 = vld [vmem:[%s7671_s2 + $0x5cc] sm:$0xf0]  ;;  %v5168_v12 = vld [vmem:[%s7671_s2 + $0x240] sm:$0xf] }
 0x233   : > { %v5605_v9 = vor.u32 %v6416_v6, %v5602_v7  ;;  %2328 = vmatpush.bf16.msra.mxu0 %v5217_v4  ;;  %v5601_v13 = vor.u32 %v6422_v11, %v5600_v10  ;;  %v6314_v14 = vld [vmem:[%s7671_s2 + $0x26c] sm:$0xf0]  ;;  %v6308_v15 = vld [vmem:[%s7671_s2 + $0x244] sm:$0xf]  ;;  %v5170_v16 = vld [vmem:[%s7671_s2 + $0x270] sm:$0xf0] }
 0x234   : > { %2356 = vmatpush.bf16.msra.mxu2 %v5221_v8  ;;  %v5169_v17 = vor.u32 %v6314_v14, %v5168_v12  ;;  %v5173_v18 = vor.u32 %v6308_v15, %v5170_v16  ;;  %v6404_v19 = vld [vmem:[%s7671_s2 + $0x544] sm:$0xf]  ;;  %v5554_v20 = vld [vmem:[%s7671_s2 + $0x570] sm:$0xf0]  ;;  %v5552_v21 = vld [vmem:[%s7671_s2 + $0x540] sm:$0xf] }
 0x235   : > { %2370 = vmatpush.bf16.msra.mxu3 %v5605_v9  ;;  %2342 = vmatpush.bf16.msra.mxu1 %v5601_v13  ;;  %v5557_v22 = vor.u32 %v6404_v19, %v5554_v20  ;;  %v6410_v23 = vld [vmem:[%s7671_s2 + $0x56c] sm:$0xf0]  ;;  %v5120_v24 = vld [vmem:[%s7671_s2 + $0x1e0] sm:$0xf]  ;;  %v6296_v27 = vld [vmem:[%s7671_s2 + $0x1e4] sm:$0xf] }
 0x236   : > { %v6302_v25 = vld [vmem:[%s7671_s2 + $0x20c] sm:$0xf0]  ;;  %v5553_v26 = vor.u32 %v6410_v23, %v5552_v21  ;;  %v5122_v28 = vld [vmem:[%s7671_s2 + $0x210] sm:$0xf0]  ;;  %v6392_v29 = vld [vmem:[%s7671_s2 + $0x4e4] sm:$0xf] }
 0x237   : > { %2329 = vmatpush.bf16.msra.mxu0 %v5169_v17  ;;  %v5121_v30 = vor.u32 %v6302_v25, %v5120_v24  ;;  %v5506_v31 = vld [vmem:[%s7671_s2 + $0x510] sm:$0xf0]  ;;  %v5504_v32 = vld [vmem:[%s7671_s2 + $0x4e0] sm:$0xf]  ;;  %v6398_v33 = vld [vmem:[%s7671_s2 + $0x50c] sm:$0xf0]  ;;  %v5125_v34 = vor.u32 %v6296_v27, %v5122_v28 }
 0x238   : > { %2357 = vmatpush.bf16.msra.mxu2 %v5173_v18  ;;  %v5509_v35 = vor.u32 %v6392_v29, %v5506_v31  ;;  %v5072_v36 = vld [vmem:[%s7671_s2 + $0x180] sm:$0xf]  ;;  %v6290_v37 = vld [vmem:[%s7671_s2 + $0x1ac] sm:$0xf0]  ;;  %v6284_v38 = vld [vmem:[%s7671_s2 + $0x184] sm:$0xf]  ;;  %v5505_v39 = vor.u32 %v6398_v33, %v5504_v32 }
 0x239   : > { %2371 = vmatpush.bf16.msra.mxu3 %v5557_v22  ;;  %2343 = vmatpush.bf16.msra.mxu1 %v5553_v26  ;;  %v5074_v40 = vld [vmem:[%s7671_s2 + $0x1b0] sm:$0xf0]  ;;  %v6380_v41 = vld [vmem:[%s7671_s2 + $0x484] sm:$0xf]  ;;  %v5456_v43 = vld [vmem:[%s7671_s2 + $0x480] sm:$0xf]  ;;  %v5073_v45 = vor.u32 %v6290_v37, %v5072_v36 }
 0x23a   : > { %v5458_v42 = vld [vmem:[%s7671_s2 + $0x4b0] sm:$0xf0]  ;;  %v6386_v44 = vld [vmem:[%s7671_s2 + $0x4ac] sm:$0xf0]  ;;  %v5077_v46 = vor.u32 %v6284_v38, %v5074_v40  ;;  %v5024_v48 = vld [vmem:[%s7671_s2 + $0x120] sm:$0xf] }
 0x23b   : > { %2330 = vmatpush.bf16.msra.mxu0 %v5121_v30  ;;  %v5461_v47 = vor.u32 %v6380_v41, %v5458_v42  ;;  %v6278_v49 = vld [vmem:[%s7671_s2 + $0x14c] sm:$0xf0]  ;;  %v6272_v50 = vld [vmem:[%s7671_s2 + $0x124] sm:$0xf]  ;;  %v5457_v51 = vor.u32 %v6386_v44, %v5456_v43  ;;  %v5026_v52 = vld [vmem:[%s7671_s2 + $0x150] sm:$0xf0] }
 0x23c   : > { %2358 = vmatpush.bf16.msra.mxu2 %v5125_v34  ;;  %v6368_v53 = vld [vmem:[%s7671_s2 + $0x424] sm:$0xf]  ;;  %v5410_v54 = vld [vmem:[%s7671_s2 + $0x450] sm:$0xf0]  ;;  %v5408_v55 = vld [vmem:[%s7671_s2 + $0x420] sm:$0xf]  ;;  %v5025_v57 = vor.u32 %v6278_v49, %v5024_v48  ;;  %v5029_v58 = vor.u32 %v6272_v50, %v5026_v52 }
 0x23d   : > { %2372 = vmatpush.bf16.msra.mxu3 %v5509_v35  ;;  %2344 = vmatpush.bf16.msra.mxu1 %v5505_v39  ;;  %v6374_v56 = vld [vmem:[%s7671_s2 + $0x44c] sm:$0xf0]  ;;  %v5413_v59 = vor.u32 %v6368_v53, %v5410_v54  ;;  %v4976_v60 = vld [vmem:[%s7671_s2 + $0xc0] sm:$0xf]  ;;  %v6260_v62 = vld [vmem:[%s7671_s2 + $0xc4] sm:$0xf] }
 0x23e   : > { %v6266_v61 = vld [vmem:[%s7671_s2 + $0xec] sm:$0xf0]  ;;  %v5409_v63 = vor.u32 %v6374_v56, %v5408_v55  ;;  %v4978_v0 = vld [vmem:[%s7671_s2 + $0xf0] sm:$0xf0]  ;;  %v6356_v3 = vld [vmem:[%s7671_s2 + $0x3c4] sm:$0xf] }
 0x23f   : > { %2331 = vmatpush.bf16.msra.mxu0 %v5073_v45  ;;  %v5362_v4 = vld [vmem:[%s7671_s2 + $0x3f0] sm:$0xf0]  ;;  %v5360_v5 = vld [vmem:[%s7671_s2 + $0x3c0] sm:$0xf]  ;;  %v6362_v6 = vld [vmem:[%s7671_s2 + $0x3ec] sm:$0xf0]  ;;  %v4977_v7 = vor.u32 %v6266_v61, %v4976_v60  ;;  %v4981_v8 = vor.u32 %v6260_v62, %v4978_v0 }
 0x240   : > { %2359 = vmatpush.bf16.msra.mxu2 %v5077_v46  ;;  %v5365_v9 = vor.u32 %v6356_v3, %v5362_v4  ;;  %v4928_v10 = vld [vmem:[%s7671_s2 + $0x60] sm:$0xf]  ;;  %v6254_v11 = vld [vmem:[%s7671_s2 + $0x8c] sm:$0xf0]  ;;  %v6248_v12 = vld [vmem:[%s7671_s2 + $0x64] sm:$0xf]  ;;  %v5361_v13 = vor.u32 %v6362_v6, %v5360_v5 }
 0x241   : > { %2373 = vmatpush.bf16.msra.mxu3 %v5461_v47  ;;  %2345 = vmatpush.bf16.msra.mxu1 %v5457_v51  ;;  %v4930_v14 = vld [vmem:[%s7671_s2 + $0x90] sm:$0xf0]  ;;  %v6344_v15 = vld [vmem:[%s7671_s2 + $0x364] sm:$0xf]  ;;  %v5312_v17 = vld [vmem:[%s7671_s2 + $0x360] sm:$0xf]  ;;  %v4929_v19 = vor.u32 %v6254_v11, %v4928_v10 }
 0x242   : > { %v5314_v16 = vld [vmem:[%s7671_s2 + $0x390] sm:$0xf0]  ;;  %v6350_v18 = vld [vmem:[%s7671_s2 + $0x38c] sm:$0xf0]  ;;  %v4880_v20 = vld [vmem:[%s7671_s2] sm:$0xf]  ;;  %v4933_v22 = vor.u32 %v6248_v12, %v4930_v14 }
 0x243   : > { %2332 = vmatpush.bf16.msra.mxu0 %v5025_v57  ;;  %v6242_v21 = vld [vmem:[%s7671_s2 + $0x2c] sm:$0xf0]  ;;  %v5317_v23 = vor.u32 %v6344_v15, %v5314_v16  ;;  %v6236_v24 = vld [vmem:[%s7671_s2 + $0x4] sm:$0xf]  ;;  %v4882_v25 = vld [vmem:[%s7671_s2 + $0x30] sm:$0xf0]  ;;  %v5313_v27 = vor.u32 %v6350_v18, %v5312_v17 }
 0x244   : > { %2360 = vmatpush.bf16.msra.mxu2 %v5029_v58  ;;  %v6332_v26 = vld [vmem:[%s7671_s2 + $0x304] sm:$0xf]  ;;  %v5266_v28 = vld [vmem:[%s7671_s2 + $0x330] sm:$0xf0]  ;;  %v5224_v29 = vld [vmem:[%s7671_s2 + $0x2a8] sm:$0xf]  ;;  %v4881_v34 = vor.u32 %v6242_v21, %v4880_v20  ;;  %v4885_v38 = vor.u32 %v6236_v24, %v4882_v25 }
 0x245   : > { %2374 = vmatpush.bf16.msra.mxu3 %v5413_v59  ;;  %2346 = vmatpush.bf16.msra.mxu1 %v5409_v63  ;;  %v6327_v30 = vld [vmem:[%s7671_s2 + $0x2d4] sm:$0xf0]  ;;  %v6321_v31 = vld [vmem:[%s7671_s2 + $0x2ac] sm:$0xf]  ;;  %v5226_v32 = vld [vmem:[%s7671_s2 + $0x2d8] sm:$0xf0]  ;;  %v5269_v39 = vor.u32 %v6332_v26, %v5266_v28 }
 0x246   : > { %v6417_v33 = vld [vmem:[%s7671_s2 + $0x5ac] sm:$0xf]  ;;  %v5610_v35 = vld [vmem:[%s7671_s2 + $0x5d8] sm:$0xf0]  ;;  %v5264_v36 = vld [vmem:[%s7671_s2 + $0x300] sm:$0xf]  ;;  %v5225_v42 = vor.u32 %v6327_v30, %v5224_v29  ;;  %v5229_v43 = vor.u32 %v6321_v31, %v5226_v32 }
 0x247   : > { %2333 = vmatpush.bf16.msra.mxu0 %v4977_v7  ;;  %v6338_v37 = vld [vmem:[%s7671_s2 + $0x32c] sm:$0xf0]  ;;  %v5608_v40 = vld [vmem:[%s7671_s2 + $0x5a8] sm:$0xf]  ;;  %v6423_v41 = vld [vmem:[%s7671_s2 + $0x5d4] sm:$0xf0]  ;;  %v5613_v45 = vor.u32 %v6417_v33, %v5610_v35 }
 0x248   : > { %2361 = vmatpush.bf16.msra.mxu2 %v4981_v8  ;;  %v5176_v44 = vld [vmem:[%s7671_s2 + $0x248] sm:$0xf]  ;;  %v5265_v46 = vor.u32 %v6338_v37, %v5264_v36  ;;  %v6315_v47 = vld [vmem:[%s7671_s2 + $0x274] sm:$0xf0]  ;;  %v6309_v48 = vld [vmem:[%s7671_s2 + $0x24c] sm:$0xf]  ;;  %v5609_v50 = vor.u32 %v6423_v41, %v5608_v40 }
 0x249   : > { %2375 = vmatpush.bf16.msra.mxu3 %v5365_v9  ;;  %2347 = vmatpush.bf16.msra.mxu1 %v5361_v13  ;;  %v5178_v49 = vld [vmem:[%s7671_s2 + $0x278] sm:$0xf0]  ;;  %v6405_v51 = vld [vmem:[%s7671_s2 + $0x54c] sm:$0xf]  ;;  %v5560_v53 = vld [vmem:[%s7671_s2 + $0x548] sm:$0xf]  ;;  %v5177_v55 = vor.u32 %v6315_v47, %v5176_v44 }
 0x24a   : > { %v5562_v52 = vld [vmem:[%s7671_s2 + $0x578] sm:$0xf0]  ;;  %v6411_v54 = vld [vmem:[%s7671_s2 + $0x574] sm:$0xf0]  ;;  %v5181_v56 = vor.u32 %v6309_v48, %v5178_v49  ;;  %v5128_v57 = vld [vmem:[%s7671_s2 + $0x1e8] sm:$0xf] }
 0x24b   : > { %2334 = vmatpush.bf16.msra.mxu0 %v4929_v19  ;;  %v5565_v58 = vor.u32 %v6405_v51, %v5562_v52  ;;  %v6303_v59 = vld [vmem:[%s7671_s2 + $0x214] sm:$0xf0]  ;;  %v6297_v60 = vld [vmem:[%s7671_s2 + $0x1ec] sm:$0xf]  ;;  %v5130_v61 = vld [vmem:[%s7671_s2 + $0x218] sm:$0xf0]  ;;  %v5561_v62 = vor.u32 %v6411_v54, %v5560_v53 }
 0x24c   : > { %2362 = vmatpush.bf16.msra.mxu2 %v4933_v22  ;;  %v6393_v63 = vld [vmem:[%s7671_s2 + $0x4ec] sm:$0xf]  ;;  %v5514_v0 = vld [vmem:[%s7671_s2 + $0x518] sm:$0xf0]  ;;  %v5512_v3 = vld [vmem:[%s7671_s2 + $0x4e8] sm:$0xf]  ;;  %v5129_v7 = vor.u32 %v6303_v59, %v5128_v57  ;;  %v5133_v8 = vor.u32 %v6297_v60, %v5130_v61 }
 0x24d   : > { %2376 = vmatpush.bf16.msra.mxu3 %v5317_v23  ;;  %2348 = vmatpush.bf16.msra.mxu1 %v5313_v27  ;;  %v6399_v4 = vld [vmem:[%s7671_s2 + $0x514] sm:$0xf0]  ;;  %v5080_v5 = vld [vmem:[%s7671_s2 + $0x188] sm:$0xf]  ;;  %v1141_v6 = vld [vmem:[#allocation2 + $0x10] sm:$0xff]  ;;  %v5517_v12 = vor.u32 %v6393_v63, %v5514_v0  ;;  %vm2685_vm7 = vcmask 64512  }
 0x24e   : > { %v6291_v9 = vld [vmem:[%s7671_s2 + $0x1b4] sm:$0xf0]  ;;  %v6285_v10 = vld [vmem:[%s7671_s2 + $0x18c] sm:$0xf]  ;;  %v5082_v13 = vld [vmem:[%s7671_s2 + $0x1b8] sm:$0xf0]  ;;  %v5513_v17 = vor.u32 %v6399_v4, %v5512_v3 }
 0x24f   : > { %2335 = vmatpush.bf16.msra.mxu0 %v4881_v34  ;;  %v1143_v11 = vld [vmem:[#allocation2 + $0x18] sm:$0xff]  ;;  %v1142_v15 = vld [vmem:[#allocation2] sm:$0xff]  ;;  %v1144_v16 = vld [vmem:[#allocation2 + $0x8] sm:$0xff]  ;;  %v5081_v23 = vor.u32 %v6291_v9, %v5080_v5  ;;  %v5085_v24 = vor.u32 %v6285_v10, %v5082_v13  ;;  %s8644_s18 = scalar_lea.vmem [#allocation17], %s7677_s0 }
 0x250   : > { %2363 = vmatpush.bf16.msra.mxu2 %v4885_v38  ;;  %v7818_v14 = vpack.c.bf16 %v1143_v11, %v1141_v6  ;;  %v6381_v18 = vld [vmem:[%s7671_s2 + $0x48c] sm:$0xf]  ;;  %v5466_v19 = vld [vmem:[%s7671_s2 + $0x4b8] sm:$0xf0]  ;;  %v7822_v20 = vpack.c.bf16 %v1144_v16, %v1142_v15  ;;  %v5464_v21 = vld [vmem:[%s7671_s2 + $0x488] sm:$0xf] }
 0x251   : > { %2377 = vmatpush.bf16.msra.mxu3 %v5269_v39  ;;  %2349 = vmatpush.bf16.msra.mxu1 %v5265_v46  ;;  %v6387_v22 = vld [vmem:[%s7671_s2 + $0x4b4] sm:$0xf0]  ;;  %v5032_v25 = vld [vmem:[%s7671_s2 + $0x128] sm:$0xf]  ;;  %v5469_v26 = vor.u32 %v6381_v18, %v5466_v19  ;;  %v6273_v28 = vld [vmem:[%s7671_s2 + $0x12c] sm:$0xf] }
 0x252   : > { %2336 = vmatmul.bf16.vlgmr.msra.gmra.mxu0 %v7818_v14  ;;  %v6279_v27 = vld [vmem:[%s7671_s2 + $0x154] sm:$0xf0]  ;;  %v5034_v29 = vld [vmem:[%s7671_s2 + $0x158] sm:$0xf0]  ;;  %v5465_v30 = vor.u32 %v6387_v22, %v5464_v21  ;;  %v6369_v31 = vld [vmem:[%s7671_s2 + $0x42c] sm:$0xf] }
 0x253   : > { %2384 = vmatpush.bf16.msrb.mxu0 %v5225_v42  ;;  %2364 = vmatmul.bf16.vlgmr.msra.gmra.mxu2 %v7818_v14  ;;  %v5418_v32 = vld [vmem:[%s7671_s2 + $0x458] sm:$0xf0]  ;;  %v5416_v33 = vld [vmem:[%s7671_s2 + $0x428] sm:$0xf]  ;;  %v6375_v34 = vld [vmem:[%s7671_s2 + $0x454] sm:$0xf0]  ;;  %v5033_v35 = vor.u32 %v6279_v27, %v5032_v25  ;;  %v5037_v36 = vor.u32 %v6273_v28, %v5034_v29 }
 0x254   : > { %2412 = vmatpush.bf16.msrb.mxu2 %v5229_v43  ;;  %2350 = vmatmul.bf16.vlgmr.msra.gmra.mxu1 %v7822_v20  ;;  %v4984_v37 = vld [vmem:[%s7671_s2 + $0xc8] sm:$0xf]  ;;  %v5421_v38 = vor.u32 %v6369_v31, %v5418_v32  ;;  %v6267_v39 = vld [vmem:[%s7671_s2 + $0xf4] sm:$0xf0]  ;;  %v6261_v40 = vld [vmem:[%s7671_s2 + $0xcc] sm:$0xf]  ;;  %v5417_v42 = vor.u32 %v6375_v34, %v5416_v33 }
 0x255   : > { %2426 = vmatpush.bf16.msrb.mxu3 %v5613_v45  ;;  %2398 = vmatpush.bf16.msrb.mxu1 %v5609_v50  ;;  %v4986_v41 = vld [vmem:[%s7671_s2 + $0xf8] sm:$0xf0]  ;;  %v6357_v43 = vld [vmem:[%s7671_s2 + $0x3cc] sm:$0xf]  ;;  %v5368_v45 = vld [vmem:[%s7671_s2 + $0x3c8] sm:$0xf]  ;;  %v4985_v47 = vor.u32 %v6267_v39, %v4984_v37 }
 0x256   : > { %2378 = vmatmul.bf16.vlgmr.msra.gmra.mxu3 %v7822_v20  ;;  %v5370_v44 = vld [vmem:[%s7671_s2 + $0x3f8] sm:$0xf0]  ;;  %v6363_v46 = vld [vmem:[%s7671_s2 + $0x3f4] sm:$0xf0]  ;;  %v4989_v48 = vor.u32 %v6261_v40, %v4986_v41  ;;  %v4936_v49 = vld [vmem:[%s7671_s2 + $0x68] sm:$0xf] }
 0x257   : > { %2385 = vmatpush.bf16.msrb.mxu0 %v5177_v55  ;;  %v5373_v50 = vor.u32 %v6357_v43, %v5370_v44  ;;  %v6255_v51 = vld [vmem:[%s7671_s2 + $0x94] sm:$0xf0]  ;;  %v6249_v52 = vld [vmem:[%s7671_s2 + $0x6c] sm:$0xf]  ;;  %v4938_v53 = vld [vmem:[%s7671_s2 + $0x98] sm:$0xf0]  ;;  %v5369_v54 = vor.u32 %v6363_v46, %v5368_v45 }
 0x258   : > { %2413 = vmatpush.bf16.msrb.mxu2 %v5181_v56  ;;  %v6345_v55 = vld [vmem:[%s7671_s2 + $0x36c] sm:$0xf]  ;;  %v5322_v56 = vld [vmem:[%s7671_s2 + $0x398] sm:$0xf0]  ;;  %v5320_v57 = vld [vmem:[%s7671_s2 + $0x368] sm:$0xf]  ;;  %v4937_v59 = vor.u32 %v6255_v51, %v4936_v49  ;;  %v4941_v60 = vor.u32 %v6249_v52, %v4938_v53 }
 0x259   : > { %2427 = vmatpush.bf16.msrb.mxu3 %v5565_v58  ;;  %2399 = vmatpush.bf16.msrb.mxu1 %v5561_v62  ;;  %v6351_v58 = vld [vmem:[%s7671_s2 + $0x394] sm:$0xf0]  ;;  %v4888_v61 = vld [vmem:[%s7671_s2 + $0x8] sm:$0xf]  ;;  %v6237_v63 = vld [vmem:[%s7671_s2 + $0xc] sm:$0xf]  ;;  %v5325_v0 = vor.u32 %v6345_v55, %v5322_v56 }
 0x25a   : > { %v6243_v62 = vld [vmem:[%s7671_s2 + $0x34] sm:$0xf0]  ;;  %v4890_v3 = vld [vmem:[%s7671_s2 + $0x38] sm:$0xf0]  ;;  %v6333_v4 = vld [vmem:[%s7671_s2 + $0x30c] sm:$0xf]  ;;  %v5321_v6 = vor.u32 %v6351_v58, %v5320_v57 }
 0x25b   : > { %2386 = vmatpush.bf16.msrb.mxu0 %v5129_v7  ;;  %v5274_v5 = vld [vmem:[%s7671_s2 + $0x338] sm:$0xf0]  ;;  %v5232_v7 = vld [vmem:[%s7671_s2 + $0x2b0] sm:$0xf]  ;;  %v6322_v9 = vld [vmem:[%s7671_s2 + $0x2b4] sm:$0xf]  ;;  %v4889_v13 = vor.u32 %v6243_v62, %v4888_v61  ;;  %v4893_v15 = vor.u32 %v6237_v63, %v4890_v3 }
 0x25c   : > { %2414 = vmatpush.bf16.msrb.mxu2 %v5133_v8  ;;  %v6328_v8 = vld [vmem:[%s7671_s2 + $0x2dc] sm:$0xf0]  ;;  %v5234_v10 = vld [vmem:[%s7671_s2 + $0x2e0] sm:$0xf0]  ;;  %v6418_v11 = vld [vmem:[%s7671_s2 + $0x5b4] sm:$0xf]  ;;  %v5277_v18 = vor.u32 %v6333_v4, %v5274_v5 }
 0x25d   : > { %2428 = vmatpush.bf16.msrb.mxu3 %v5517_v12  ;;  %2400 = vmatpush.bf16.msrb.mxu1 %v5513_v17  ;;  %v5618_v12 = vld [vmem:[%s7671_s2 + $0x5e0] sm:$0xf0]  ;;  %v5272_v16 = vld [vmem:[%s7671_s2 + $0x308] sm:$0xf]  ;;  %v6339_v17 = vld [vmem:[%s7671_s2 + $0x334] sm:$0xf0]  ;;  %v5233_v19 = vor.u32 %v6328_v8, %v5232_v7 }
 0x25e   : > { %v5616_v21 = vld [vmem:[%s7671_s2 + $0x5b0] sm:$0xf]  ;;  %v6424_v22 = vld [vmem:[%s7671_s2 + $0x5dc] sm:$0xf0]  ;;  %v6310_v27 = vld [vmem:[%s7671_s2 + $0x254] sm:$0xf]  ;;  %v5273_v28 = vor.u32 %v6339_v17, %v5272_v16 }
 0x25f   : > { %2387 = vmatpush.bf16.msrb.mxu0 %v5081_v23  ;;  %v5237_v23 = vor.u32 %v6322_v9, %v5234_v10  ;;  %v5184_v25 = vld [vmem:[%s7671_s2 + $0x250] sm:$0xf]  ;;  %v5186_v29 = vld [vmem:[%s7671_s2 + $0x280] sm:$0xf0]  ;;  %v5617_v32 = vor.u32 %v6424_v22, %v5616_v21  ;;  %v6304_v39 = vld [vmem:[%s7671_s2 + $0x21c] sm:$0xf0] }
 0x260   : > { %2415 = vmatpush.bf16.msrb.mxu2 %v5085_v24  ;;  %v5621_v24 = vor.u32 %v6418_v11, %v5618_v12  ;;  %v5570_v31 = vld [vmem:[%s7671_s2 + $0x580] sm:$0xf0]  ;;  %v5568_v34 = vld [vmem:[%s7671_s2 + $0x550] sm:$0xf]  ;;  %v6298_v40 = vld [vmem:[%s7671_s2 + $0x1f4] sm:$0xf] }
 0x261   : > { %2429 = vmatpush.bf16.msrb.mxu3 %v5469_v26  ;;  %2401 = vmatpush.bf16.msrb.mxu1 %v5465_v30  ;;  %v6316_v26 = vld [vmem:[%s7671_s2 + $0x27c] sm:$0xf0]  ;;  %v6406_v30 = vld [vmem:[%s7671_s2 + $0x554] sm:$0xf]  ;;  %v5138_v41 = vld [vmem:[%s7671_s2 + $0x220] sm:$0xf0] }
 0x262   : > { %v5185_v33 = vor.u32 %v6316_v26, %v5184_v25  ;;  %v5573_v37 = vor.u32 %v6406_v30, %v5570_v31  ;;  %v5522_v43 = vld [vmem:[%s7671_s2 + $0x520] sm:$0xf0]  ;;  %v5520_v46 = vld [vmem:[%s7671_s2 + $0x4f0] sm:$0xf]  ;;  %v6292_v51 = vld [vmem:[%s7671_s2 + $0x1bc] sm:$0xf0] }
 0x263   : > { %2388 = vmatpush.bf16.msrb.mxu0 %v5033_v35  ;;  %v6412_v35 = vld [vmem:[%s7671_s2 + $0x57c] sm:$0xf0]  ;;  %v6286_v52 = vld [vmem:[%s7671_s2 + $0x194] sm:$0xf]  ;;  %v5090_v53 = vld [vmem:[%s7671_s2 + $0x1c0] sm:$0xf0] }
 0x264   : > { %2416 = vmatpush.bf16.msrb.mxu2 %v5037_v36  ;;  %v5189_v36 = vor.u32 %v6310_v27, %v5186_v29  ;;  %v5569_v44 = vor.u32 %v6412_v35, %v5568_v34  ;;  %v5474_v55 = vld [vmem:[%s7671_s2 + $0x4c0] sm:$0xf0]  ;;  %v5472_v58 = vld [vmem:[%s7671_s2 + $0x490] sm:$0xf]  ;;  %v6280_v63 = vld [vmem:[%s7671_s2 + $0x15c] sm:$0xf0] }
 0x265   : > { %2430 = vmatpush.bf16.msrb.mxu3 %v5421_v38  ;;  %2402 = vmatpush.bf16.msrb.mxu1 %v5417_v42  ;;  %v5136_v38 = vld [vmem:[%s7671_s2 + $0x1f0] sm:$0xf]  ;;  %v6394_v42 = vld [vmem:[%s7671_s2 + $0x4f4] sm:$0xf]  ;;  %v5042_v3 = vld [vmem:[%s7671_s2 + $0x160] sm:$0xf0] }
 0x266   : > { %v5137_v45 = vor.u32 %v6304_v39, %v5136_v38  ;;  %v5525_v49 = vor.u32 %v6394_v42, %v5522_v43  ;;  %v5040_v62 = vld [vmem:[%s7671_s2 + $0x130] sm:$0xf]  ;;  %v6370_v4 = vld [vmem:[%s7671_s2 + $0x434] sm:$0xf]  ;;  %v5426_v5 = vld [vmem:[%s7671_s2 + $0x460] sm:$0xf0] }
 0x267   : > { %2389 = vmatpush.bf16.msrb.mxu0 %v4985_v47  ;;  %v6400_v47 = vld [vmem:[%s7671_s2 + $0x51c] sm:$0xf0]  ;;  %v5041_v7 = vor.u32 %v6280_v63, %v5040_v62  ;;  %v5424_v8 = vld [vmem:[%s7671_s2 + $0x430] sm:$0xf]  ;;  %v5429_v11 = vor.u32 %v6370_v4, %v5426_v5  ;;  %v4994_v16 = vld [vmem:[%s7671_s2 + $0x100] sm:$0xf0] }
 0x268   : > { %2417 = vmatpush.bf16.msrb.mxu2 %v4989_v48  ;;  %v5141_v48 = vor.u32 %v6298_v40, %v5138_v41  ;;  %v5521_v56 = vor.u32 %v6400_v47, %v5520_v46  ;;  %v6376_v9 = vld [vmem:[%s7671_s2 + $0x45c] sm:$0xf0]  ;;  %v4992_v12 = vld [vmem:[%s7671_s2 + $0xd0] sm:$0xf]  ;;  %v6358_v17 = vld [vmem:[%s7671_s2 + $0x3d4] sm:$0xf] }
 0x269   : > { %2431 = vmatpush.bf16.msrb.mxu3 %v5373_v50  ;;  %2403 = vmatpush.bf16.msrb.mxu1 %v5369_v54  ;;  %v5088_v50 = vld [vmem:[%s7671_s2 + $0x190] sm:$0xf]  ;;  %v6382_v54 = vld [vmem:[%s7671_s2 + $0x494] sm:$0xf]  ;;  %v6256_v27 = vld [vmem:[%s7671_s2 + $0x9c] sm:$0xf0] }
 0x26a   : > { %v5089_v57 = vor.u32 %v6292_v51, %v5088_v50  ;;  %v5477_v61 = vor.u32 %v6382_v54, %v5474_v55  ;;  %v5376_v22 = vld [vmem:[%s7671_s2 + $0x3d0] sm:$0xf]  ;;  %v4946_v29 = vld [vmem:[%s7671_s2 + $0xa0] sm:$0xf0]  ;;  %v6346_v30 = vld [vmem:[%s7671_s2 + $0x374] sm:$0xf] }
 0x26b   : > { %2390 = vmatpush.bf16.msrb.mxu0 %v4937_v59  ;;  %v6388_v59 = vld [vmem:[%s7671_s2 + $0x4bc] sm:$0xf0]  ;;  %v4944_v26 = vld [vmem:[%s7671_s2 + $0x70] sm:$0xf]  ;;  %v5330_v31 = vld [vmem:[%s7671_s2 + $0x3a0] sm:$0xf0] }
 0x26c   : > { %2418 = vmatpush.bf16.msrb.mxu2 %v4941_v60  ;;  %v5093_v60 = vor.u32 %v6286_v52, %v5090_v53  ;;  %v4945_v34 = vor.u32 %v6256_v27, %v4944_v26  ;;  %v6352_v35 = vld [vmem:[%s7671_s2 + $0x39c] sm:$0xf0]  ;;  %v5333_v39 = vor.u32 %v6346_v30, %v5330_v31  ;;  %v6238_v40 = vld [vmem:[%s7671_s2 + $0x14] sm:$0xf]  ;;  %v4898_v41 = vld [vmem:[%s7671_s2 + $0x40] sm:$0xf0] }
 0x26d   : > { %2432 = vmatpush.bf16.msrb.mxu3 %v5325_v0  ;;  %2404 = vmatpush.bf16.msrb.mxu1 %v5321_v6  ;;  %v6274_v0 = vld [vmem:[%s7671_s2 + $0x134] sm:$0xf]  ;;  %v5473_v6 = vor.u32 %v6388_v59, %v5472_v58  ;;  %v5282_v43 = vld [vmem:[%s7671_s2 + $0x340] sm:$0xf0]  ;;  %v6323_v47 = vld [vmem:[%s7671_s2 + $0x2bc] sm:$0xf]  ;;  %v4901_v54 = vor.u32 %v6238_v40, %v4898_v41 }
 0x26e   : > { %v5045_v10 = vor.u32 %v6274_v0, %v5042_v3  ;;  %v6334_v42 = vld [vmem:[%s7671_s2 + $0x314] sm:$0xf]  ;;  %v5626_v51 = vld [vmem:[%s7671_s2 + $0x5e8] sm:$0xf0]  ;;  %v5280_v52 = vld [vmem:[%s7671_s2 + $0x310] sm:$0xf] }
 0x26f   : > { %2391 = vmatpush.bf16.msrb.mxu0 %v4889_v13  ;;  %v6268_v13 = vld [vmem:[%s7671_s2 + $0xfc] sm:$0xf0]  ;;  %v5285_v55 = vor.u32 %v6334_v42, %v5282_v43  ;;  %v5624_v58 = vld [vmem:[%s7671_s2 + $0x5b8] sm:$0xf]  ;;  %v6425_v59 = vld [vmem:[%s7671_s2 + $0x5e4] sm:$0xf0] }
 0x270   : > { %2419 = vmatpush.bf16.msrb.mxu2 %v4893_v15  ;;  %v6262_v15 = vld [vmem:[%s7671_s2 + $0xd4] sm:$0xf]  ;;  %v4993_v21 = vor.u32 %v6268_v13, %v4992_v12  ;;  %v6340_v53 = vld [vmem:[%s7671_s2 + $0x33c] sm:$0xf0]  ;;  %v5192_v62 = vld [vmem:[%s7671_s2 + $0x258] sm:$0xf] }
 0x271   : > { %2433 = vmatpush.bf16.msrb.mxu3 %v5277_v18  ;;  %2405 = vmatpush.bf16.msrb.mxu1 %v5273_v28  ;;  %v5378_v18 = vld [vmem:[%s7671_s2 + $0x400] sm:$0xf0]  ;;  %v6250_v28 = vld [vmem:[%s7671_s2 + $0x74] sm:$0xf]  ;;  %v6317_v63 = vld [vmem:[%s7671_s2 + $0x284] sm:$0xf0] }
 0x272   : > { %2392 = vmatmul.bf16.vlgmr.msrb.gmra.mxu0 %v7818_v14  ;;  %v5381_v25 = vor.u32 %v6358_v17, %v5378_v18  ;;  %v4949_v38 = vor.u32 %v6250_v28, %v4946_v29  ;;  %v6311_v0 = vld [vmem:[%s7671_s2 + $0x25c] sm:$0xf]  ;;  %v5194_v3 = vld [vmem:[%s7671_s2 + $0x288] sm:$0xf0]  ;;  %v5144_v12 = vld [vmem:[%s7671_s2 + $0x1f8] sm:$0xf] }
 0x273   : > { %2440 = vmatpush.bf16.msra.mxu0 %v5233_v19  ;;  %2420 = vmatmul.bf16.vlgmr.msrb.gmra.mxu2 %v7818_v14  ;;  %v5425_v19 = vor.u32 %v6376_v9, %v5424_v8  ;;  %v6407_v4 = vld [vmem:[%s7671_s2 + $0x55c] sm:$0xf]  ;;  %v5578_v5 = vld [vmem:[%s7671_s2 + $0x588] sm:$0xf0]  ;;  %v5576_v8 = vld [vmem:[%s7671_s2 + $0x558] sm:$0xf] }
 0x274   : > { %2468 = vmatpush.bf16.msra.mxu2 %v5237_v23  ;;  %2434 = vmatmul.bf16.vlgmr.msrb.gmra.mxu3 %v7822_v20  ;;  %v6364_v23 = vld [vmem:[%s7671_s2 + $0x3fc] sm:$0xf0]  ;;  %v6413_v9 = vld [vmem:[%s7671_s2 + $0x584] sm:$0xf0]  ;;  %v6395_v17 = vld [vmem:[%s7671_s2 + $0x4fc] sm:$0xf] }
 0x275   : > { %2482 = vmatpush.bf16.msra.mxu3 %v5621_v24  ;;  %2454 = vmatpush.bf16.msra.mxu1 %v5617_v32  ;;  %v4997_v24 = vor.u32 %v6262_v15, %v4994_v16  ;;  %v5377_v32 = vor.u32 %v6364_v23, %v5376_v22  ;;  %v6305_v13 = vld [vmem:[%s7671_s2 + $0x224] sm:$0xf0]  ;;  %v6299_v15 = vld [vmem:[%s7671_s2 + $0x1fc] sm:$0xf]  ;;  %v5146_v16 = vld [vmem:[%s7671_s2 + $0x228] sm:$0xf0] }
 0x276   : > { %2406 = vmatmul.bf16.vlgmr.msrb.gmra.mxu1 %v7822_v20  ;;  %v5530_v18 = vld [vmem:[%s7671_s2 + $0x528] sm:$0xf0]  ;;  %v5528_v22 = vld [vmem:[%s7671_s2 + $0x4f8] sm:$0xf]  ;;  %v6401_v23 = vld [vmem:[%s7671_s2 + $0x524] sm:$0xf0] }
 0x277   : > { %2441 = vmatpush.bf16.msra.mxu0 %v5185_v33  ;;  %v5328_v33 = vld [vmem:[%s7671_s2 + $0x370] sm:$0xf]  ;;  %v5096_v26 = vld [vmem:[%s7671_s2 + $0x198] sm:$0xf]  ;;  %v6293_v27 = vld [vmem:[%s7671_s2 + $0x1c4] sm:$0xf0] }
 0x278   : > { %2469 = vmatpush.bf16.msra.mxu2 %v5189_v36  ;;  %v4896_v36 = vld [vmem:[%s7671_s2 + $0x10] sm:$0xf]  ;;  %v5329_v46 = vor.u32 %v6352_v35, %v5328_v33  ;;  %v6287_v28 = vld [vmem:[%s7671_s2 + $0x19c] sm:$0xf]  ;;  %v5098_v29 = vld [vmem:[%s7671_s2 + $0x1c8] sm:$0xf0]  ;;  %v5097_v33 = vor.u32 %v6293_v27, %v5096_v26 }
 0x279   : > { %2483 = vmatpush.bf16.msra.mxu3 %v5573_v37  ;;  %2455 = vmatpush.bf16.msra.mxu1 %v5569_v44  ;;  %v6244_v37 = vld [vmem:[%s7671_s2 + $0x3c] sm:$0xf0]  ;;  %v5240_v44 = vld [vmem:[%s7671_s2 + $0x2b8] sm:$0xf]  ;;  %v6383_v30 = vld [vmem:[%s7671_s2 + $0x49c] sm:$0xf] }
 0x27a   : > { %v4897_v50 = vor.u32 %v6244_v37, %v4896_v36  ;;  %v5482_v31 = vld [vmem:[%s7671_s2 + $0x4c8] sm:$0xf0]  ;;  %v6389_v35 = vld [vmem:[%s7671_s2 + $0x4c4] sm:$0xf0]  ;;  %v5101_v36 = vor.u32 %v6287_v28, %v5098_v29  ;;  %v6275_v40 = vld [vmem:[%s7671_s2 + $0x13c] sm:$0xf] }
 0x27b   : > { %2442 = vmatpush.bf16.msra.mxu0 %v5137_v45  ;;  %v6329_v45 = vld [vmem:[%s7671_s2 + $0x2e4] sm:$0xf0]  ;;  %v5485_v37 = vor.u32 %v6383_v30, %v5482_v31  ;;  %v5050_v41 = vld [vmem:[%s7671_s2 + $0x168] sm:$0xf0]  ;;  %v6371_v42 = vld [vmem:[%s7671_s2 + $0x43c] sm:$0xf] }
 0x27c   : > { %2470 = vmatpush.bf16.msra.mxu2 %v5141_v48  ;;  %v5242_v48 = vld [vmem:[%s7671_s2 + $0x2e8] sm:$0xf0]  ;;  %v5288_v26 = vld [vmem:[%s7671_s2 + $0x318] sm:$0xf]  ;;  %v6341_v27 = vld [vmem:[%s7671_s2 + $0x344] sm:$0xf0] }
 0x27d   : > { %2484 = vmatpush.bf16.msra.mxu3 %v5525_v49  ;;  %2456 = vmatpush.bf16.msra.mxu1 %v5521_v56  ;;  %v6419_v49 = vld [vmem:[%s7671_s2 + $0x5bc] sm:$0xf]  ;;  %v5241_v56 = vor.u32 %v6329_v45, %v5240_v44  ;;  %v5434_v43 = vld [vmem:[%s7671_s2 + $0x468] sm:$0xf0] }
 0x27e   : > { %v4239_v2 = vld [vmem:[%s8644_s18] sm:$0x3] }
 0x27f   : > { %2443 = vmatpush.bf16.msra.mxu0 %v5089_v57  ;;  %v5245_v57 = vor.u32 %v6323_v47, %v5242_v48  ;;  %v6377_v47 = vld [vmem:[%s7671_s2 + $0x464] sm:$0xf0]  ;;  %v5053_v48 = vor.u32 %v6275_v40, %v5050_v41  ;;  %v6408_v41 = vld [vmem:[%s7671_s2 + $0x564] sm:$0xf] }
 0x280   : > { %2471 = vmatpush.bf16.msra.mxu2 %v5093_v60  ;;  %v5629_v60 = vor.u32 %v6419_v49, %v5626_v51  ;;  %v5437_v49 = vor.u32 %v6371_v42, %v5434_v43  ;;  %v6269_v51 = vld [vmem:[%s7671_s2 + $0x104] sm:$0xf0]  ;;  %v5586_v42 = vld [vmem:[%s7671_s2 + $0x590] sm:$0xf0]  ;;  %v5152_v43 = vld [vmem:[%s7671_s2 + $0x200] sm:$0xf] }
 0x281   : > { %2485 = vmatpush.bf16.msra.mxu3 %v5477_v61  ;;  %2457 = vmatpush.bf16.msra.mxu1 %v5473_v6  ;;  %v5281_v61 = vor.u32 %v6340_v53, %v5280_v52  ;;  %v5625_v6 = vor.u32 %v6425_v59, %v5624_v58  ;;  %v6263_v52 = vld [vmem:[%s7671_s2 + $0xdc] sm:$0xf]  ;;  %v5002_v53 = vld [vmem:[%s7671_s2 + $0x108] sm:$0xf0]  ;;  %v5384_v58 = vld [vmem:[%s7671_s2 + $0x3d8] sm:$0xf] }
 0x282   : > { %v6365_v59 = vld [vmem:[%s7671_s2 + $0x404] sm:$0xf0] }
 0x283   : > { %2444 = vmatpush.bf16.msra.mxu0 %v5041_v7  ;;  %v5193_v7 = vor.u32 %v6317_v63, %v5192_v62  ;;  %v4952_v62 = vld [vmem:[%s7671_s2 + $0x78] sm:$0xf]  ;;  %v6257_v63 = vld [vmem:[%s7671_s2 + $0xa4] sm:$0xf0] }
 0x284   : > { %2472 = vmatpush.bf16.msra.mxu2 %v5045_v10  ;;  %v5197_v10 = vor.u32 %v6311_v0, %v5194_v3  ;;  %v6251_v0 = vld [vmem:[%s7671_s2 + $0x7c] sm:$0xf]  ;;  %v4954_v3 = vld [vmem:[%s7671_s2 + $0xa8] sm:$0xf0] }
 0x285   : > { %2486 = vmatpush.bf16.msra.mxu3 %v5429_v11  ;;  %2458 = vmatpush.bf16.msra.mxu1 %v5425_v19  ;;  %v5581_v11 = vor.u32 %v6407_v4, %v5578_v5  ;;  %v5577_v19 = vor.u32 %v6413_v9, %v5576_v8  ;;  %v6347_v4 = vld [vmem:[%s7671_s2 + $0x37c] sm:$0xf]  ;;  %v5338_v5 = vld [vmem:[%s7671_s2 + $0x3a8] sm:$0xf0]  ;;  %v5336_v8 = vld [vmem:[%s7671_s2 + $0x378] sm:$0xf] }
 0x286   : > { %v6353_v9 = vld [vmem:[%s7671_s2 + $0x3a4] sm:$0xf0] }
 0x287   : > { %2445 = vmatpush.bf16.msra.mxu0 %v4993_v21  ;;  %v5145_v21 = vor.u32 %v6305_v13, %v5144_v12  ;;  %v5341_v12 = vor.u32 %v6347_v4, %v5338_v5  ;;  %v6245_v13 = vld [vmem:[%s7671_s2 + $0x44] sm:$0xf0]  ;;  %v6270_v4 = vld [vmem:[%s7671_s2 + $0x10c] sm:$0xf0] }
 0x288   : > { %2473 = vmatpush.bf16.msra.mxu2 %v4997_v24  ;;  %v5149_v24 = vor.u32 %v6299_v15, %v5146_v16  ;;  %v6239_v15 = vld [vmem:[%s7671_s2 + $0x1c] sm:$0xf]  ;;  %v4906_v16 = vld [vmem:[%s7671_s2 + $0x48] sm:$0xf0] }
 0x289   : > { %2487 = vmatpush.bf16.msra.mxu3 %v5381_v25  ;;  %2459 = vmatpush.bf16.msra.mxu1 %v5377_v32  ;;  %v5533_v25 = vor.u32 %v6395_v17, %v5530_v18  ;;  %v5529_v32 = vor.u32 %v6401_v23, %v5528_v22  ;;  %v6335_v17 = vld [vmem:[%s7671_s2 + $0x31c] sm:$0xf]  ;;  %v5290_v18 = vld [vmem:[%s7671_s2 + $0x348] sm:$0xf0]  ;;  %v6330_v22 = vld [vmem:[%s7671_s2 + $0x2ec] sm:$0xf0]  ;;  %v4909_v28 = vor.u32 %v6239_v15, %v4906_v16 }
 0x28a   : > { %v6324_v23 = vld [vmem:[%s7671_s2 + $0x2c4] sm:$0xf]  ;;  %v5293_v29 = vor.u32 %v6335_v17, %v5290_v18  ;;  %v4912_v16 = vld [vmem:[%s7671_s2 + $0x20] sm:$0xf]  ;;  %v6246_v17 = vld [vmem:[%s7671_s2 + $0x4c] sm:$0xf0] }
 0x28b   : > { %2446 = vmatpush.bf16.msra.mxu0 %v4945_v34  ;;  %v5480_v34 = vld [vmem:[%s7671_s2 + $0x498] sm:$0xf]  ;;  %v5256_v18 = vld [vmem:[%s7671_s2 + $0x2c8] sm:$0xf] }
 0x28c   : > { %2474 = vmatpush.bf16.msra.mxu2 %v4949_v38  ;;  %v5048_v38 = vld [vmem:[%s7671_s2 + $0x138] sm:$0xf]  ;;  %v5481_v44 = vor.u32 %v6389_v35, %v5480_v34  ;;  %v5289_v34 = vor.u32 %v6341_v27, %v5288_v26  ;;  %v5200_v35 = vld [vmem:[%s7671_s2 + $0x260] sm:$0xf]  ;;  %v5490_v26 = vld [vmem:[%s7671_s2 + $0x4d0] sm:$0xf0] }
 0x28d   : > { %2488 = vmatpush.bf16.msra.mxu3 %v5333_v39  ;;  %2460 = vmatpush.bf16.msra.mxu1 %v5329_v46  ;;  %v6281_v39 = vld [vmem:[%s7671_s2 + $0x164] sm:$0xf0]  ;;  %v5432_v46 = vld [vmem:[%s7671_s2 + $0x438] sm:$0xf]  ;;  %v5258_v27 = vld [vmem:[%s7671_s2 + $0x2f8] sm:$0xf0] }
 0x28e   : > { %v5049_v45 = vor.u32 %v6281_v39, %v5048_v38  ;;  %v5202_v38 = vld [vmem:[%s7671_s2 + $0x290] sm:$0xf0] }
 0x28f   : > { %2447 = vmatpush.bf16.msra.mxu0 %v4897_v50  ;;  %v5000_v50 = vld [vmem:[%s7671_s2 + $0xd8] sm:$0xf] }
 0x290   : > { %2475 = vmatpush.bf16.msra.mxu2 %v4901_v54  ;;  %v6359_v54 = vld [vmem:[%s7671_s2 + $0x3dc] sm:$0xf] }
 0x291   : > { %2489 = vmatpush.bf16.msra.mxu3 %v5285_v55  ;;  %2461 = vmatpush.bf16.msra.mxu1 %v5281_v61  ;;  %v5386_v55 = vld [vmem:[%s7671_s2 + $0x408] sm:$0xf0] }
 0x292   : > { %2448 = vmatmul.bf16.vlgmr.msra.gmra.mxu0 %v7818_v14  ;;  %v5389_v61 = vor.u32 %v6359_v54, %v5386_v55  ;;  %v6288_v55 = vld [vmem:[%s7671_s2 + $0x1a4] sm:$0xf] }
 0x293   : > { %2496 = vmatpush.bf16.msrb.mxu0 %v5241_v56  ;;  %2476 = vmatmul.bf16.vlgmr.msra.gmra.mxu2 %v7818_v14  ;;  %v5433_v56 = vor.u32 %v6377_v47, %v5432_v46  ;;  %v6300_v46 = vld [vmem:[%s7671_s2 + $0x204] sm:$0xf]  ;;  %v5154_v47 = vld [vmem:[%s7671_s2 + $0x230] sm:$0xf0] }
 0x294   : > { %2524 = vmatpush.bf16.msrb.mxu2 %v5245_v57  ;;  %2490 = vmatmul.bf16.vlgmr.msra.gmra.mxu3 %v7822_v20  ;;  %v5001_v57 = vor.u32 %v6269_v51, %v5000_v50  ;;  %v6396_v50 = vld [vmem:[%s7671_s2 + $0x504] sm:$0xf]  ;;  %v5538_v51 = vld [vmem:[%s7671_s2 + $0x530] sm:$0xf0]  ;;  %v5157_v54 = vor.u32 %v6300_v46, %v5154_v47  ;;  %v5160_v47 = vld [vmem:[%s7671_s2 + $0x208] sm:$0xf] }
 0x295   : > { %2538 = vmatpush.bf16.msrb.mxu3 %v5629_v60  ;;  %2510 = vmatpush.bf16.msrb.mxu1 %v5625_v6  ;;  %v5005_v60 = vor.u32 %v6263_v52, %v5002_v53  ;;  %v5385_v6 = vor.u32 %v6365_v59, %v5384_v58  ;;  %v5104_v52 = vld [vmem:[%s7671_s2 + $0x1a0] sm:$0xf]  ;;  %v6294_v53 = vld [vmem:[%s7671_s2 + $0x1cc] sm:$0xf0] }
 0x296   : > { %2462 = vmatmul.bf16.vlgmr.msra.gmra.mxu1 %v7822_v20  ;;  %v5105_v58 = vor.u32 %v6294_v53, %v5104_v52  ;;  %v5056_v59 = vld [vmem:[%s7671_s2 + $0x140] sm:$0xf]  ;;  %v5394_v52 = vld [vmem:[%s7671_s2 + $0x410] sm:$0xf0]  ;;  %v5162_v53 = vld [vmem:[%s7671_s2 + $0x238] sm:$0xf0] }
 0x297   : > { %2497 = vmatpush.bf16.msrb.mxu0 %v5193_v7  ;;  %v4953_v7 = vor.u32 %v6257_v63, %v4952_v62  ;;  %v6276_v62 = vld [vmem:[%s7671_s2 + $0x144] sm:$0xf]  ;;  %v5058_v63 = vld [vmem:[%s7671_s2 + $0x170] sm:$0xf0] }
 0x298   : > { %2525 = vmatpush.bf16.msrb.mxu2 %v5197_v10  ;;  %v4904_v10 = vld [vmem:[%s7671_s2 + $0x18] sm:$0xf]  ;;  %v5061_v5 = vor.u32 %v6276_v62, %v5058_v63 }
 0x299   : > { %2539 = vmatpush.bf16.msrb.mxu3 %v5581_v11  ;;  %2511 = vmatpush.bf16.msrb.mxu1 %v5577_v19  ;;  %v4957_v11 = vor.u32 %v6251_v0, %v4954_v3  ;;  %v5248_v19 = vld [vmem:[%s7671_s2 + $0x2c0] sm:$0xf]  ;;  %v6295_v62 = vld [vmem:[%s7671_s2 + $0x1d4] sm:$0xf0] }
 0x29a   : > { %v5249_v30 = vor.u32 %v6330_v22, %v5248_v19  ;;  %v5008_v3 = vld [vmem:[%s7671_s2 + $0xe0] sm:$0xf]  ;;  %v6331_v19 = vld [vmem:[%s7671_s2 + $0x2f4] sm:$0xf0]  ;;  %v6240_v22 = vld [vmem:[%s7671_s2 + $0x24] sm:$0xf] }
 0x29b   : > { %2498 = vmatpush.bf16.msrb.mxu0 %v5145_v21  ;;  %v5337_v21 = vor.u32 %v6353_v9, %v5336_v8  ;;  %v5009_v8 = vor.u32 %v6270_v4, %v5008_v3  ;;  %v4960_v9 = vld [vmem:[%s7671_s2 + $0x80] sm:$0xf]  ;;  %v6289_v3 = vld [vmem:[%s7671_s2 + $0x1ac] sm:$0xf]  ;;  %v5114_v4 = vld [vmem:[%s7671_s2 + $0x1d8] sm:$0xf0] }
 0x29c   : > { %2526 = vmatpush.bf16.msrb.mxu2 %v5149_v24  ;;  %v5250_v24 = vld [vmem:[%s7671_s2 + $0x2f0] sm:$0xf0] }
 0x29d   : > { %2540 = vmatpush.bf16.msrb.mxu3 %v5533_v25  ;;  %2512 = vmatpush.bf16.msrb.mxu1 %v5529_v32  ;;  %v4905_v25 = vor.u32 %v6245_v13, %v4904_v10  ;;  %v5253_v31 = vor.u32 %v6324_v23, %v5250_v24  ;;  %v6420_v32 = vld [vmem:[%s7671_s2 + $0x5c4] sm:$0xf]  ;;  %v6258_v10 = vld [vmem:[%s7671_s2 + $0xac] sm:$0xf0]  ;;  %v4962_v13 = vld [vmem:[%s7671_s2 + $0xb0] sm:$0xf0] }
 0x29e   : > { %v4961_v15 = vor.u32 %v6258_v10, %v4960_v9  ;;  %v6384_v23 = vld [vmem:[%s7671_s2 + $0x4a4] sm:$0xf]  ;;  %v4914_v24 = vld [vmem:[%s7671_s2 + $0x50] sm:$0xf0]  ;;  %v5064_v9 = vld [vmem:[%s7671_s2 + $0x148] sm:$0xf] }
 0x29f   : > { %2499 = vmatpush.bf16.msrb.mxu0 %v5097_v33  ;;  %v5634_v33 = vld [vmem:[%s7671_s2 + $0x5f0] sm:$0xf0]  ;;  %v6283_v10 = vld [vmem:[%s7671_s2 + $0x174] sm:$0xf0] }
 0x2a0   : > { %2527 = vmatpush.bf16.msrb.mxu2 %v5101_v36  ;;  %v6318_v36 = vld [vmem:[%s7671_s2 + $0x28c] sm:$0xf0]  ;;  %v5637_v39 = vor.u32 %v6420_v32, %v5634_v33  ;;  %v6372_v33 = vld [vmem:[%s7671_s2 + $0x444] sm:$0xf] }
 0x2a1   : > { %2541 = vmatpush.bf16.msrb.mxu3 %v5485_v37  ;;  %2513 = vmatpush.bf16.msrb.mxu1 %v5481_v44  ;;  %v6312_v37 = vld [vmem:[%s7671_s2 + $0x264] sm:$0xf]  ;;  %v5201_v40 = vor.u32 %v6318_v36, %v5200_v35  ;;  %v6306_v44 = vld [vmem:[%s7671_s2 + $0x22c] sm:$0xf0]  ;;  %v5257_v35 = vor.u32 %v6331_v19, %v5256_v18  ;;  %v4917_v36 = vor.u32 %v6240_v22, %v4914_v24  ;;  %v5016_v18 = vld [vmem:[%s7671_s2 + $0xe8] sm:$0xf] }
 0x2a2   : > { %v5642_v22 = vld [vmem:[%s7671_s2 + $0x5f8] sm:$0xf0] }
 0x2a3   : > { %2500 = vmatpush.bf16.msrb.mxu0 %v5049_v45  ;;  %v5205_v45 = vor.u32 %v6312_v37, %v5202_v38  ;;  %v5208_v37 = vld [vmem:[%s7671_s2 + $0x268] sm:$0xf]  ;;  %v6319_v38 = vld [vmem:[%s7671_s2 + $0x294] sm:$0xf0] }
 0x2a4   : > { %2528 = vmatpush.bf16.msrb.mxu2 %v5053_v48  ;;  %v5589_v48 = vor.u32 %v6408_v41, %v5586_v42  ;;  %v5584_v41 = vld [vmem:[%s7671_s2 + $0x560] sm:$0xf]  ;;  %v6313_v42 = vld [vmem:[%s7671_s2 + $0x26c] sm:$0xf]  ;;  %v5209_v46 = vor.u32 %v6319_v38, %v5208_v37  ;;  %v6366_v38 = vld [vmem:[%s7671_s2 + $0x40c] sm:$0xf0] }
 0x2a5   : > { %2542 = vmatpush.bf16.msrb.mxu3 %v5437_v49  ;;  %2514 = vmatpush.bf16.msrb.mxu1 %v5433_v56  ;;  %v5153_v49 = vor.u32 %v6306_v44, %v5152_v43  ;;  %v5106_v56 = vld [vmem:[%s7671_s2 + $0x1d0] sm:$0xf0]  ;;  %v5210_v43 = vld [vmem:[%s7671_s2 + $0x298] sm:$0xf0]  ;;  %v6414_v44 = vld [vmem:[%s7671_s2 + $0x58c] sm:$0xf0] }
 0x2a6   : > { %v5392_v37 = vld [vmem:[%s7671_s2 + $0x3e0] sm:$0xf] }
 0x2a7   : > { %2501 = vmatpush.bf16.msrb.mxu0 %v5001_v57  ;;  %v5541_v57 = vor.u32 %v6396_v50, %v5538_v51  ;;  %v5213_v50 = vor.u32 %v6313_v42, %v5210_v43  ;;  %v6301_v51 = vld [vmem:[%s7671_s2 + $0x20c] sm:$0xf]  ;;  %v5393_v42 = vor.u32 %v6366_v38, %v5392_v37  ;;  %v5496_v37 = vld [vmem:[%s7671_s2 + $0x4a8] sm:$0xf]  ;;  %v6391_v38 = vld [vmem:[%s7671_s2 + $0x4d4] sm:$0xf0] }
 0x2a8   : > { %2529 = vmatpush.bf16.msrb.mxu2 %v5005_v60  ;;  %v6282_v60 = vld [vmem:[%s7671_s2 + $0x16c] sm:$0xf0]  ;;  %v5165_v63 = vor.u32 %v6301_v51, %v5162_v53  ;;  %v5344_v51 = vld [vmem:[%s7671_s2 + $0x380] sm:$0xf]  ;;  %v4920_v53 = vld [vmem:[%s7671_s2 + $0x28] sm:$0xf] }
 0x2a9   : > { %2543 = vmatpush.bf16.msrb.mxu3 %v5389_v61  ;;  %2515 = vmatpush.bf16.msrb.mxu1 %v5385_v6  ;;  %v5109_v61 = vor.u32 %v6288_v55, %v5106_v56  ;;  %v5057_v0 = vor.u32 %v6282_v60, %v5056_v59  ;;  %v6264_v6 = vld [vmem:[%s7671_s2 + $0xe4] sm:$0xf]  ;;  %v5536_v55 = vld [vmem:[%s7671_s2 + $0x500] sm:$0xf]  ;;  %v6402_v56 = vld [vmem:[%s7671_s2 + $0x52c] sm:$0xf0] }
 0x2aa   : > { %v5346_v59 = vld [vmem:[%s7671_s2 + $0x3b0] sm:$0xf0]  ;;  %v8100_v43 = vld [vmem:[%s7679_s21] sm:$0xff] }
 0x2ab   : > { %2502 = vmatpush.bf16.msrb.mxu0 %v4953_v7  ;;  %v5010_v7 = vld [vmem:[%s7671_s2 + $0x110] sm:$0xf0] }
 0x2ac   : > { %2530 = vmatpush.bf16.msrb.mxu2 %v4957_v11  ;;  %v5013_v11 = vor.u32 %v6264_v6, %v5010_v7  ;;  %v6390_v6 = vld [vmem:[%s7671_s2 + $0x4cc] sm:$0xf0] }
 0x2ad   : > { %2544 = vmatpush.bf16.msrb.mxu3 %v5341_v12  ;;  %2516 = vmatpush.bf16.msrb.mxu1 %v5337_v21  ;;  %v6252_v12 = vld [vmem:[%s7671_s2 + $0x84] sm:$0xf] }
 0x2ae   : > { %v4965_v21 = vor.u32 %v6252_v12, %v4962_v13  ;;  %v6277_v12 = vld [vmem:[%s7671_s2 + $0x14c] sm:$0xf]  ;;  %v5066_v13 = vld [vmem:[%s7671_s2 + $0x178] sm:$0xf0] }
 0x2af   : > { %2503 = vmatpush.bf16.msrb.mxu0 %v4905_v25  ;;  %v6325_v25 = vld [vmem:[%s7671_s2 + $0x2cc] sm:$0xf]  ;;  %v5069_v24 = vor.u32 %v6277_v12, %v5066_v13  ;;  %v6342_v12 = vld [vmem:[%s7671_s2 + $0x34c] sm:$0xf0] }
 0x2b0   : > { %2531 = vmatpush.bf16.msrb.mxu2 %v4909_v28  ;;  %v5493_v28 = vor.u32 %v6384_v23, %v5490_v26  ;;  %v6271_v23 = vld [vmem:[%s7671_s2 + $0x114] sm:$0xf0]  ;;  %v5440_v26 = vld [vmem:[%s7671_s2 + $0x440] sm:$0xf] }
 0x2b1   : > { %2545 = vmatpush.bf16.msrb.mxu3 %v5293_v29  ;;  %2517 = vmatpush.bf16.msrb.mxu1 %v5289_v34  ;;  %v5632_v29 = vld [vmem:[%s7671_s2 + $0x5c0] sm:$0xf]  ;;  %v5442_v34 = vld [vmem:[%s7671_s2 + $0x470] sm:$0xf0] }
 0x2b2   : > { %2504 = vmatmul.bf16.vlgmr.msrb.gmra.mxu0 %v7818_v14 }
 0x2b3   : > { %2552 = vmatpush.bf16.msra.mxu0 %v5249_v30  ;;  %2532 = vmatmul.bf16.vlgmr.msrb.gmra.mxu2 %v7818_v14  ;;  %v6426_v30 = vld [vmem:[%s7671_s2 + $0x5ec] sm:$0xf0] }
 0x2b4   : > { %2580 = vmatpush.bf16.msra.mxu2 %v5253_v31  ;;  %2546 = vmatmul.bf16.vlgmr.msrb.gmra.mxu3 %v7822_v20  ;;  %v4913_v31 = vor.u32 %v6246_v17, %v4912_v16  ;;  %v5633_v32 = vor.u32 %v6426_v30, %v5632_v29  ;;  %v5298_v16 = vld [vmem:[%s7671_s2 + $0x350] sm:$0xf0]  ;;  %v5065_v17 = vor.u32 %v6283_v10, %v5064_v9  ;;  %v6265_v29 = vld [vmem:[%s7671_s2 + $0xec] sm:$0xf]  ;;  %v5018_v30 = vld [vmem:[%s7671_s2 + $0x118] sm:$0xf0] }
 0x2b5   : > { %2594 = vmatpush.bf16.msra.mxu3 %v5637_v39  ;;  %2518 = vmatmul.bf16.vlgmr.msrb.gmra.mxu1 %v7822_v20  ;;  %v5261_v39 = vor.u32 %v6325_v25, %v5258_v27  ;;  %v6378_v27 = vld [vmem:[%s7671_s2 + $0x46c] sm:$0xf0] }
 0x2b6   : > { %2566 = vmatpush.bf16.msra.mxu1 %v5633_v32  ;;  %v6409_v32 = vld [vmem:[%s7671_s2 + $0x56c] sm:$0xf] }
 0x2b7   : > { %2553 = vmatpush.bf16.msra.mxu0 %v5201_v40  ;;  %v5445_v40 = vor.u32 %v6372_v33, %v5442_v34  ;;  %v5594_v33 = vld [vmem:[%s7671_s2 + $0x598] sm:$0xf0] }
 0x2b8   : > { %2581 = vmatpush.bf16.msra.mxu2 %v5205_v45  ;;  %v5585_v45 = vor.u32 %v6414_v44, %v5584_v41  ;;  %v5021_v41 = vor.u32 %v6265_v29, %v5018_v30  ;;  %v6253_v44 = vld [vmem:[%s7671_s2 + $0x8c] sm:$0xf]  ;;  %v5402_v29 = vld [vmem:[%s7671_s2 + $0x418] sm:$0xf0]  ;;  %v5544_v30 = vld [vmem:[%s7671_s2 + $0x508] sm:$0xf] }
 0x2b9   : > { %2595 = vmatpush.bf16.msra.mxu3 %v5589_v48  ;;  %v6360_v48 = vld [vmem:[%s7671_s2 + $0x3e4] sm:$0xf] }
 0x2ba   : > { %2567 = vmatpush.bf16.msra.mxu1 %v5585_v45  ;;  %v4970_v45 = vld [vmem:[%s7671_s2 + $0xb8] sm:$0xf0] }
 0x2bb   : > { %2554 = vmatpush.bf16.msra.mxu0 %v5153_v49  ;;  %v6307_v49 = vld [vmem:[%s7671_s2 + $0x234] sm:$0xf0] }
 0x2bc   : > { %2582 = vmatpush.bf16.msra.mxu2 %v5157_v54  ;;  %v5397_v54 = vor.u32 %v6360_v48, %v5394_v52  ;;  %v5161_v60 = vor.u32 %v6307_v49, %v5160_v47  ;;  %v6397_v47 = vld [vmem:[%s7671_s2 + $0x50c] sm:$0xf]  ;;  %v6354_v52 = vld [vmem:[%s7671_s2 + $0x3ac] sm:$0xf0] }
 0x2bd   : > { %2596 = vmatpush.bf16.msra.mxu3 %v5541_v57  ;;  %v5537_v57 = vor.u32 %v6402_v56, %v5536_v55  ;;  %v4973_v55 = vor.u32 %v6253_v44, %v4970_v45  ;;  %v6241_v56 = vld [vmem:[%s7671_s2 + $0x2c] sm:$0xf]  ;;  %v5448_v44 = vld [vmem:[%s7671_s2 + $0x448] sm:$0xf]  ;;  %v6379_v45 = vld [vmem:[%s7671_s2 + $0x474] sm:$0xf0] }
 0x2bf   : > { %2555 = vmatpush.bf16.msra.mxu0 %v5105_v58  ;;  %v6348_v58 = vld [vmem:[%s7671_s2 + $0x384] sm:$0xf]  ;;  %2568 = vmatpush.bf16.msra.mxu1 %v5537_v57 }
 0x2c0   : > { %2583 = vmatpush.bf16.msra.mxu2 %v5109_v61  ;;  %v5112_v61 = vld [vmem:[%s7671_s2 + $0x1a8] sm:$0xf] }
 0x2c1   : > { %2597 = vmatpush.bf16.msra.mxu3 %v5493_v28  ;;  %v5113_v7 = vor.u32 %v6295_v62, %v5112_v61  ;;  %v6385_v61 = vld [vmem:[%s7671_s2 + $0x4ac] sm:$0xf]  ;;  %v5498_v62 = vld [vmem:[%s7671_s2 + $0x4d8] sm:$0xf0] }
 0x2c3   : > { %2556 = vmatpush.bf16.msra.mxu0 %v5057_v0  ;;  %v5349_v0 = vor.u32 %v6348_v58, %v5346_v59  ;;  %v5345_v58 = vor.u32 %v6354_v52, %v5344_v51  ;;  %v5400_v51 = vld [vmem:[%s7671_s2 + $0x3e8] sm:$0xf]  ;;  %v6367_v52 = vld [vmem:[%s7671_s2 + $0x414] sm:$0xf0] }
 0x2c4   : > { %2584 = vmatpush.bf16.msra.mxu2 %v5061_v5  ;;  %v5488_v5 = vld [vmem:[%s7671_s2 + $0x4a0] sm:$0xf] }
 0x2c5   : > { %2598 = vmatpush.bf16.msra.mxu3 %v5445_v40  ;;  %v6259_v40 = vld [vmem:[%s7671_s2 + $0xb4] sm:$0xf0] }
 0x2c7   : > { %2557 = vmatpush.bf16.msra.mxu0 %v5009_v8  ;;  %v5489_v8 = vor.u32 %v6390_v6, %v5488_v5  ;;  %v1345_v6 = vperm.slane %v8100_v43, 1 }
 0x2c8   : > { %2585 = vmatpush.bf16.msra.mxu2 %v5013_v11  ;;  %v5117_v11 = vor.u32 %v6289_v3, %v5114_v4  ;;  %v5501_v3 = vor.u32 %v6385_v61, %v5498_v62  ;;  %v6343_v61 = vld [vmem:[%s7671_s2 + $0x354] sm:$0xf0] }
 0x2c9   : > { %2599 = vmatpush.bf16.msra.mxu3 %v5397_v54  ;;  %2569 = vmatpush.bf16.msra.mxu1 %v5489_v8  ;;  %v6247_v54 = vld [vmem:[%s7671_s2 + $0x54] sm:$0xf0] }
 0x2ca   : > { %v4921_v5 = vor.u32 %v6247_v54, %v4920_v53  ;;  %v5401_v53 = vor.u32 %v6367_v52, %v5400_v51  ;;  %v5352_v54 = vld [vmem:[%s7671_s2 + $0x388] sm:$0xf] }
 0x2cb   : > { %2558 = vmatpush.bf16.msra.mxu0 %v4961_v15  ;;  %v6336_v15 = vld [vmem:[%s7671_s2 + $0x324] sm:$0xf] }
 0x2cc   : > { %2586 = vmatpush.bf16.msra.mxu2 %v4965_v21  ;;  %v5301_v19 = vor.u32 %v6336_v15, %v5298_v16  ;;  %v6421_v21 = vld [vmem:[%s7671_s2 + $0x5cc] sm:$0xf]  ;;  %v5640_v15 = vld [vmem:[%s7671_s2 + $0x5c8] sm:$0xf]  ;;  %v6427_v16 = vld [vmem:[%s7671_s2 + $0x5f4] sm:$0xf0] }
 0x2cd   : > { %2600 = vmatpush.bf16.msra.mxu3 %v5349_v0  ;;  %v5645_v25 = vor.u32 %v6421_v21, %v5642_v22  ;;  %v6373_v21 = vld [vmem:[%s7671_s2 + $0x44c] sm:$0xf]  ;;  %v5450_v22 = vld [vmem:[%s7671_s2 + $0x478] sm:$0xf0] }
 0x2cf   : > { %2559 = vmatpush.bf16.msra.mxu0 %v4913_v31  ;;  %v8086_v28 = vpop.f32.mrf.mxu0  ;;  %v5441_v31 = vor.u32 %v6378_v27, %v5440_v26  ;;  %v6361_v27 = vld [vmem:[%s7671_s2 + $0x3ec] sm:$0xf] }
 0x2d0   : > { %2587 = vmatpush.bf16.msra.mxu2 %v4917_v36  ;;  %v5597_v36 = vor.u32 %v6409_v32, %v5594_v33  ;;  %v6349_v33 = vld [vmem:[%s7671_s2 + $0x38c] sm:$0xf] }
 0x2d1   : > { %2601 = vmatpush.bf16.msra.mxu3 %v5301_v19  ;;  %v8092_v34 = vpop.f32.mrf.mxu1  ;;  %2570 = vmatpush.bf16.msra.mxu1 %v5441_v31  ;;  %v6403_v31 = vld [vmem:[%s7671_s2 + $0x534] sm:$0xf0] }
 0x2d2   : > { %2560 = vmatmul.bf16.vlgmr.msra.gmra.mxu0 %v7818_v14  ;;  %v5545_v32 = vor.u32 %v6403_v31, %v5544_v30  ;;  %v1351_v31 = vperm.slane %v8100_v43, 7 }
 0x2d3   : > { %2608 = vmatpush.bf16.msrb.mxu0 %v5257_v35  ;;  %2588 = vmatmul.bf16.vlgmr.msra.gmra.mxu2 %v7818_v14  ;;  %v5017_v35 = vor.u32 %v6271_v23, %v5016_v18  ;;  %v5641_v18 = vor.u32 %v6427_v16, %v5640_v15  ;;  %v5453_v23 = vor.u32 %v6373_v21, %v5450_v22 }
 0x2d4   : > { %2636 = vmatpush.bf16.msrb.mxu2 %v5261_v39  ;;  %v4968_v39 = vld [vmem:[%s7671_s2 + $0x88] sm:$0xf]  ;;  %2602 = vmatmul.bf16.vlgmr.msra.gmra.mxu3 %v7822_v20 }
 0x2d5   : > { %2650 = vmatpush.bf16.msrb.mxu3 %v5645_v25  ;;  %v4969_v49 = vor.u32 %v6259_v40, %v4968_v39  ;;  %2571 = vmatpush.bf16.msra.mxu1 %v5393_v42  ;;  %v6415_v25 = vld [vmem:[%s7671_s2 + $0x594] sm:$0xf0]  ;;  %v5497_v39 = vor.u32 %v6391_v38, %v5496_v37  ;;  %v6337_v40 = vld [vmem:[%s7671_s2 + $0x32c] sm:$0xf] }
 0x2d6   : > { %v8106_v48 = vpop.f32.mrf.mxu2 }
 0x2d7   : > { %2609 = vmatpush.bf16.msrb.mxu0 %v5209_v46  ;;  %v1344_v46 = vperm.slane %v8100_v43, 0  ;;  %v2339_v59 = vpop.f32.mrf.mxu0 }
 0x2d8   : > { %2637 = vmatpush.bf16.msrb.mxu2 %v5213_v50  ;;  %v5546_v50 = vld [vmem:[%s7671_s2 + $0x538] sm:$0xf0] }
 0x2d9   : > { %2651 = vmatpush.bf16.msrb.mxu3 %v5597_v36  ;;  %v5549_v57 = vor.u32 %v6397_v47, %v5546_v50  ;;  %v2340_v0 = vadd.f32 %v2339_v59, %v1344_v46  ;;  %v2353_v4 = vpop.f32.mrf.mxu1  ;;  %2572 = vmatpush.bf16.msra.mxu1 %v5345_v58  ;;  %v5449_v47 = vor.u32 %v6379_v45, %v5448_v44 }
 0x2db   : > { %2610 = vmatpush.bf16.msrb.mxu0 %v5161_v60  ;;  %v4922_v60 = vld [vmem:[%s7671_s2 + $0x58] sm:$0xf0] }
 0x2dc   : > { %2638 = vmatpush.bf16.msrb.mxu2 %v5165_v63  ;;  %v8117_v63 = vpop.f32.mrf.mxu3  ;;  %v4925_v8 = vor.u32 %v6241_v56, %v4922_v60  ;;  %v5304_v60 = vld [vmem:[%s7671_s2 + $0x328] sm:$0xf] }
 0x2dd   : > { %2652 = vmatpush.bf16.msrb.mxu3 %v5549_v57  ;;  %v5305_v62 = vor.u32 %v6343_v61, %v5304_v60 }
 0x2de   : > { %v2367_v9 = vpop.f32.mrf.mxu2 }
 0x2df   : > { %2611 = vmatpush.bf16.msrb.mxu0 %v5113_v7  ;;  %v8122_v7 = vadd.f32 %v2353_v4, %v2340_v0  ;;  %v2368_v10 = vadd.f32 %v2367_v9, %v1345_v6 }
 0x2e0   : > { %2639 = vmatpush.bf16.msrb.mxu2 %v5117_v11  ;;  %v5296_v11 = vld [vmem:[%s7671_s2 + $0x320] sm:$0xf] }
 0x2e1   : > { %2653 = vmatpush.bf16.msrb.mxu3 %v5501_v3  ;;  %v5297_v13 = vor.u32 %v6342_v12, %v5296_v11 }
 0x2e3   : > { %2612 = vmatpush.bf16.msrb.mxu0 %v5065_v17  ;;  %2573 = vmatpush.bf16.msra.mxu1 %v5297_v13  ;;  %v1349_v13 = vperm.slane %v8100_v43, 5 }
 0x2e4   : > { %2640 = vmatpush.bf16.msrb.mxu2 %v5069_v24  ;;  %v2381_v17 = vpop.f32.mrf.mxu3  ;;  %v5592_v24 = vld [vmem:[%s7671_s2 + $0x568] sm:$0xf] }
 0x2e5   : > { %v8131_v19 = vadd.f32 %v2381_v17, %v2368_v10  ;;  %2654 = vmatpush.bf16.msrb.mxu3 %v5453_v23  ;;  %v5593_v26 = vor.u32 %v6415_v25, %v5592_v24  ;;  %v2338_v10 = vadd.f32 %v8086_v28, %v1344_v46  ;;  %v1350_v23 = vperm.slane %v8100_v43, 6 }
 0x2e6   : > { %2574 = vmatmul.bf16.vlgmr.msra.gmra.mxu1 %v7822_v20  ;;  %v1346_v24 = vperm.slane %v8100_v43, 2 }
 0x2e7   : > { %2613 = vmatpush.bf16.msrb.mxu0 %v5017_v35  ;;  %2622 = vmatpush.bf16.msrb.mxu1 %v5641_v18  ;;  %v5354_v35 = vld [vmem:[%s7671_s2 + $0x3b8] sm:$0xf0]  ;;  %v2352_v15 = vadd.f32 %v8092_v34, %v2338_v10  ;;  %v2366_v18 = vadd.f32 %v8106_v48, %v1345_v6 }
 0x2e8   : > { %2641 = vmatpush.bf16.msrb.mxu2 %v5021_v41  ;;  %v5357_v36 = vor.u32 %v6349_v33, %v5354_v35  ;;  %v5306_v41 = vld [vmem:[%s7671_s2 + $0x358] sm:$0xf0] }
 0x2e9   : > { %v5309_v42 = vor.u32 %v6337_v40, %v5306_v41  ;;  %v2380_v22 = vadd.f32 %v8117_v63, %v2366_v18  ;;  %v1347_v63 = vperm.slane %v8100_v43, 3 }
 0x2eb   : > { %2614 = vmatpush.bf16.msrb.mxu0 %v4969_v49  ;;  %2623 = vmatpush.bf16.msrb.mxu1 %v5593_v26 }
 0x2ec   : > { %2642 = vmatpush.bf16.msrb.mxu2 %v4973_v55  ;;  %v6355_v55 = vld [vmem:[%s7671_s2 + $0x3b4] sm:$0xf0] }
 0x2ed   : > { %v5353_v57 = vor.u32 %v6355_v55, %v5352_v54 }
 0x2ef   : > { %2615 = vmatpush.bf16.msrb.mxu0 %v4921_v5  ;;  %2624 = vmatpush.bf16.msrb.mxu1 %v5545_v32  ;;  %v2393_v49 = vpop.f32.mrf.mxu0  ;;  %v1348_v5 = vperm.slane %v8100_v43, 4 }
 0x2f0   : > { %2643 = vmatpush.bf16.msrb.mxu2 %v4925_v8 }
 0x2f2   : > { %2616 = vmatmul.bf16.vlgmr.msrb.gmra.mxu0 %v7818_v14 }
 0x2f3   : > { %2644 = vmatmul.bf16.vlgmr.msrb.gmra.mxu2 %v7818_v14  ;;  %v5405_v14 = vor.u32 %v6361_v27, %v5402_v29  ;;  %2625 = vmatpush.bf16.msrb.mxu1 %v5497_v39  ;;  %v2407_v50 = vpop.f32.mrf.mxu1 }
 0x2f5   : > { %2655 = vmatpush.bf16.msrb.mxu3 %v5405_v14  ;;  %v2394_v14 = vadd.f32 %v2393_v49, %v1346_v24 }
 0x2f6   : > { %v2421_v56 = vpop.f32.mrf.mxu2 }
 0x2f7   : > { %2626 = vmatpush.bf16.msrb.mxu1 %v5449_v47  ;;  %v2435_v58 = vpop.f32.mrf.mxu3  ;;  %v8156_v59 = vpop.f32.mrf.mxu0  ;;  %v2408_v32 = vadd.f32 %v2407_v50, %v2394_v14  ;;  %v2422_v39 = vadd.f32 %v2421_v56, %v1347_v63 }
 0x2f8   : > { %v2396_v52 = vadd.f32 %v8156_v59, %v1346_v24 }
 0x2f9   : > { %2656 = vmatpush.bf16.msrb.mxu3 %v5357_v36  ;;  %v2436_v47 = vadd.f32 %v2435_v58, %v2422_v39 }
 0x2fb   : > { %2627 = vmatpush.bf16.msrb.mxu1 %v5401_v53  ;;  %v8160_v0 = vpop.f32.mrf.mxu1 }
 0x2fc   : > { %v2410_v53 = vadd.f32 %v8160_v0, %v2396_v52 }
 0x2fd   : > { %2657 = vmatpush.bf16.msrb.mxu3 %v5309_v42 }
 0x2fe   : > { %v8162_v3 = vpop.f32.mrf.mxu2 }
 0x2ff   : > { %2628 = vmatpush.bf16.msrb.mxu1 %v5353_v57  ;;  %v8165_v4 = vpop.f32.mrf.mxu3  ;;  %v2424_v54 = vadd.f32 %v8162_v3, %v1347_v63  ;;  %v1341_v57 = vld [vmem:[%s7679_s21 + $0x8] sm:$0xf]  ;;  %s8640_s21 = sld [smem:[#allocation34_spill]] }
 0x300   : > { %2658 = vmatmul.bf16.vlgmr.msrb.gmra.mxu3 %v7822_v20  ;;  %v1352_v58 = vperm.slane %v1341_v57, 0  ;;  %v1354_v10 = vperm.slane %v1341_v57, 2 }
 0x301   : > { %v2438_v55 = vadd.f32 %v8165_v4, %v2424_v54 }
 0x303   : > { %2629 = vmatpush.bf16.msrb.mxu1 %v5305_v62  ;;  %v1353_v62 = vperm.slane %v1341_v57, 1 }
 0x306   : > { %2630 = vmatmul.bf16.vlgmr.msrb.gmra.mxu1 %v7822_v20 }
 0x30f   : > { %v2449_v8 = vpop.f32.mrf.mxu0 }
 0x310   : > { %v2450_v9 = vadd.f32 %v2449_v8, %v1348_v5 }
 0x313   : > { %v2463_v11 = vpop.f32.mrf.mxu1 }
 0x314   : > { %v2464_v12 = vadd.f32 %v2463_v11, %v2450_v9 }
 0x316   : > { %2680 = vmatpush.xpose.msra.mxu0 %v2464_v12  ;;  %v2477_v16 = vpop.f32.mrf.mxu2 }
 0x317   : > { %v2478_v17 = vadd.f32 %v2477_v16, %v1349_v13  ;;  %v2491_v20 = vpop.f32.mrf.mxu3  ;;  %v2451_v28 = vpop.f32.mrf.mxu0 }
 0x318   : > { %v2452_v25 = vadd.f32 %v2451_v28, %v1348_v5 }
 0x319   : > { %2681 = vmatmul.f32.vlgmr.msra.gmra.mxu0 %v2352_v15  ;;  %v2492_v21 = vadd.f32 %v2491_v20, %v2478_v17 }
 0x31b   : > { %2735 = vmatpush.xpose.msra.mxu2 %v2492_v21  ;;  %v2465_v46 = vpop.f32.mrf.mxu1 }
 0x31c   : > { %v2466_v30 = vadd.f32 %v2465_v46, %v2452_v25 }
 0x31e   : > { %2736 = vmatmul.f32.vlgmr.msra.gmra.mxu2 %v2380_v22  ;;  %v2479_v34 = vpop.f32.mrf.mxu2 }
 0x31f   : > { %v2493_v26 = vpop.f32.mrf.mxu3  ;;  %v2480_v33 = vadd.f32 %v2479_v34, %v1349_v13  ;;  %v1355_v13 = vperm.slane %v1341_v57, 3 }
 0x321   : > { %v2494_v42 = vadd.f32 %v2493_v26, %v2480_v33 }
 0x32f   : > { %v2505_v27 = vpop.f32.mrf.mxu0 }
 0x330   : > { %v2506_v29 = vadd.f32 %v2505_v27, %v1350_v23  ;;  %v1145_v27 = vld [vmem:[%s8640_s21] sm:$0x3] }
 0x331   : > { %v2882_v39 = vperm.slane %v1145_v27, 1 }
 0x332   : > { %v2519_v48 = vpop.f32.mrf.mxu1 }
 0x333   : > { %v2520_v6 = vadd.f32 %v2519_v48, %v2506_v29  ;;  %v2664_v29 = vperm.slane %v1145_v27, 0 }
 0x335   : > { %2789 = vmatpush.xpose.msrb.mxu0 %v2520_v6 }
 0x336   : > { %v2533_v35 = vpop.f32.mrf.mxu2 }
 0x337   : > { %v2547_v36 = vpop.f32.mrf.mxu3  ;;  %v2534_v37 = vadd.f32 %v2533_v35, %v1351_v31  ;;  %v2507_v38 = vpop.f32.mrf.mxu0 }
 0x338   : > { %2790 = vmatmul.f32.vlgmr.msrb.gmra.mxu0 %v2408_v32  ;;  %v2508_v40 = vadd.f32 %v2507_v38, %v1350_v23 }
 0x339   : > { %2898 = vmatpush.xpose.msra.mxu0 %v2466_v30  ;;  %v2548_v41 = vadd.f32 %v2547_v36, %v2534_v37 }
 0x33a   : > { %v2521_v44 = vpop.f32.mrf.mxu1 }
 0x33b   : > { %2843 = vmatpush.xpose.msrb.mxu2 %v2548_v41  ;;  %v2522_v45 = vadd.f32 %v2521_v44, %v2508_v40 }
 0x33d   : > { %3006 = vmatpush.xpose.msrb.mxu0 %v2522_v45 }
 0x33e   : > { %v2535_v43 = vpop.f32.mrf.mxu2  ;;  %2844 = vmatmul.f32.vlgmr.msrb.gmra.mxu2 %v2436_v47 }
 0x33f   : > { %2952 = vmatpush.xpose.msra.mxu2 %v2494_v42  ;;  %v2536_v49 = vadd.f32 %v2535_v43, %v1351_v31  ;;  %v2549_v50 = vpop.f32.mrf.mxu3 }
 0x340   : > { %2899 = vmatmul.f32.vlgmr.msra.gmra.mxu0 %v8122_v7 }
 0x341   : > { %v2550_v51 = vadd.f32 %v2549_v50, %v2536_v49 }
 0x343   : > { %3060 = vmatpush.xpose.msrb.mxu2 %v2550_v51 }
 0x346   : > { %2953 = vmatmul.f32.vlgmr.msra.gmra.mxu2 %v8131_v19 }
 0x348   : > { %3007 = vmatmul.f32.vlgmr.msrb.gmra.mxu0 %v2410_v53 }
 0x34e   : > { %3061 = vmatmul.f32.vlgmr.msrb.gmra.mxu2 %v2438_v55 }
 0x34f   : > { %v2561_v56 = vpop.f32.mrf.mxu0 }
 0x350   : > { %v2562_v4 = vadd.f32 %v2561_v56, %v1352_v58 }
 0x356   : > { %v2589_v60 = vpop.f32.mrf.mxu2 }
 0x357   : > { %v2563_v61 = vpop.f32.mrf.mxu0  ;;  %v2590_v8 = vadd.f32 %v2589_v60, %v1353_v62  ;;  %v2603_v9 = vpop.f32.mrf.mxu3 }
 0x358   : > { %v2564_v7 = vadd.f32 %v2563_v61, %v1352_v58 }
 0x359   : > { %v2604_v0 = vadd.f32 %v2603_v9, %v2590_v8 }
 0x35b   : > { %2769 = vmatpush.msra.mxu3 %v2604_v0 }
 0x35e   : > { %v2591_v5 = vpop.f32.mrf.mxu2 }
 0x35f   : > { %v2592_v59 = vadd.f32 %v2591_v5, %v1353_v62  ;;  %v2605_v16 = vpop.f32.mrf.mxu3 }
 0x361   : > { %v8190_v18 = vadd.f32 %v2605_v16, %v2592_v59 }
 0x363   : > { %v2575_v15 = vpop.f32.mrf.mxu1 }
 0x364   : > { %v2576_v20 = vadd.f32 %v2575_v15, %v2562_v4 }
 0x366   : > { %2715 = vmatpush.msra.mxu1 %v2576_v20 }
 0x36b   : > { %v2577_v28 = vpop.f32.mrf.mxu1 }
 0x36c   : > { %v8194_v23 = vadd.f32 %v2577_v28, %v2564_v7 }
 0x36f   : > { %v2617_v19 = vpop.f32.mrf.mxu0 }
 0x370   : > { %v2618_v34 = vadd.f32 %v2617_v19, %v1354_v10 }
 0x376   : > { %v2645_v3 = vpop.f32.mrf.mxu2 }
 0x377   : > { %v2619_v11 = vpop.f32.mrf.mxu0  ;;  %v2646_v22 = vadd.f32 %v2645_v3, %v1355_v13 }
 0x378   : > { %v8188_v12 = vadd.f32 %v2619_v11, %v1354_v10 }
 0x37e   : > { %v2647_v17 = vpop.f32.mrf.mxu2 }
 0x37f   : > { %v8192_v21 = vadd.f32 %v2647_v17, %v1355_v13 }
 0x383   : > { %v2659_v46 = vpop.f32.mrf.mxu3  ;;  %v2631_v25 = vpop.f32.mrf.mxu1 }
 0x384   : > { %v2660_v24 = vadd.f32 %v2659_v46, %v2646_v22  ;;  %v2632_v26 = vadd.f32 %v2631_v25, %v2618_v34 }
 0x386   : > { %2877 = vmatpush.msrb.mxu3 %v2660_v24  ;;  %2823 = vmatpush.msrb.mxu1 %v2632_v26 }
 0x396   : > { %v2682_v6 = vpop.f32.mrf.mxu0 }
 0x397   : > { %v2683_v31 = vadd.f32 %v2682_v6, %v2664_v29 }
 0x399   : > { %v2686_v63 = vsel %vm2685_vm7, %v2683_v31, -inf }
 0x3a1   : > { %v2737_v14 = vpop.f32.mrf.mxu2 }
 0x3a2   : > { %v2738_v30 = vadd.f32 %v2737_v14, %v2664_v29 }
 0x3a4   : > { %v2740_v48 = vsel %vm2685_vm7, %v2738_v30, -inf }
 0x3a5   : > { %2741 = vmax.xlane.f32.xlu0 %v2740_v48 }
 0x3ad   : > { %2687 = vmax.xlane.f32.xlu0 %v2686_v63 }
 0x3b5   : > { %v2791_v32 = vpop.f32.mrf.mxu0 }
 0x3b6   : > { %v2792_v38 = vadd.f32 %v2791_v32, %v2664_v29 }
 0x3b8   : > { %v2794_v44 = vsel %vm2685_vm7, %v2792_v38, -inf }
 0x3bd   : > { %v2900_v36 = vpop.f32.mrf.mxu0 }
 0x3be   : > { %v2901_v47 = vadd.f32 %v2900_v36, %v2882_v39 }
 0x3c0   : > { %v2903_v51 = vsel %vm2685_vm7, %v2901_v47, -inf }
 0x3c1   : > { %v2845_v33 = vpop.f32.mrf.mxu2 }
 0x3c2   : > { %v2846_v35 = vadd.f32 %v2845_v33, %v2664_v29 }
 0x3c4   : > { %v2848_v37 = vsel %vm2685_vm7, %v2846_v35, -inf }
 0x3c5   : > { %2849 = vmax.xlane.f32.xlu1 %v2848_v37  ;;  %v3008_v45 = vpop.f32.mrf.mxu0 }
 0x3c6   : > { %v3009_v43 = vadd.f32 %v3008_v45, %v2882_v39  ;;  %v2661_v45 = vpop.f32.mrf.mxu3 }
 0x3c8   : > { %v3011_v52 = vsel %vm2685_vm7, %v3009_v43, -inf }
 0x3c9   : > { %v2954_v40 = vpop.f32.mrf.mxu2 }
 0x3ca   : > { %v2955_v41 = vadd.f32 %v2954_v40, %v2882_v39 }
 0x3cc   : > { %v2957_v42 = vsel %vm2685_vm7, %v2955_v41, -inf }
 0x3cd   : > { %2958 = vmax.xlane.f32.xlu2 %v2957_v42  ;;  %2795 = vmax.xlane.f32.xlu1 %v2794_v44  ;;  %v6443_v42 = vld [vmem:[%s7681_s25 + $0x74] sm:$0xf0] }
 0x3d1   : > { %v3062_v49 = vpop.f32.mrf.mxu2 }
 0x3d2   : > { %v3063_v50 = vadd.f32 %v3062_v49, %v2882_v39 }
 0x3d4   : > { %v3065_v53 = vsel %vm2685_vm7, %v3063_v50, -inf }
 0x3d5   : > { %2904 = vmax.xlane.f32.xlu2 %v2903_v51  ;;  %3012 = vmax.xlane.f32.xlu1 %v3011_v52 }
 0x3d6   : > { %3066 = vmax.xlane.f32.xlu0 %v3065_v53 }
 0x418   : > { %v2742_v54 = vpop.xlane.xlu0 %2741 }
 0x419   : > { %v2743_v55 = vsub.f32 %v2738_v30, %v2742_v54 }
 0x41b   : > { %v2744_v56 = vmul.f32 1.442695, %v2743_v55 }
 0x41d   : > { %6685 = vpow2.f32 %v2744_v56 }
 0x420   : > { %v2688_v57 = vpop.xlane.xlu0 %2687 }
 0x421   : > { %v2689_v58 = vsub.f32 %v2683_v31, %v2688_v57 }
 0x423   : > { %v6686_v60 = vpop.eup %6685  ;;  %v2690_v61 = vmul.f32 1.442695, %v2689_v58  ;;  %v5776_v58 = vld [vmem:[%s7681_s25 + $0xf0] sm:$0xf] }
 0x424   : > { %v2746_v7 = vsel %vm2685_vm7, %v6686_v60, 0.0 }
 0x425   : > { %6687 = vpow2.f32 %v2690_v61  ;;  %2747 = vadd.xlane.f32.xlu2 %v2746_v7 }
 0x42b   : > { %v6688_v62 = vpop.eup %6687 }
 0x42c   : > { %v2692_v5 = vsel %vm2685_vm7, %v6688_v62, 0.0 }
 0x42d   : > { %2693 = vadd.xlane.f32.xlu0 %v2692_v5 }
 0x438   : > { %v2850_v59 = vpop.xlane.xlu1 %2849 }
 0x439   : > { %v2851_v8 = vsub.f32 %v2846_v35, %v2850_v59 }
 0x43b   : > { %v2852_v9 = vmul.f32 1.442695, %v2851_v8 }
 0x43d   : > { %6689 = vpow2.f32 %v2852_v9  ;;  %v5768_v9 = vld [vmem:[%s7681_s25 + $0xe0] sm:$0xf] }
 0x440   : > { %v2959_v0 = vpop.xlane.xlu2 %2958  ;;  %v2796_v19 = vpop.xlane.xlu1 %2795 }
 0x441   : > { %v2960_v10 = vsub.f32 %v2955_v41, %v2959_v0  ;;  %v2797_v3 = vsub.f32 %v2792_v38, %v2796_v19  ;;  %v5712_v41 = vld [vmem:[%s7681_s25 + $0x70] sm:$0xf]  ;;  %v6457_v0 = vld [vmem:[%s7681_s25 + $0xe4] sm:$0xf0] }
 0x442   : > { %v5713_v44 = vor.u32 %v6443_v42, %v5712_v41  ;;  %v5769_v19 = vor.u32 %v6457_v0, %v5768_v9  ;;  %v6435_v42 = vld [vmem:[%s7681_s25 + $0x34] sm:$0xf0] }
 0x443   : > { %v6690_v11 = vpop.eup %6689  ;;  %v2961_v4 = vmul.f32 1.442695, %v2960_v10  ;;  %v2798_v13 = vmul.f32 1.442695, %v2797_v3  ;;  %v5704_v10 = vld [vmem:[%s7681_s25 + $0x60] sm:$0xf] }
 0x444   : > { %v2854_v15 = vsel %vm2685_vm7, %v6690_v11, 0.0  ;;  %3493 = vmatpush.bf16.msra.mxu0 %v5713_v44  ;;  %v6441_v3 = vld [vmem:[%s7681_s25 + $0x64] sm:$0xf0]  ;;  %v5824_v44 = vld [vmem:[%s7681_s25 + $0x150] sm:$0xf] }
 0x445   : > { %6691 = vpow2.f32 %v2961_v4  ;;  %2855 = vadd.xlane.f32.xlu1 %v2854_v15  ;;  %v5705_v4 = vor.u32 %v6441_v3, %v5704_v10  ;;  %v5904_v15 = vld [vmem:[%s7681_s25 + $0x1f0] sm:$0xf]  ;;  %v6431_v9 = vld [vmem:[%s7681_s25 + $0x14] sm:$0xf0]  ;;  %v6481_v10 = vld [vmem:[%s7681_s25 + $0x1a4] sm:$0xf0] }
 0x446   : > { %6693 = vpow2.f32 %v2798_v13  ;;  %v6455_v13 = vld [vmem:[%s7681_s25 + $0xd4] sm:$0xf0] }
 0x448   : > { %v2905_v16 = vpop.xlane.xlu2 %2904  ;;  %v3013_v17 = vpop.xlane.xlu1 %3012  ;;  %3494 = vmatpush.bf16.msra.mxu0 %v5705_v4  ;;  %v6445_v4 = vld [vmem:[%s7681_s25 + $0x84] sm:$0xf0] }
 0x449   : > { %v2906_v20 = vsub.f32 %v2901_v47, %v2905_v16  ;;  %v3014_v22 = vsub.f32 %v3009_v43, %v3013_v17  ;;  %v3067_v28 = vpop.xlane.xlu0 %3066  ;;  %v6491_v16 = vld [vmem:[%s7681_s25 + $0x1f4] sm:$0xf0] }
 0x44a   : > { %v3068_v46 = vsub.f32 %v3063_v50, %v3067_v28  ;;  %v2662_v50 = vadd.f32 %v2661_v45, %v8192_v21  ;;  %v6439_v28 = vld [vmem:[%s7681_s25 + $0x54] sm:$0xf0] }
 0x44b   : > { %v6692_v24 = vpop.eup %6691  ;;  %v2907_v34 = vmul.f32 1.442695, %v2906_v20  ;;  %v3015_v25 = vmul.f32 1.442695, %v3014_v22  ;;  %v5905_v20 = vor.u32 %v6491_v16, %v5904_v15  ;;  %v5696_v22 = vld [vmem:[%s7681_s25 + $0x50] sm:$0xf] }
 0x44c   : > { %v6694_v26 = vpop.eup %6693  ;;  %v3069_v27 = vmul.f32 1.442695, %v3068_v46  ;;  %v2963_v29 = vsel %vm2685_vm7, %v6692_v24, 0.0  ;;  %v5840_v46 = vld [vmem:[%s7681_s25 + $0x170] sm:$0xf] }
 0x44d   : > { %6695 = vpow2.f32 %v2907_v34  ;;  %v2800_v14 = vsel %vm2685_vm7, %v6694_v26, 0.0  ;;  %2964 = vadd.xlane.f32.xlu0 %v2963_v29  ;;  %v6475_v34 = vld [vmem:[%s7681_s25 + $0x174] sm:$0xf0]  ;;  %v5896_v29 = vld [vmem:[%s7681_s25 + $0x1e0] sm:$0xf] }
 0x44e   : > { %6697 = vpow2.f32 %v3015_v25  ;;  %2801 = vadd.xlane.f32.xlu2 %v2800_v14  ;;  %v5752_v25 = vld [vmem:[%s7681_s25 + $0xc0] sm:$0xf]  ;;  %v6489_v14 = vld [vmem:[%s7681_s25 + $0x1e4] sm:$0xf0]  ;;  %v6471_v45 = vld [vmem:[%s7681_s25 + $0x154] sm:$0xf0] }
 0x44f   : > { %6699 = vpow2.f32 %v3069_v27  ;;  %v5841_v27 = vor.u32 %v6475_v34, %v5840_v46  ;;  %v5778_v16 = vld [vmem:[%s7681_s25 + $0xf8] sm:$0xf0]  ;;  %v6429_v46 = vld [vmem:[%s7681_s25 + $0x4] sm:$0xf0] }
 0x451   : > { %3521 = vmatpush.bf16.msra.mxu2 %v5841_v27  ;;  %v6479_v27 = vld [vmem:[%s7681_s25 + $0x194] sm:$0xf0] }
 0x453   : > { %v6696_v30 = vpop.eup %6695 }
 0x454   : > { %v6698_v48 = vpop.eup %6697  ;;  %v2909_v6 = vsel %vm2685_vm7, %v6696_v30, 0.0 }
 0x455   : > { %v6700_v31 = vpop.eup %6699  ;;  %2910 = vadd.xlane.f32.xlu1 %v2909_v6  ;;  %v3017_v63 = vsel %vm2685_vm7, %v6698_v48, 0.0  ;;  %v5897_v6 = vor.u32 %v6489_v14, %v5896_v29 }
 0x456   : > { %3018 = vadd.xlane.f32.xlu0 %v3017_v63  ;;  %v3071_v32 = vsel %vm2685_vm7, %v6700_v31, 0.0  ;;  %v5832_v63 = vld [vmem:[%s7681_s25 + $0x160] sm:$0xf] }
 0x457   : > { %3072 = vadd.xlane.f32.xlu2 %v3071_v32  ;;  %v6473_v32 = vld [vmem:[%s7681_s25 + $0x164] sm:$0xf0] }
 0x498   : > { %v2748_v33 = vpop.xlane.xlu2 %2747 }
 0x499   : > { %6701 = vrcp.f32 %v2748_v33  ;;  %v5833_v33 = vor.u32 %v6473_v32, %v5832_v63  ;;  %v5770_v63 = vld [vmem:[%s7681_s25 + $0xe8] sm:$0xf0] }
 0x49b   : > { %3522 = vmatpush.bf16.msra.mxu2 %v5833_v33  ;;  %v5792_v33 = vld [vmem:[%s7681_s25 + $0x110] sm:$0xf] }
 0x49f   : > { %v6702_v35 = vpop.eup %6701 }
 0x4a0   : > { %v2750_v36 = vmul.f32 %v6702_v35, %v6686_v60  ;;  %v2694_v37 = vpop.xlane.xlu0 %2693  ;;  %v6459_v60 = vld [vmem:[%s7681_s25 + $0xf4] sm:$0xf0]  ;;  %v5744_v35 = vld [vmem:[%s7681_s25 + $0xb0] sm:$0xf] }
 0x4a1   : > { %6703 = vrcp.f32 %v2694_v37  ;;  %v5888_v37 = vld [vmem:[%s7681_s25 + $0x1d0] sm:$0xf] }
 0x4a2   : > { %5647 = vmatmul.msk.f32.vlgmr.msra.gmra.mxu3 %vm2685_vm7, %v2750_v36  ;;  %v6451_v36 = vld [vmem:[%s7681_s25 + $0xb4] sm:$0xf0] }
 0x4a3   : > { %2986 = vmatpush.msra.mxu3 %v8190_v18 }
 0x4a7   : > { %v6704_v38 = vpop.eup %6703 }
 0x4a8   : > { %v2696_v39 = vmul.f32 %v6704_v38, %v6688_v62  ;;  %v5777_v62 = vor.u32 %v6459_v60, %v5776_v58  ;;  %v6483_v58 = vld [vmem:[%s7681_s25 + $0x1b4] sm:$0xf0] }
 0x4aa   : > { %5646 = vmatmul.msk.f32.vlgmr.msra.gmra.mxu1 %vm2685_vm7, %v2696_v39  ;;  %v6487_v39 = vld [vmem:[%s7681_s25 + $0x1d4] sm:$0xf0] }
 0x4ab   : > { %2932 = vmatpush.msra.mxu1 %v8194_v23  ;;  %v2633_v23 = vpop.f32.mrf.mxu1  ;;  %v5889_v41 = vor.u32 %v6487_v39, %v5888_v37  ;;  %v6440_v37 = vld [vmem:[%s7681_s25 + $0x64] sm:$0xf] }
 0x4ac   : > { %v2634_v56 = vadd.f32 %v2633_v23, %v8188_v12 }
 0x4b8   : > { %v2856_v40 = vpop.xlane.xlu1 %2855 }
 0x4b9   : > { %6705 = vrcp.f32 %v2856_v40  ;;  %v5680_v40 = vld [vmem:[%s7681_s25 + $0x30] sm:$0xf] }
 0x4ba   : > { %v5681_v23 = vor.u32 %v6435_v42, %v5680_v40  ;;  %v5848_v40 = vld [vmem:[%s7681_s25 + $0x180] sm:$0xf] }
 0x4bf   : > { %v6706_v47 = vpop.eup %6705 }
 0x4c0   : > { %v2858_v43 = vmul.f32 %v6706_v47, %v6690_v11  ;;  %v2965_v49 = vpop.xlane.xlu0 %2964  ;;  %v5760_v11 = vld [vmem:[%s7681_s25 + $0xd0] sm:$0xf]  ;;  %v5745_v47 = vor.u32 %v6451_v36, %v5744_v35  ;;  %v6463_v35 = vld [vmem:[%s7681_s25 + $0x114] sm:$0xf0] }
 0x4c1   : > { %v2802_v51 = vpop.xlane.xlu2 %2801  ;;  %6707 = vrcp.f32 %v2965_v49  ;;  %v5761_v17 = vor.u32 %v6455_v13, %v5760_v11  ;;  %v6485_v49 = vld [vmem:[%s7681_s25 + $0x1c4] sm:$0xf0]  ;;  %v5720_v11 = vld [vmem:[%s7681_s25 + $0x80] sm:$0xf]  ;;  %v6458_v13 = vld [vmem:[%s7681_s25 + $0xf4] sm:$0xf]  ;;  %v5793_v36 = vor.u32 %v6463_v35, %v5792_v33 }
 0x4c2   : > { %6709 = vrcp.f32 %v2802_v51  ;;  %5649 = vmatmul.msk.f32.vlgmr.msrb.gmra.mxu3 %vm2685_vm7, %v2858_v43  ;;  %v5880_v43 = vld [vmem:[%s7681_s25 + $0x1c0] sm:$0xf]  ;;  %v5721_v34 = vor.u32 %v6445_v4, %v5720_v11  ;;  %v5781_v29 = vor.u32 %v6458_v13, %v5778_v16  ;;  %v5890_v4 = vld [vmem:[%s7681_s25 + $0x1d8] sm:$0xf0]  ;;  %v6482_v33 = vld [vmem:[%s7681_s25 + $0x1b4] sm:$0xf] }
 0x4c3   : > { %3094 = vmatpush.msrb.mxu3 %v2662_v50  ;;  %v5825_v50 = vor.u32 %v6471_v45, %v5824_v44  ;;  %v5736_v51 = vld [vmem:[%s7681_s25 + $0xa0] sm:$0xf]  ;;  %v6454_v44 = vld [vmem:[%s7681_s25 + $0xd4] sm:$0xf]  ;;  %v5762_v45 = vld [vmem:[%s7681_s25 + $0xd8] sm:$0xf0] }
 0x4c4   : > { %v5682_v16 = vld [vmem:[%s7681_s25 + $0x38] sm:$0xf0] }
 0x4c5   : > { %3523 = vmatpush.bf16.msra.mxu2 %v5825_v50  ;;  %v5784_v50 = vld [vmem:[%s7681_s25 + $0x100] sm:$0xf] }
 0x4c7   : > { %v6708_v18 = vpop.eup %6707 }
 0x4c8   : > { %v6710_v52 = vpop.eup %6709  ;;  %v2967_v53 = vmul.f32 %v6708_v18, %v6692_v24  ;;  %v2911_v54 = vpop.xlane.xlu1 %2910  ;;  %v5697_v24 = vor.u32 %v6439_v28, %v5696_v22  ;;  %v6449_v18 = vld [vmem:[%s7681_s25 + $0xa4] sm:$0xf0]  ;;  %v5656_v28 = vld [vmem:[%s7681_s25] sm:$0xf] }
 0x4c9   : > { %v2804_v55 = vmul.f32 %v6710_v52, %v6694_v26  ;;  %6711 = vrcp.f32 %v2911_v54  ;;  %v3019_v21 = vpop.xlane.xlu0 %3018  ;;  %v6453_v26 = vld [vmem:[%s7681_s25 + $0xc4] sm:$0xf0]  ;;  %v5816_v52 = vld [vmem:[%s7681_s25 + $0x140] sm:$0xf]  ;;  %v5881_v54 = vor.u32 %v6485_v49, %v5880_v43  ;;  %v5765_v43 = vor.u32 %v6454_v44, %v5762_v45  ;;  %v5906_v49 = vld [vmem:[%s7681_s25 + $0x1f8] sm:$0xf0] }
 0x4ca   : > { %v3073_v57 = vpop.xlane.xlu2 %3072  ;;  %5651 = vmatmul.msk.f32.vlgmr.msra.gmra.mxu3 %vm2685_vm7, %v2967_v53  ;;  %3495 = vmatpush.bf16.msra.mxu0 %v5697_v24  ;;  %v6469_v53 = vld [vmem:[%s7681_s25 + $0x144] sm:$0xf0]  ;;  %v6442_v24 = vld [vmem:[%s7681_s25 + $0x74] sm:$0xf]  ;;  %v6444_v44 = vld [vmem:[%s7681_s25 + $0x84] sm:$0xf] }
 0x4cb   : > { %6713 = vrcp.f32 %v3073_v57  ;;  %5648 = vmatmul.msk.f32.vlgmr.msrb.gmra.mxu1 %vm2685_vm7, %v2804_v55  ;;  %3535 = vmatpush.bf16.msra.mxu3 %v5905_v20  ;;  %v5672_v55 = vld [vmem:[%s7681_s25 + $0x20] sm:$0xf]  ;;  %v5737_v57 = vor.u32 %v6449_v18, %v5736_v51  ;;  %v5817_v60 = vor.u32 %v6469_v53, %v5816_v52  ;;  %v6465_v20 = vld [vmem:[%s7681_s25 + $0x124] sm:$0xf0]  ;;  %v6438_v52 = vld [vmem:[%s7681_s25 + $0x54] sm:$0xf] }
 0x4cc   : > { %3040 = vmatpush.msrb.mxu1 %v2634_v56  ;;  %6715 = vrcp.f32 %v3019_v21  ;;  %v6433_v56 = vld [vmem:[%s7681_s25 + $0x24] sm:$0xf0]  ;;  %v5872_v21 = vld [vmem:[%s7681_s25 + $0x1b0] sm:$0xf]  ;;  %v5698_v53 = vld [vmem:[%s7681_s25 + $0x58] sm:$0xf0] }
 0x4cd   : > { %3524 = vmatpush.bf16.msra.mxu2 %v5817_v60  ;;  %v6461_v51 = vld [vmem:[%s7681_s25 + $0x104] sm:$0xf0]  ;;  %v6488_v60 = vld [vmem:[%s7681_s25 + $0x1e4] sm:$0xf]  ;;  %v5722_v45 = vld [vmem:[%s7681_s25 + $0x88] sm:$0xf0] }
 0x4cf   : > { %v6712_v61 = vpop.eup %6711  ;;  %3536 = vmatpush.bf16.msra.mxu3 %v5897_v6 }
 0x4d0   : > { %v2913_v7 = vmul.f32 %v6712_v61, %v6696_v30  ;;  %v5688_v30 = vld [vmem:[%s7681_s25 + $0x40] sm:$0xf]  ;;  %v5728_v61 = vld [vmem:[%s7681_s25 + $0x90] sm:$0xf] }
 0x4d1   : > { %v6714_v12 = vpop.eup %6713 }
 0x4d2   : > { %v3075_v5 = vmul.f32 %v6714_v12, %v6700_v31  ;;  %v6716_v59 = vpop.eup %6715  ;;  %v6437_v31 = vld [vmem:[%s7681_s25 + $0x44] sm:$0xf0]  ;;  %v5808_v12 = vld [vmem:[%s7681_s25 + $0x130] sm:$0xf] }
 0x4d3   : > { %5650 = vmatmul.msk.f32.vlgmr.msra.gmra.mxu1 %vm2685_vm7, %v2913_v7  ;;  %v3021_v8 = vmul.f32 %v6716_v59, %v6698_v48  ;;  %v5753_v48 = vor.u32 %v6453_v26, %v5752_v25  ;;  %v5689_v38 = vor.u32 %v6437_v31, %v5688_v30  ;;  %3537 = vmatpush.bf16.msra.mxu3 %v5889_v41  ;;  %v6447_v7 = vld [vmem:[%s7681_s25 + $0x94] sm:$0xf0]  ;;  %v5714_v25 = vld [vmem:[%s7681_s25 + $0x78] sm:$0xf0]  ;;  %v5856_v26 = vld [vmem:[%s7681_s25 + $0x190] sm:$0xf] }
 0x4d4   : > { %5653 = vmatmul.msk.f32.vlgmr.msrb.gmra.mxu3 %vm2685_vm7, %v3075_v5  ;;  %3507 = vmatpush.bf16.msra.mxu1 %v5777_v62  ;;  %v5673_v62 = vor.u32 %v6433_v56, %v5672_v55  ;;  %v6467_v5 = vld [vmem:[%s7681_s25 + $0x134] sm:$0xf0]  ;;  %v5873_v59 = vor.u32 %v6483_v58, %v5872_v21  ;;  %v5729_v0 = vor.u32 %v6447_v7, %v5728_v61  ;;  %v6456_v31 = vld [vmem:[%s7681_s25 + $0xe4] sm:$0xf]  ;;  %v6477_v41 = vld [vmem:[%s7681_s25 + $0x184] sm:$0xf0] }
 0x4d5   : > { %3496 = vmatpush.bf16.msra.mxu0 %v5689_v38  ;;  %v5809_v3 = vor.u32 %v6467_v5, %v5808_v12  ;;  %v5657_v30 = vor.u32 %v6429_v46, %v5656_v28  ;;  %v5857_v6 = vor.u32 %v6479_v27, %v5856_v26  ;;  %v5773_v32 = vor.u32 %v6456_v31, %v5770_v63  ;;  %v5706_v38 = vld [vmem:[%s7681_s25 + $0x68] sm:$0xf0]  ;;  %v5842_v56 = vld [vmem:[%s7681_s25 + $0x178] sm:$0xf0]  ;;  %v6452_v21 = vld [vmem:[%s7681_s25 + $0xc4] sm:$0xf] }
 0x4d6   : > { %v5709_v39 = vor.u32 %v6440_v37, %v5706_v38  ;;  %v5849_v42 = vor.u32 %v6477_v41, %v5848_v40  ;;  %v5701_v55 = vor.u32 %v6438_v52, %v5698_v53  ;;  %v5754_v58 = vld [vmem:[%s7681_s25 + $0xc8] sm:$0xf0]  ;;  %v6436_v12 = vld [vmem:[%s7681_s25 + $0x44] sm:$0xf]  ;;  %v6446_v63 = vld [vmem:[%s7681_s25 + $0x94] sm:$0xf] }
 0x4d7   : > { %3538 = vmatpush.bf16.msra.mxu3 %v5881_v54  ;;  %3525 = vmatpush.bf16.msra.mxu2 %v5809_v3  ;;  %v6474_v54 = vld [vmem:[%s7681_s25 + $0x174] sm:$0xf]  ;;  %v5757_v61 = vor.u32 %v6452_v21, %v5754_v58  ;;  %v5898_v7 = vld [vmem:[%s7681_s25 + $0x1e8] sm:$0xf0]  ;;  %v6448_v46 = vld [vmem:[%s7681_s25 + $0xa4] sm:$0xf] }
 0x4d8   : > { %3508 = vmatpush.bf16.msra.mxu1 %v5769_v19  ;;  %v5864_v19 = vld [vmem:[%s7681_s25 + $0x1a0] sm:$0xf]  ;;  %v5690_v5 = vld [vmem:[%s7681_s25 + $0x48] sm:$0xf0]  ;;  %v6486_v3 = vld [vmem:[%s7681_s25 + $0x1d4] sm:$0xf] }
 0x4d9   : > { %3497 = vmatpush.bf16.msra.mxu0 %v5681_v23  ;;  %v5865_v22 = vor.u32 %v6481_v10, %v5864_v19  ;;  %v5785_v23 = vor.u32 %v6461_v51, %v5784_v50  ;;  %v6450_v19 = vld [vmem:[%s7681_s25 + $0xb4] sm:$0xf]  ;;  %v5746_v10 = vld [vmem:[%s7681_s25 + $0xb8] sm:$0xf0]  ;;  %v5893_v13 = vor.u32 %v6486_v3, %v5890_v4  ;;  %v5882_v26 = vld [vmem:[%s7681_s25 + $0x1c8] sm:$0xf0] }
 0x4da   : > { %v5749_v11 = vor.u32 %v6450_v19, %v5746_v10  ;;  %v6430_v38 = vld [vmem:[%s7681_s25 + $0x14] sm:$0xf]  ;;  %v5866_v50 = vld [vmem:[%s7681_s25 + $0x1a8] sm:$0xf0]  ;;  %v6428_v51 = vld [vmem:[%s7681_s25 + $0x4] sm:$0xf] }
 0x4db   : > { %5652 = vmatmul.msk.f32.vlgmr.msrb.gmra.mxu1 %vm2685_vm7, %v3021_v8  ;;  %v5664_v8 = vld [vmem:[%s7681_s25 + $0x10] sm:$0xf]  ;;  %3539 = vmatpush.bf16.msra.mxu3 %v5873_v59  ;;  %v6472_v59 = vld [vmem:[%s7681_s25 + $0x164] sm:$0xf]  ;;  %v6466_v40 = vld [vmem:[%s7681_s25 + $0x134] sm:$0xf] }
 0x4dc   : > { %3509 = vmatpush.bf16.msra.mxu1 %v5761_v17  ;;  %v5665_v15 = vor.u32 %v6431_v9, %v5664_v8  ;;  %v5800_v17 = vld [vmem:[%s7681_s25 + $0x120] sm:$0xf]  ;;  %v5693_v8 = vor.u32 %v6436_v12, %v5690_v5  ;;  %v5834_v9 = vld [vmem:[%s7681_s25 + $0x168] sm:$0xf0]  ;;  %v6464_v53 = vld [vmem:[%s7681_s25 + $0x124] sm:$0xf] }
 0x4dd   : > { %3498 = vmatpush.bf16.msra.mxu0 %v5673_v62  ;;  %v5801_v14 = vor.u32 %v6465_v20, %v5800_v17  ;;  %v5901_v62 = vor.u32 %v6488_v60, %v5898_v7  ;;  %v6470_v17 = vld [vmem:[%s7681_s25 + $0x154] sm:$0xf]  ;;  %v5658_v52 = vld [vmem:[%s7681_s25 + $0x8] sm:$0xf0]  ;;  %v5858_v58 = vld [vmem:[%s7681_s25 + $0x198] sm:$0xf0] }
 0x4de   : > { %v6478_v21 = vld [vmem:[%s7681_s25 + $0x194] sm:$0xf]  ;;  %v5794_v7 = vld [vmem:[%s7681_s25 + $0x118] sm:$0xf0]  ;;  %v6476_v12 = vld [vmem:[%s7681_s25 + $0x184] sm:$0xf] }
 0x4df   : > { %3540 = vmatpush.bf16.msra.mxu3 %v5865_v22  ;;  %3526 = vmatpush.bf16.msra.mxu2 %v5801_v14  ;;  %v5826_v22 = vld [vmem:[%s7681_s25 + $0x158] sm:$0xf0]  ;;  %v5674_v14 = vld [vmem:[%s7681_s25 + $0x28] sm:$0xf0]  ;;  %v5861_v60 = vor.u32 %v6478_v21, %v5858_v58 }
 0x4e0   : > { %3510 = vmatpush.bf16.msra.mxu1 %v5753_v48  ;;  %v5717_v48 = vor.u32 %v6442_v24, %v5714_v25  ;;  %v5829_v28 = vor.u32 %v6470_v17, %v5826_v22  ;;  %v5738_v24 = vld [vmem:[%s7681_s25 + $0xa8] sm:$0xf0]  ;;  %v6735_v21 = vld [vmem:[#allocation2 + $0x18] sm:$0xff] }
 0x4e1   : > { %3499 = vmatpush.bf16.msra.mxu0 %v5665_v15  ;;  %v6434_v15 = vld [vmem:[%s7681_s25 + $0x34] sm:$0xf]  ;;  %v5741_v25 = vor.u32 %v6448_v46, %v5738_v24  ;;  %v5850_v5 = vld [vmem:[%s7681_s25 + $0x188] sm:$0xf0] }
 0x4e2   : > { %v5685_v20 = vor.u32 %v6434_v15, %v5682_v16 }
 0x4e3   : > { %3541 = vmatpush.bf16.msra.mxu3 %v5857_v6  ;;  %3527 = vmatpush.bf16.msra.mxu2 %v5793_v36  ;;  %v5818_v6 = vld [vmem:[%s7681_s25 + $0x148] sm:$0xf0]  ;;  %v5874_v36 = vld [vmem:[%s7681_s25 + $0x1b8] sm:$0xf0] }
 0x4e4   : > { %3511 = vmatpush.bf16.msra.mxu1 %v5745_v47  ;;  %v6490_v47 = vld [vmem:[%s7681_s25 + $0x1f4] sm:$0xf]  ;;  %v5877_v37 = vor.u32 %v6482_v33, %v5874_v36 }
 0x4e5   : > { %3500 = vmatpush.bf16.msra.mxu0 %v5657_v30  ;;  %v5909_v18 = vor.u32 %v6490_v47, %v5906_v49  ;;  %v6468_v30 = vld [vmem:[%s7681_s25 + $0x144] sm:$0xf] }
 0x4e6   : > { %v5821_v31 = vor.u32 %v6468_v30, %v5818_v6  ;;  %v6480_v49 = vld [vmem:[%s7681_s25 + $0x1a4] sm:$0xf] }
 0x4e7   : > { %3542 = vmatpush.bf16.msra.mxu3 %v5849_v42  ;;  %3528 = vmatpush.bf16.msra.mxu2 %v5785_v23  ;;  %v5810_v42 = vld [vmem:[%s7681_s25 + $0x138] sm:$0xf0]  ;;  %v5869_v23 = vor.u32 %v6480_v49, %v5866_v50  ;;  %v6734_v50 = vld [vmem:[#allocation2] sm:$0xff] }
 0x4e8   : > { %3512 = vmatpush.bf16.msra.mxu1 %v5737_v57  ;;  %v5845_v57 = vor.u32 %v6474_v54, %v5842_v56  ;;  %v5813_v47 = vor.u32 %v6466_v40, %v5810_v42  ;;  %v5802_v54 = vld [vmem:[%s7681_s25 + $0x128] sm:$0xf0] }
 0x4e9   : > { %3549 = vmatpush.bf16.msrb.mxu0 %v5717_v48  ;;  %v5805_v56 = vor.u32 %v6464_v53, %v5802_v54 }
 0x4eb   : > { %3591 = vmatpush.bf16.msrb.mxu3 %v5909_v18  ;;  %3577 = vmatpush.bf16.msrb.mxu2 %v5845_v57 }
 0x4ec   : > { %3513 = vmatpush.bf16.msra.mxu1 %v5729_v0  ;;  %v5837_v0 = vor.u32 %v6472_v59, %v5834_v9  ;;  %v6460_v59 = vld [vmem:[%s7681_s25 + $0x104] sm:$0xf]  ;;  %v5786_v9 = vld [vmem:[%s7681_s25 + $0x108] sm:$0xf0] }
 0x4ed   : > { %3550 = vmatpush.bf16.msrb.mxu0 %v5709_v39  ;;  %v5666_v39 = vld [vmem:[%s7681_s25 + $0x18] sm:$0xf0]  ;;  %v5789_v19 = vor.u32 %v6460_v59, %v5786_v9 }
 0x4ee   : > { %v5669_v41 = vor.u32 %v6430_v38, %v5666_v39 }
 0x4ef   : > { %3592 = vmatpush.bf16.msrb.mxu3 %v5901_v62  ;;  %3578 = vmatpush.bf16.msrb.mxu2 %v5837_v0 }
 0x4f0   : > { %3514 = vmatpush.bf16.msra.mxu1 %v5721_v34  ;;  %v6484_v34 = vld [vmem:[%s7681_s25 + $0x1c4] sm:$0xf] }
 0x4f1   : > { %3551 = vmatpush.bf16.msrb.mxu0 %v5701_v55  ;;  %v5885_v27 = vor.u32 %v6484_v34, %v5882_v26  ;;  %v5661_v55 = vor.u32 %v6428_v51, %v5658_v52  ;;  %v3167_v34 = vld [vmem:[%s852_s26] sm:$0x3]  ;;  %s8642_s26 = scalar_lea.vmem [#allocation14], %s7677_s0 }
 0x4f2   : > { %v3170_v30 = vperm.slane %v3167_v34, 1 }
 0x4f3   : > { %3593 = vmatpush.bf16.msrb.mxu3 %v5893_v13  ;;  %3579 = vmatpush.bf16.msrb.mxu2 %v5829_v28 }
 0x4f4   : > { %3563 = vmatpush.bf16.msrb.mxu1 %v5781_v29  ;;  %v6432_v29 = vld [vmem:[%s7681_s25 + $0x24] sm:$0xf] }
 0x4f5   : > { %3552 = vmatpush.bf16.msrb.mxu0 %v5693_v8  ;;  %v5677_v48 = vor.u32 %v6432_v29, %v5674_v14  ;;  %v5853_v8 = vor.u32 %v6476_v12, %v5850_v5 }
 0x4f7   : > { %3594 = vmatpush.bf16.msrb.mxu3 %v5885_v27  ;;  %3580 = vmatpush.bf16.msrb.mxu2 %v5821_v31  ;;  %v3169_v27 = vperm.slane %v3167_v34, 0  ;;  %v6506_v34 = vld [vmem:[%s7686_s3 + $0x74] sm:$0xf] }
 0x4f8   : > { %3564 = vmatpush.bf16.msrb.mxu1 %v5773_v32  ;;  %v5730_v32 = vld [vmem:[%s7681_s25 + $0x98] sm:$0xf0] }
 0x4f9   : > { %3553 = vmatpush.bf16.msrb.mxu0 %v5685_v20  ;;  %v5733_v35 = vor.u32 %v6446_v63, %v5730_v32 }
 0x4fb   : > { %3595 = vmatpush.bf16.msrb.mxu3 %v5877_v37  ;;  %3581 = vmatpush.bf16.msrb.mxu2 %v5813_v47 }
 0x4fc   : > { %3565 = vmatpush.bf16.msrb.mxu1 %v5765_v43  ;;  %v5725_v43 = vor.u32 %v6444_v44, %v5722_v45 }
 0x4fd   : > { %3554 = vmatpush.bf16.msrb.mxu0 %v5677_v48 }
 0x4ff   : > { %3596 = vmatpush.bf16.msrb.mxu3 %v5869_v23  ;;  %3582 = vmatpush.bf16.msrb.mxu2 %v5805_v56 }
 0x500   : > { %3566 = vmatpush.bf16.msrb.mxu1 %v5757_v61  ;;  %v6462_v61 = vld [vmem:[%s7681_s25 + $0x114] sm:$0xf]  ;;  %s8641_s25 = scalar_lea.vmem [#allocation12], %s7677_s0 }
 0x501   : > { %3555 = vmatpush.bf16.msrb.mxu0 %v5669_v41  ;;  %v5797_v62 = vor.u32 %v6462_v61, %v5794_v7 }
 0x503   : > { %3597 = vmatpush.bf16.msrb.mxu3 %v5861_v60  ;;  %3583 = vmatpush.bf16.msrb.mxu2 %v5797_v62  ;;  %v6736_v60 = vld [vmem:[#allocation2 + $0x8] sm:$0xff] }
 0x504   : > { %3567 = vmatpush.bf16.msrb.mxu1 %v5749_v11 }
 0x505   : > { %3556 = vmatpush.bf16.msrb.mxu0 %v5661_v55 }
 0x507   : > { %3598 = vmatpush.bf16.msrb.mxu3 %v5853_v8  ;;  %3584 = vmatpush.bf16.msrb.mxu2 %v5789_v19 }
 0x508   : > { %3568 = vmatpush.bf16.msrb.mxu1 %v5741_v25 }
 0x50c   : > { %3569 = vmatpush.bf16.msrb.mxu1 %v5733_v35 }
 0x510   : > { %3570 = vmatpush.bf16.msrb.mxu1 %v5725_v43  ;;  %v6733_v43 = vld [vmem:[#allocation2 + $0x10] sm:$0xff] }
 0x525   : > { %v2771_v18 = vpop.f32.mrf.mxu3 }
 0x527   : > { %v2717_v57 = vpop.f32.mrf.mxu1 }
 0x545   : > { %v2879_v0 = vpop.f32.mrf.mxu3 }
 0x548   : > { %v2825_v10 = vpop.f32.mrf.mxu1 }
 0x54d   : > { %v2988_v3 = vpop.f32.mrf.mxu3 }
 0x54e   : > { %v3100_v11 = vpack.c.bf16 %v2988_v3, %v2771_v18 }
 0x550   : > { %v2934_v4 = vpop.f32.mrf.mxu1  ;;  %3515 = vmatmul.bf16.vlgmr.msra.gmra.mxu1 %v3100_v11 }
 0x551   : > { %v3099_v13 = vpack.c.bf16 %v2934_v4, %v2717_v57 }
 0x553   : > { %3501 = vmatmul.bf16.vlgmr.msra.gmra.mxu0 %v3099_v13 }
 0x557   : > { %v3096_v15 = vpop.f32.mrf.mxu3 }
 0x558   : > { %v3102_v16 = vpack.c.bf16 %v3096_v15, %v2879_v0  ;;  %v3042_v17 = vpop.f32.mrf.mxu1 }
 0x559   : > { %v3101_v20 = vpack.c.bf16 %v3042_v17, %v2825_v10 }
 0x55a   : > { %3543 = vmatmul.bf16.vlgmr.msra.gmra.mxu3 %v3102_v16 }
 0x55b   : > { %3529 = vmatmul.bf16.vlgmr.msra.gmra.mxu2 %v3101_v20 }
 0x560   : > { %3571 = vmatmul.bf16.vlgmr.msrb.gmra.mxu1 %v3100_v11 }
 0x563   : > { %3557 = vmatmul.bf16.vlgmr.msrb.gmra.mxu0 %v3099_v13 }
 0x56a   : > { %3599 = vmatmul.bf16.vlgmr.msrb.gmra.mxu3 %v3102_v16 }
 0x56b   : > { %3585 = vmatmul.bf16.vlgmr.msrb.gmra.mxu2 %v3101_v20  ;;  %v5968_v20 = vld [vmem:[%s7686_s3 + $0x70] sm:$0xf] }
 0x5cd   : > { %v3516_v28 = vpop.f32.mrf.mxu1 }
 0x5d0   : > { %v3502_v22 = vpop.f32.mrf.mxu0 }
 0x5d1   : > { %v3503_v14 = vadd.f32 %v3502_v22, %v3169_v27  ;;  %v6507_v22 = vld [vmem:[%s7686_s3 + $0x74] sm:$0xf0] }
 0x5d3   : > { %v3517_v31 = vadd.f32 %v3516_v28, %v3503_v14  ;;  %v6032_v28 = vld [vmem:[%s7686_s3 + $0xf0] sm:$0xf]  ;;  %v6034_v14 = vld [vmem:[%s7686_s3 + $0xf8] sm:$0xf0] }
 0x5d5   : > { %v3518_v26 = vpop.f32.mrf.mxu1 }
 0x5d8   : > { %v3504_v46 = vpop.f32.mrf.mxu0 }
 0x5d9   : > { %v3505_v35 = vadd.f32 %v3504_v46, %v3169_v27  ;;  %v5969_v46 = vor.u32 %v6507_v22, %v5968_v20  ;;  %v6002_v20 = vld [vmem:[%s7686_s3 + $0xb8] sm:$0xf0] }
 0x5db   : > { %v3519_v42 = vadd.f32 %v3518_v26, %v3505_v35  ;;  %3887 = vmatpush.bf16.msra.mxu0 %v5969_v46  ;;  %v5962_v35 = vld [vmem:[%s7686_s3 + $0x68] sm:$0xf0]  ;;  %v6497_v46 = vld [vmem:[%s7686_s3 + $0x24] sm:$0xf0] }
 0x5dd   : > { %v3544_v24 = vpop.f32.mrf.mxu3  ;;  %v3572_v32 = vpop.f32.mrf.mxu1 }
 0x5de   : > { %v3530_v25 = vpop.f32.mrf.mxu2 }
 0x5df   : > { %v3531_v33 = vadd.f32 %v3530_v25, %v3517_v31  ;;  %v5970_v25 = vld [vmem:[%s7686_s3 + $0x78] sm:$0xf0]  ;;  %v6024_v31 = vld [vmem:[%s7686_s3 + $0xe0] sm:$0xf] }
 0x5e0   : > { %v3558_v29 = vpop.f32.mrf.mxu0  ;;  %v5973_v27 = vor.u32 %v6506_v34, %v5970_v25  ;;  %v6513_v25 = vld [vmem:[%s7686_s3 + $0xa4] sm:$0xf0] }
 0x5e1   : > { %v3559_v63 = vadd.f32 %v3558_v29, %v3170_v30  ;;  %v3545_v40 = vadd.f32 %v3544_v24, %v3531_v33  ;;  %v6523_v24 = vld [vmem:[%s7686_s3 + $0xf4] sm:$0xf0]  ;;  %v6522_v29 = vld [vmem:[%s7686_s3 + $0xf4] sm:$0xf]  ;;  %v6504_v33 = vld [vmem:[%s7686_s3 + $0x64] sm:$0xf] }
 0x5e2   : > { %v6033_v26 = vor.u32 %v6523_v24, %v6032_v28  ;;  %3915 = vmatpush.bf16.msra.mxu2 %v5973_v27  ;;  %v5928_v28 = vld [vmem:[%s7686_s3 + $0x20] sm:$0xf]  ;;  %v5930_v27 = vld [vmem:[%s7686_s3 + $0x28] sm:$0xf0] }
 0x5e3   : > { %v3573_v37 = vadd.f32 %v3572_v32, %v3559_v63  ;;  %v3605_v49 = vadd.f32 %v6733_v43, %v3545_v40  ;;  %v6521_v32 = vld [vmem:[%s7686_s3 + $0xe4] sm:$0xf0]  ;;  %v6502_v43 = vld [vmem:[%s7686_s3 + $0x54] sm:$0xf]  ;;  %v5992_v24 = vld [vmem:[%s7686_s3 + $0xa0] sm:$0xf]  ;;  %v5929_v34 = vor.u32 %v6497_v46, %v5928_v28 }
 0x5e4   : > { %3901 = vmatpush.bf16.msra.mxu1 %v6033_v26  ;;  %v6496_v26 = vld [vmem:[%s7686_s3 + $0x24] sm:$0xf] }
 0x5e5   : > { %v3546_v48 = vpop.f32.mrf.mxu3  ;;  %v3574_v18 = vpop.f32.mrf.mxu1 }
 0x5e6   : > { %v3532_v6 = vpop.f32.mrf.mxu2 }
 0x5e7   : > { %v3533_v47 = vadd.f32 %v3532_v6, %v3519_v42  ;;  %v6505_v6 = vld [vmem:[%s7686_s3 + $0x64] sm:$0xf0]  ;;  %v6503_v42 = vld [vmem:[%s7686_s3 + $0x54] sm:$0xf0] }
 0x5e8   : > { %v3560_v36 = vpop.f32.mrf.mxu0 }
 0x5e9   : > { %v3561_v44 = vadd.f32 %v3560_v36, %v3170_v30  ;;  %v3547_v54 = vadd.f32 %v3546_v48, %v3533_v47  ;;  %v6037_v30 = vor.u32 %v6522_v29, %v6034_v14  ;;  %v5960_v48 = vld [vmem:[%s7686_s3 + $0x60] sm:$0xf]  ;;  %v6025_v36 = vor.u32 %v6521_v32, %v6024_v31  ;;  %v6519_v47 = vld [vmem:[%s7686_s3 + $0xd4] sm:$0xf0]  ;;  %v5920_v31 = vld [vmem:[%s7686_s3 + $0x10] sm:$0xf] }
 0x5ea   : > { %v5961_v63 = vor.u32 %v6505_v6, %v5960_v48  ;;  %v5993_v29 = vor.u32 %v6513_v25, %v5992_v24  ;;  %v5933_v14 = vor.u32 %v6496_v26, %v5930_v27  ;;  %v5994_v48 = vld [vmem:[%s7686_s3 + $0xa8] sm:$0xf0]  ;;  %v5984_v32 = vld [vmem:[%s7686_s3 + $0x90] sm:$0xf] }
 0x5eb   : > { %v3575_v23 = vadd.f32 %v3574_v18, %v3561_v44  ;;  %v3607_v58 = vadd.f32 %v6735_v21, %v3547_v54  ;;  %3929 = vmatpush.bf16.msra.mxu3 %v6037_v30  ;;  %3902 = vmatpush.bf16.msra.mxu1 %v6025_v36  ;;  %v6016_v44 = vld [vmem:[%s7686_s3 + $0xd0] sm:$0xf]  ;;  %v6518_v18 = vld [vmem:[%s7686_s3 + $0xd4] sm:$0xf]  ;;  %v6501_v54 = vld [vmem:[%s7686_s3 + $0x44] sm:$0xf0] }
 0x5ec   : > { %3888 = vmatpush.bf16.msra.mxu0 %v5961_v63  ;;  %v6500_v21 = vld [vmem:[%s7686_s3 + $0x44] sm:$0xf]  ;;  %v6495_v63 = vld [vmem:[%s7686_s3 + $0x14] sm:$0xf0]  ;;  %v6494_v36 = vld [vmem:[%s7686_s3 + $0x14] sm:$0xf] }
 0x5ed   : > { %v3600_v38 = vpop.f32.mrf.mxu3  ;;  %v6512_v30 = vld [vmem:[%s7686_s3 + $0xa4] sm:$0xf] }
 0x5ee   : > { %v3586_v39 = vpop.f32.mrf.mxu2  ;;  %v5997_v6 = vor.u32 %v6512_v30, %v5994_v48 }
 0x5ef   : > { %v3587_v41 = vadd.f32 %v3586_v39, %v3573_v37  ;;  %v5965_v37 = vor.u32 %v6504_v33, %v5962_v35  ;;  %v6026_v39 = vld [vmem:[%s7686_s3 + $0xe8] sm:$0xf0]  ;;  %v5921_v33 = vor.u32 %v6495_v63, %v5920_v31  ;;  %v6511_v35 = vld [vmem:[%s7686_s3 + $0x94] sm:$0xf0] }
 0x5f1   : > { %v3601_v45 = vadd.f32 %v3600_v38, %v3587_v41  ;;  %v6520_v38 = vld [vmem:[%s7686_s3 + $0xe4] sm:$0xf]  ;;  %3916 = vmatpush.bf16.msra.mxu2 %v5965_v37  ;;  %v5952_v41 = vld [vmem:[%s7686_s3 + $0x50] sm:$0xf]  ;;  %v5922_v37 = vld [vmem:[%s7686_s3 + $0x18] sm:$0xf0] }
 0x5f2   : > { %v6029_v40 = vor.u32 %v6520_v38, %v6026_v39  ;;  %v5985_v39 = vor.u32 %v6511_v35, %v5984_v32  ;;  %v6096_v32 = vld [vmem:[%s7689_s22 + $0x70] sm:$0xf]  ;;  %v6538_v35 = vld [vmem:[%s7689_s22 + $0x74] sm:$0xf] }
 0x5f3   : > { %v3606_v51 = vadd.f32 %v6734_v50, %v3601_v45  ;;  %v5953_v45 = vor.u32 %v6503_v42, %v5952_v41  ;;  %v6017_v50 = vor.u32 %v6519_v47, %v6016_v44  ;;  %v6510_v41 = vld [vmem:[%s7686_s3 + $0x94] sm:$0xf]  ;;  %v5986_v42 = vld [vmem:[%s7686_s3 + $0x98] sm:$0xf0]  ;;  %v5912_v44 = vld [vmem:[%s7686_s3] sm:$0xf] }
 0x5f4   : > { %3930 = vmatpush.bf16.msra.mxu3 %v6029_v40  ;;  %v5925_v40 = vor.u32 %v6494_v36, %v5922_v37  ;;  %v5989_v47 = vor.u32 %v6510_v41, %v5986_v42  ;;  %v6098_v37 = vld [vmem:[%s7689_s22 + $0x78] sm:$0xf0]  ;;  %v6536_v41 = vld [vmem:[%s7689_s22 + $0x64] sm:$0xf] }
 0x5f5   : > { %v3611_v52 = vadd.f32 %v3606_v51, %v3605_v49  ;;  %v3602_v56 = vpop.f32.mrf.mxu3  ;;  %3889 = vmatpush.bf16.msra.mxu0 %v5953_v45  ;;  %3903 = vmatpush.bf16.msra.mxu1 %v6017_v50 }
 0x5f6   : > { %v3588_v53 = vpop.f32.mrf.mxu2 }
 0x5f7   : > { %v3589_v55 = vadd.f32 %v3588_v53, %v3575_v23  ;;  %3612 = vadd.xlane.f32.xlu1 %v3611_v52  ;;  %v6018_v23 = vld [vmem:[%s7686_s3 + $0xd8] sm:$0xf0]  ;;  %v5944_v53 = vld [vmem:[%s7686_s3 + $0x40] sm:$0xf] }
 0x5f8   : > { %v6021_v52 = vor.u32 %v6518_v18, %v6018_v23  ;;  %v6492_v18 = vld [vmem:[%s7686_s3 + $0x4] sm:$0xf]  ;;  %v5914_v23 = vld [vmem:[%s7686_s3 + $0x8] sm:$0xf0] }
 0x5f9   : > { %v3603_v57 = vadd.f32 %v3602_v56, %v3589_v55  ;;  %v6008_v55 = vld [vmem:[%s7686_s3 + $0xc0] sm:$0xf]  ;;  %v5945_v56 = vor.u32 %v6501_v54, %v5944_v53  ;;  %v5917_v54 = vor.u32 %v6492_v18, %v5914_v23  ;;  %v6080_v23 = vld [vmem:[%s7689_s22 + $0x50] sm:$0xf] }
 0x5fa   : > { %3931 = vmatpush.bf16.msra.mxu3 %v6021_v52 }
 0x5fb   : > { %v3608_v61 = vadd.f32 %v6736_v60, %v3603_v57  ;;  %v6517_v57 = vld [vmem:[%s7686_s3 + $0xc4] sm:$0xf0]  ;;  %3890 = vmatpush.bf16.msra.mxu0 %v5945_v56  ;;  %v5978_v56 = vld [vmem:[%s7686_s3 + $0x88] sm:$0xf0] }
 0x5fc   : > { %v6009_v60 = vor.u32 %v6517_v57, %v6008_v55  ;;  %v6508_v55 = vld [vmem:[%s7686_s3 + $0x84] sm:$0xf] }
 0x5fd   : > { %v3614_v7 = vadd.f32 %v3608_v61, %v3607_v58  ;;  %v5981_v57 = vor.u32 %v6508_v55, %v5978_v56  ;;  %v6082_v55 = vld [vmem:[%s7689_s22 + $0x58] sm:$0xf0] }
 0x5fe   : > { %3904 = vmatpush.bf16.msra.mxu1 %v6009_v60 }
 0x5ff   : > { %3615 = vadd.xlane.f32.xlu2 %v3614_v7  ;;  %v6516_v7 = vld [vmem:[%s7686_s3 + $0xc4] sm:$0xf] }
 0x66a   : > { %v3613_v62 = vpop.xlane.xlu1 %3612 }
 0x66b   : > { %v3617_v12 = vmul.f32 0.0051020407, %v3613_v62  ;;  %v6010_v62 = vld [vmem:[%s7686_s3 + $0xc8] sm:$0xf0] }
 0x66d   : > { %v8357_v5 = vsub.f32 %v3605_v49, %v3617_v12  ;;  %v3620_v59 = vsub.f32 %v3606_v51, %v3617_v12  ;;  %v5954_v49 = vld [vmem:[%s7686_s3 + $0x58] sm:$0xf0]  ;;  %v6013_v12 = vor.u32 %v6516_v7, %v6010_v62 }
 0x66e   : > { %v5957_v51 = vor.u32 %v6502_v43, %v5954_v49  ;;  %v6493_v43 = vld [vmem:[%s7686_s3 + $0x4] sm:$0xf0]  ;;  %v5976_v49 = vld [vmem:[%s7686_s3 + $0x80] sm:$0xf] }
 0x66f   : > { %v8361_v8 = vsel %vm1050_vm0, %v3620_v59, 0.0  ;;  %v3631_v9 = vmul.f32 %v8357_v5, %v8357_v5  ;;  %v5936_v59 = vld [vmem:[%s7686_s3 + $0x30] sm:$0xf]  ;;  %3932 = vmatpush.bf16.msra.mxu3 %v6013_v12  ;;  %v5913_v50 = vor.u32 %v6493_v43, %v5912_v44  ;;  %v6555_v43 = vld [vmem:[%s7689_s22 + $0xf4] sm:$0xf0] }
 0x670   : > { %v3632_v0 = vmul.f32 %v8361_v8, %v8361_v8  ;;  %3917 = vmatpush.bf16.msra.mxu2 %v5957_v51  ;;  %v6509_v51 = vld [vmem:[%s7686_s3 + $0x84] sm:$0xf0]  ;;  %v6090_v44 = vld [vmem:[%s7689_s22 + $0x68] sm:$0xf0] }
 0x671   : > { %v5977_v53 = vor.u32 %v6509_v51, %v5976_v49  ;;  %v6554_v49 = vld [vmem:[%s7689_s22 + $0xf4] sm:$0xf]  ;;  %v6162_v51 = vld [vmem:[%s7689_s22 + $0xf8] sm:$0xf0] }
 0x672   : > { %v3616_v19 = vpop.xlane.xlu2 %3615  ;;  %v3635_v10 = vadd.f32 %v3632_v0, %v3631_v9  ;;  %v6499_v9 = vld [vmem:[%s7686_s3 + $0x34] sm:$0xf0]  ;;  %v6000_v0 = vld [vmem:[%s7686_s3 + $0xb0] sm:$0xf]  ;;  %v6165_v18 = vor.u32 %v6554_v49, %v6162_v51  ;;  %v6050_v49 = vld [vmem:[%s7689_s22 + $0x18] sm:$0xf0] }
 0x673   : > { %v3618_v3 = vmul.f32 0.0051020407, %v3616_v19  ;;  %v5937_v19 = vor.u32 %v6499_v9, %v5936_v59  ;;  %v6545_v51 = vld [vmem:[%s7689_s22 + $0xa4] sm:$0xf0] }
 0x674   : > { %3636 = vadd.xlane.f32.xlu0 %v3635_v10  ;;  %v6515_v10 = vld [vmem:[%s7686_s3 + $0xb4] sm:$0xf0] }
 0x675   : > { %v8367_v11 = vsub.f32 %v3607_v58, %v3618_v3  ;;  %v3622_v4 = vsub.f32 %v3608_v61, %v3618_v3  ;;  %v5946_v58 = vld [vmem:[%s7686_s3 + $0x48] sm:$0xf0]  ;;  %v6498_v3 = vld [vmem:[%s7686_s3 + $0x34] sm:$0xf]  ;;  %3891 = vmatpush.bf16.msra.mxu0 %v5937_v19 }
 0x676   : > { %v5949_v61 = vor.u32 %v6500_v21, %v5946_v58 }
 0x677   : > { %v8371_v13 = vsel %vm1050_vm0, %v3622_v4, 0.0  ;;  %v3633_v15 = vmul.f32 %v8367_v11, %v8367_v11  ;;  %v5938_v4 = vld [vmem:[%s7686_s3 + $0x38] sm:$0xf0] }
 0x678   : > { %v3634_v16 = vmul.f32 %v8371_v13, %v8371_v13  ;;  %3918 = vmatpush.bf16.msra.mxu2 %v5949_v61 }
 0x679   : > { %3892 = vmatpush.bf16.msra.mxu0 %v5929_v34 }
 0x67a   : > { %v3638_v17 = vadd.f32 %v3634_v16, %v3633_v15  ;;  %v6001_v15 = vor.u32 %v6515_v10, %v6000_v0  ;;  %v5941_v16 = vor.u32 %v6498_v3, %v5938_v4 }
 0x67c   : > { %3639 = vadd.xlane.f32.xlu1 %v3638_v17  ;;  %v6514_v17 = vld [vmem:[%s7686_s3 + $0xb4] sm:$0xf]  ;;  %3905 = vmatpush.bf16.msra.mxu1 %v6001_v15  ;;  %v3609_v15 = vld [vmem:[%s862_s28] sm:$0x3]  ;;  %s8643_s28 = scalar_lea.vmem [#allocation16], %s7677_s0  ;;  %s8645_s3 = scalar_lea.vmem [#allocation18], %s7677_s0 }
 0x67d   : > { %v6005_v22 = vor.u32 %v6514_v17, %v6002_v20  ;;  %3919 = vmatpush.bf16.msra.mxu2 %v5941_v16  ;;  %3893 = vmatpush.bf16.msra.mxu0 %v5921_v33  ;;  %v3670_v28 = vperm.slane %v3609_v15, 0  ;;  %v3671_v46 = vperm.slane %v3609_v15, 1  ;;  %v6539_v33 = vld [vmem:[%s7689_s22 + $0x74] sm:$0xf0]  ;;  %s8646_s0 = sld [smem:[#allocation28_spill]] }
 0x67e   : > { %v6097_v36 = vor.u32 %v6539_v33, %v6096_v32  ;;  %v6058_v33 = vld [vmem:[%s7689_s22 + $0x28] sm:$0xf0] }
 0x67f   : > { %3933 = vmatpush.bf16.msra.mxu3 %v6005_v22  ;;  %v3610_v22 = vld [vmem:[%s8641_s25] sm:$0x3] }
 0x680   : > { %3906 = vmatpush.bf16.msra.mxu1 %v5993_v29  ;;  %v3679_v25 = vperm.slane %v3610_v22, 0  ;;  %v3680_v26 = vperm.slane %v3610_v22, 1  ;;  %v6531_v22 = vld [vmem:[%s7689_s22 + $0x34] sm:$0xf0] }
 0x681   : > { %3920 = vmatpush.bf16.msra.mxu2 %v5933_v14  ;;  %3894 = vmatpush.bf16.msra.mxu0 %v5913_v50 }
 0x683   : > { %3934 = vmatpush.bf16.msra.mxu3 %v5997_v6  ;;  %p6166_p4 = scmp.ne.s32.totalorder %s8646_s0, 1 }
 0x684   : > { %3907 = vmatpush.bf16.msra.mxu1 %v5985_v39  ;;  %v6088_v39 = vld [vmem:[%s7689_s22 + $0x60] sm:$0xf]  ;;  %s8647_s15 = sld [smem:[#allocation42_spill]] (!%p6166_p4) }
 0x685   : > { %3921 = vmatpush.bf16.msra.mxu2 %v5925_v40  ;;  %4179 = vmatpush.bf16.msrb.mxu0 %v6097_v36  ;;  %v6537_v40 = vld [vmem:[%s7689_s22 + $0x64] sm:$0xf0]  ;;  %v6128_v36 = vld [vmem:[%s7689_s22 + $0xb0] sm:$0xf] }
 0x686   : > { %v6089_v42 = vor.u32 %v6537_v40, %v6088_v39 }
 0x687   : > { %3935 = vmatpush.bf16.msra.mxu3 %v5989_v47  ;;  %v6160_v47 = vld [vmem:[%s7689_s22 + $0xf0] sm:$0xf] }
 0x688   : > { %3908 = vmatpush.bf16.msra.mxu1 %v5977_v53  ;;  %v6161_v50 = vor.u32 %v6555_v43, %v6160_v47  ;;  %v6534_v53 = vld [vmem:[%s7689_s22 + $0x54] sm:$0xf] }
 0x689   : > { %3922 = vmatpush.bf16.msra.mxu2 %v5917_v54  ;;  %4180 = vmatpush.bf16.msrb.mxu0 %v6089_v42  ;;  %v6085_v56 = vor.u32 %v6534_v53, %v6082_v55  ;;  %v6526_v47 = vld [vmem:[%s7689_s22 + $0x14] sm:$0xf]  ;;  %v6122_v53 = vld [vmem:[%s7689_s22 + $0xa8] sm:$0xf0] }
 0x68b   : > { %3936 = vmatpush.bf16.msra.mxu3 %v5981_v57  ;;  %v6152_v57 = vld [vmem:[%s7689_s22 + $0xe0] sm:$0xf] }
 0x68c   : > { %4193 = vmatpush.bf16.msrb.mxu1 %v6161_v50  ;;  %v6120_v50 = vld [vmem:[%s7689_s22 + $0xa0] sm:$0xf] }
 0x68f   : > { %4221 = vmatpush.bf16.msrb.mxu3 %v6165_v18  ;;  %v6053_v18 = vor.u32 %v6526_v47, %v6050_v49 }
 0x6e7   : > { %v3637_v38 = vpop.xlane.xlu0 %3636 }
 0x6e8   : > { %v3641_v45 = vmul.f32 0.0051020407, %v3637_v38  ;;  %v6101_v38 = vor.u32 %v6538_v35, %v6098_v37  ;;  %v6547_v37 = vld [vmem:[%s7689_s22 + $0xb4] sm:$0xf0] }
 0x6e9   : > { %v6129_v40 = vor.u32 %v6547_v37, %v6128_v36 }
 0x6ea   : > { %v3643_v52 = vadd.f32 1e-12, %v3641_v45  ;;  %4207 = vmatpush.bf16.msrb.mxu2 %v6101_v38  ;;  %v6093_v45 = vor.u32 %v6536_v41, %v6090_v44  ;;  %v6546_v38 = vld [vmem:[%s7689_s22 + $0xb4] sm:$0xf]  ;;  %v6130_v41 = vld [vmem:[%s7689_s22 + $0xb8] sm:$0xf0] }
 0x6eb   : > { %v6133_v42 = vor.u32 %v6546_v38, %v6130_v41  ;;  %v6048_v44 = vld [vmem:[%s7689_s22 + $0x10] sm:$0xf] }
 0x6ec   : > { %6717 = vrsqrt.f32 %v3643_v52  ;;  %vm3651_vm9 = vweird.f32 %v3643_v52 }
 0x6ee   : > { %4208 = vmatpush.bf16.msrb.mxu2 %v6093_v45  ;;  %v6527_v45 = vld [vmem:[%s7689_s22 + $0x14] sm:$0xf0] }
 0x6ef   : > { %v3640_v21 = vpop.xlane.xlu1 %3639  ;;  %v6049_v43 = vor.u32 %v6527_v45, %v6048_v44 }
 0x6f0   : > { %v3642_v58 = vmul.f32 0.0051020407, %v3640_v21  ;;  %v6553_v21 = vld [vmem:[%s7689_s22 + $0xe4] sm:$0xf0] }
 0x6f2   : > { %v6718_v60 = vpop.eup %6717  ;;  %v3644_v61 = vadd.f32 1e-12, %v3642_v58  ;;  %v6552_v58 = vld [vmem:[%s7689_s22 + $0xe4] sm:$0xf]  ;;  %4209 = vmatpush.bf16.msrb.mxu2 %v6085_v56  ;;  %v6525_v56 = vld [vmem:[%s7689_s22 + $0x4] sm:$0xf0] }
 0x6f3   : > { %v3646_v7 = vmul.f32 %v6718_v60, %v3643_v52  ;;  %vm3652_vm8 = vweird.f32 %v6718_v60  ;;  %v6535_v52 = vld [vmem:[%s7689_s22 + $0x54] sm:$0xf0] }
 0x6f4   : > { %6719 = vrsqrt.f32 %v3644_v61  ;;  %vm3653_vm10 = vmor %vm3651_vm9, %vm3652_vm8  ;;  %vm3661_vm12 = vweird.f32 %v3644_v61  ;;  %v6081_v54 = vor.u32 %v6535_v52, %v6080_v23  ;;  %v6121_v23 = vor.u32 %v6545_v51, %v6120_v50  ;;  %v6544_v52 = vld [vmem:[%s7689_s22 + $0xa4] sm:$0xf] }
 0x6f5   : > { %v3647_v62 = vmul.f32 %v6718_v60, %v3646_v7  ;;  %v6125_v55 = vor.u32 %v6544_v52, %v6122_v53 }
 0x6f6   : > { %4181 = vmatpush.bf16.msrb.mxu0 %v6081_v54  ;;  %v6040_v54 = vld [vmem:[%s7689_s22] sm:$0xf] }
 0x6f7   : > { %v3648_v12 = vmul.f32 0.5, %v3647_v62  ;;  %v6072_v62 = vld [vmem:[%s7689_s22 + $0x40] sm:$0xf] }
 0x6f9   : > { %v3649_v59 = vsub.f32 1.5, %v3648_v12  ;;  %v6533_v12 = vld [vmem:[%s7689_s22 + $0x44] sm:$0xf0] }
 0x6fa   : > { %v6720_v9 = vpop.eup %6719 }
 0x6fb   : > { %v3650_v0 = vmul.f32 %v6718_v60, %v3649_v59  ;;  %v3656_v19 = vmul.f32 %v6720_v9, %v3644_v61  ;;  %vm3662_vm11 = vweird.f32 %v6720_v9  ;;  %v6154_v61 = vld [vmem:[%s7689_s22 + $0xe8] sm:$0xf0]  ;;  %v6532_v59 = vld [vmem:[%s7689_s22 + $0x44] sm:$0xf] }
 0x6fc   : > { %vm3663_vm13 = vmor %vm3661_vm12, %vm3662_vm11  ;;  %v6157_v7 = vor.u32 %v6552_v58, %v6154_v61  ;;  %v6041_v58 = vor.u32 %v6525_v56, %v6040_v54  ;;  %v6112_v61 = vld [vmem:[%s7689_s22 + $0x90] sm:$0xf] }
 0x6fd   : > { %v3657_v10 = vmul.f32 %v6720_v9, %v3656_v19  ;;  %v3654_v3 = vsel %vm3653_vm10, %v6718_v60, %v3650_v0  ;;  %v6153_v60 = vor.u32 %v6553_v21, %v6152_v57  ;;  %v6074_v0 = vld [vmem:[%s7689_s22 + $0x48] sm:$0xf0]  ;;  %v6524_v57 = vld [vmem:[%s7689_s22 + $0x4] sm:$0xf] }
 0x6fe   : > { %v3665_v17 = vmul.f32 %v3654_v3, %v8357_v5  ;;  %v3666_v20 = vmul.f32 %v3654_v3, %v8361_v8  ;;  %4222 = vmatpush.bf16.msrb.mxu3 %v6157_v7  ;;  %v6077_v19 = vor.u32 %v6532_v59, %v6074_v0  ;;  %v6551_v3 = vld [vmem:[%s7689_s22 + $0xd4] sm:$0xf0]  ;;  %v6042_v21 = vld [vmem:[%s7689_s22 + $0x8] sm:$0xf0]  ;;  %v6114_v0 = vld [vmem:[%s7689_s22 + $0x98] sm:$0xf0] }
 0x6ff   : > { %v3658_v4 = vmul.f32 0.5, %v3657_v10  ;;  %4194 = vmatpush.bf16.msrb.mxu1 %v6153_v60  ;;  %v6144_v10 = vld [vmem:[%s7689_s22 + $0xd0] sm:$0xf]  ;;  %v6045_v60 = vor.u32 %v6524_v57, %v6042_v21  ;;  %v6543_v7 = vld [vmem:[%s7689_s22 + $0x94] sm:$0xf0] }
 0x700   : > { %v3674_v14 = vmul.f32 %v3670_v28, %v3665_v17  ;;  %v3675_v5 = vmul.f32 %v3671_v46, %v3666_v20  ;;  %v6145_v15 = vor.u32 %v6551_v3, %v6144_v10  ;;  %4210 = vmatpush.bf16.msrb.mxu2 %v6077_v19  ;;  %v6064_v20 = vld [vmem:[%s7689_s22 + $0x30] sm:$0xf] }
 0x701   : > { %v3659_v16 = vsub.f32 1.5, %v3658_v4  ;;  %v6550_v4 = vld [vmem:[%s7689_s22 + $0xd4] sm:$0xf] }
 0x702   : > { %v8449_v48 = vadd.f32 %v3679_v25, %v3674_v14  ;;  %v8453_v31 = vadd.f32 %v3680_v26, %v3675_v5  ;;  %v6138_v5 = vld [vmem:[%s7689_s22 + $0xc8] sm:$0xf0] }
 0x703   : > { %v3660_v24 = vmul.f32 %v6720_v9, %v3659_v16  ;;  %v6146_v16 = vld [vmem:[%s7689_s22 + $0xd8] sm:$0xf0]  ;;  %4195 = vmatpush.bf16.msrb.mxu1 %v6145_v15  ;;  %v6104_v15 = vld [vmem:[%s7689_s22 + $0x80] sm:$0xf] }
 0x704   : > { %v6149_v17 = vor.u32 %v6550_v4, %v6146_v16  ;;  %v6541_v16 = vld [vmem:[%s7689_s22 + $0x84] sm:$0xf0] }
 0x705   : > { %v3664_v34 = vsel %vm3663_vm13, %v6720_v9, %v3660_v24  ;;  %v6073_v9 = vor.u32 %v6533_v12, %v6072_v62  ;;  %v6066_v24 = vld [vmem:[%s7689_s22 + $0x38] sm:$0xf0]  ;;  %v6542_v62 = vld [vmem:[%s7689_s22 + $0x94] sm:$0xf] }
 0x706   : > { %v3667_v27 = vmul.f32 %v3664_v34, %v8367_v11  ;;  %v3668_v29 = vmul.f32 %v3664_v34, %v8371_v13  ;;  %4223 = vmatpush.bf16.msrb.mxu3 %v6149_v17  ;;  %v6117_v10 = vor.u32 %v6542_v62, %v6114_v0  ;;  %v6540_v17 = vld [vmem:[%s7689_s22 + $0x84] sm:$0xf] }
 0x707   : > { %4182 = vmatpush.bf16.msrb.mxu0 %v6073_v9  ;;  %v6113_v9 = vor.u32 %v6543_v7, %v6112_v61 }
 0x708   : > { %v3676_v8 = vmul.f32 %v3670_v28, %v3667_v27  ;;  %v3677_v30 = vmul.f32 %v3671_v46, %v3668_v29  ;;  %v6530_v28 = vld [vmem:[%s7689_s22 + $0x34] sm:$0xf]  ;;  %v6065_v46 = vor.u32 %v6531_v22, %v6064_v20  ;;  %v6548_v27 = vld [vmem:[%s7689_s22 + $0xc4] sm:$0xf]  ;;  %v8498_v29 = vld [vmem:[%s8642_s26] sm:$0x3]  ;;  %v6105_v22 = vor.u32 %v6541_v16, %v6104_v15 }
 0x709   : > { %v6069_v34 = vor.u32 %v6530_v28, %v6066_v24  ;;  %v3723_v39 = vperm.slane %v8498_v29, 0  ;;  %v3724_v4 = vperm.slane %v8498_v29, 1  ;;  %v6106_v28 = vld [vmem:[%s7689_s22 + $0x88] sm:$0xf0] }
 0x70a   : > { %v8451_v6 = vadd.f32 %v3679_v25, %v3676_v8  ;;  %v8455_v63 = vadd.f32 %v3680_v26, %v3677_v30  ;;  %v6136_v25 = vld [vmem:[%s7689_s22 + $0xc0] sm:$0xf]  ;;  %v6549_v26 = vld [vmem:[%s7689_s22 + $0xc4] sm:$0xf0]  ;;  %v6141_v8 = vor.u32 %v6548_v27, %v6138_v5 }
 0x70b   : > { %4183 = vmatpush.bf16.msrb.mxu0 %v6065_v46  ;;  %v6137_v14 = vor.u32 %v6549_v26, %v6136_v25  ;;  %4211 = vmatpush.bf16.msrb.mxu2 %v6069_v34  ;;  %v6056_v30 = vld [vmem:[%s7689_s22 + $0x20] sm:$0xf]  ;;  %v6109_v46 = vor.u32 %v6540_v17, %v6106_v28 }
 0x70c   : > { %v3687_v11 = vpack.c.bf16 %v8451_v6, %v8449_v48  ;;  %v3688_v13 = vpack.c.bf16 %v8455_v63, %v8453_v31  ;;  %4224 = vmatpush.bf16.msrb.mxu3 %v6141_v8 }
 0x70d   : > { %4196 = vmatpush.bf16.msrb.mxu1 %v6137_v14 }
 0x70e   : > { %3895 = vmatmul.bf16.vlgmr.msra.gmra.mxu0 %v3687_v11  ;;  %3909 = vmatmul.bf16.vlgmr.msra.gmra.mxu1 %v3688_v13 }
 0x70f   : > { %3923 = vmatmul.bf16.vlgmr.msra.gmra.mxu2 %v3687_v11  ;;  %3937 = vmatmul.bf16.vlgmr.msra.gmra.mxu3 %v3688_v13  ;;  %v6529_v11 = vld [vmem:[%s7689_s22 + $0x24] sm:$0xf0]  ;;  %v6528_v13 = vld [vmem:[%s7689_s22 + $0x24] sm:$0xf] }
 0x710   : > { %v6057_v32 = vor.u32 %v6529_v11, %v6056_v30  ;;  %v6061_v35 = vor.u32 %v6528_v13, %v6058_v33  ;;  %4225 = vmatpush.bf16.msrb.mxu3 %v6133_v42 }
 0x711   : > { %4197 = vmatpush.bf16.msrb.mxu1 %v6129_v40 }
 0x712   : > { %4184 = vmatpush.bf16.msrb.mxu0 %v6057_v32  ;;  %4212 = vmatpush.bf16.msrb.mxu2 %v6061_v35 }
 0x714   : > { %4226 = vmatpush.bf16.msrb.mxu3 %v6125_v55 }
 0x715   : > { %4198 = vmatpush.bf16.msrb.mxu1 %v6121_v23 }
 0x716   : > { %4185 = vmatpush.bf16.msrb.mxu0 %v6049_v43  ;;  %4213 = vmatpush.bf16.msrb.mxu2 %v6053_v18 }
 0x718   : > { %4227 = vmatpush.bf16.msrb.mxu3 %v6117_v10 }
 0x719   : > { %4199 = vmatpush.bf16.msrb.mxu1 %v6113_v9 }
 0x71a   : > { %4186 = vmatpush.bf16.msrb.mxu0 %v6041_v58  ;;  %4214 = vmatpush.bf16.msrb.mxu2 %v6045_v60 }
 0x71c   : > { %4228 = vmatpush.bf16.msrb.mxu3 %v6109_v46 }
 0x71d   : > { %4200 = vmatpush.bf16.msrb.mxu1 %v6105_v22 }
 0x78b   : > { %v3896_v12 = vpop.f32.mrf.mxu0  ;;  %v3910_v59 = vpop.f32.mrf.mxu1 }
 0x78c   : > { %v3897_v19 = vadd.f32 %v3896_v12, %v3723_v39 }
 0x78e   : > { %v3911_v3 = vadd.f32 %v3910_v59, %v3897_v19 }
 0x790   : > { %v3947_v20 = vmul.f32 0.044715, %v3911_v3  ;;  %v3943_v55 = vmul.f32 0.5, %v3911_v3 }
 0x792   : > { %v3951_v24 = vmul.f32 %v3947_v20, %v3911_v3  ;;  %v3924_v34 = vpop.f32.mrf.mxu2  ;;  %v3938_v25 = vpop.f32.mrf.mxu3 }
 0x793   : > { %v3925_v26 = vadd.f32 %v3924_v34, %v3724_v4  ;;  %v3898_v27 = vpop.f32.mrf.mxu0  ;;  %v3912_v8 = vpop.f32.mrf.mxu1 }
 0x794   : > { %v3955_v14 = vmul.f32 %v3951_v24, %v3911_v3  ;;  %v3899_v5 = vadd.f32 %v3898_v27, %v3723_v39 }
 0x795   : > { %v3939_v29 = vadd.f32 %v3938_v25, %v3925_v26 }
 0x796   : > { %v3959_v30 = vadd.f32 %v3955_v14, %v3911_v3  ;;  %v3913_v11 = vadd.f32 %v3912_v8, %v3899_v5  ;;  %v4013_v3 = vld [vmem:[%s8643_s28] sm:$0x3] }
 0x797   : > { %v3948_v13 = vmul.f32 0.044715, %v3939_v29  ;;  %v3944_v12 = vmul.f32 0.5, %v3939_v29  ;;  %v4015_v15 = vperm.slane %v4013_v3, 0  ;;  %v4016_v20 = vperm.slane %v4013_v3, 1 }
 0x798   : > { %v3949_v32 = vmul.f32 0.044715, %v3913_v11  ;;  %v3963_v35 = vmul.f32 0.7978846, %v3959_v30  ;;  %v3945_v56 = vmul.f32 0.5, %v3913_v11 }
 0x799   : > { %v3952_v33 = vmul.f32 %v3948_v13, %v3939_v29 }
 0x79a   : > { %v3953_v36 = vmul.f32 %v3949_v32, %v3913_v11  ;;  %v3926_v37 = vpop.f32.mrf.mxu2  ;;  %v3940_v42 = vpop.f32.mrf.mxu3  ;;  %6721 = vtanh.f32 %v3963_v35 }
 0x79b   : > { %v3956_v38 = vmul.f32 %v3952_v33, %v3939_v29  ;;  %v3927_v40 = vadd.f32 %v3926_v37, %v3724_v4 }
 0x79c   : > { %v3957_v41 = vmul.f32 %v3953_v36, %v3913_v11 }
 0x79d   : > { %v3960_v44 = vadd.f32 %v3956_v38, %v3939_v29  ;;  %v3941_v45 = vadd.f32 %v3940_v42, %v3927_v40 }
 0x79e   : > { %v3961_v47 = vadd.f32 %v3957_v41, %v3913_v11 }
 0x79f   : > { %v3950_v39 = vmul.f32 0.044715, %v3941_v45  ;;  %v3964_v49 = vmul.f32 0.7978846, %v3960_v44  ;;  %v3946_v59 = vmul.f32 0.5, %v3941_v45 }
 0x7a0   : > { %v3965_v43 = vmul.f32 0.7978846, %v3961_v47  ;;  %v6722_v18 = vpop.eup %6721 }
 0x7a1   : > { %v3954_v50 = vmul.f32 %v3950_v39, %v3941_v45  ;;  %v3971_v53 = vadd.f32 1.0, %v6722_v18 }
 0x7a2   : > { %6723 = vtanh.f32 %v3965_v43 }
 0x7a3   : > { %v3958_v51 = vmul.f32 %v3954_v50, %v3941_v45  ;;  %6725 = vtanh.f32 %v3964_v49  ;;  %v3975_v58 = vmul.f32 %v3971_v53, %v3943_v55 }
 0x7a5   : > { %v3962_v23 = vadd.f32 %v3958_v51, %v3941_v45 }
 0x7a7   : > { %v3966_v52 = vmul.f32 0.7978846, %v3962_v23 }
 0x7a8   : > { %v6724_v54 = vpop.eup %6723 }
 0x7a9   : > { %v3973_v57 = vadd.f32 1.0, %v6724_v54  ;;  %6727 = vtanh.f32 %v3966_v52  ;;  %v6726_v21 = vpop.eup %6725 }
 0x7aa   : > { %v3972_v7 = vadd.f32 1.0, %v6726_v21 }
 0x7ab   : > { %v3977_v60 = vmul.f32 %v3973_v57, %v3945_v56 }
 0x7ac   : > { %v3976_v0 = vmul.f32 %v3972_v7, %v3944_v12  ;;  %v4296_v12 = vperm.slane %v4239_v2, 0 }
 0x7ad   : > { %v3979_v61 = vpack.c.bf16 %v3977_v60, %v3975_v58 }
 0x7af   : > { %v6728_v62 = vpop.eup %6727  ;;  %4187 = vmatmul.bf16.vlgmr.msrb.gmra.mxu0 %v3979_v61  ;;  %4215 = vmatmul.bf16.vlgmr.msrb.gmra.mxu2 %v3979_v61  ;;  %v4240_v61 = vld [vmem:[%s8645_s3] sm:$0x3] }
 0x7b0   : > { %v3974_v9 = vadd.f32 1.0, %v6728_v62 }
 0x7b2   : > { %v3978_v19 = vmul.f32 %v3974_v9, %v3946_v59  ;;  %v4297_v59 = vperm.slane %v4239_v2, 1 }
 0x7b4   : > { %v3980_v10 = vpack.c.bf16 %v3978_v19, %v3976_v0  ;;  %v4305_v19 = vperm.slane %v4240_v61, 0 }
 0x7b6   : > { %4201 = vmatmul.bf16.vlgmr.msrb.gmra.mxu1 %v3980_v10  ;;  %4229 = vmatmul.bf16.vlgmr.msrb.gmra.mxu3 %v3980_v10  ;;  %v4306_v10 = vperm.slane %v4240_v61, 1 }
 0x82c   : > { %v4188_v4 = vpop.f32.mrf.mxu0 }
 0x82d   : > { %v4189_v22 = vadd.f32 %v4188_v4, %v4015_v15 }
 0x832   : > { %v4216_v17 = vpop.f32.mrf.mxu2 }
 0x833   : > { %v4202_v16 = vpop.f32.mrf.mxu1  ;;  %v4217_v46 = vadd.f32 %v4216_v17, %v4016_v20 }
 0x834   : > { %v4203_v28 = vadd.f32 %v4202_v16, %v4189_v22  ;;  %v4190_v25 = vpop.f32.mrf.mxu0 }
 0x835   : > { %v4191_v29 = vadd.f32 %v4190_v25, %v4015_v15 }
 0x836   : > { %v4235_v26 = vadd.f32 %v4203_v28, %v8449_v48 }
 0x839   : > { %v4230_v24 = vpop.f32.mrf.mxu3 }
 0x83a   : > { %v4231_v34 = vadd.f32 %v4230_v24, %v4217_v46  ;;  %v4218_v5 = vpop.f32.mrf.mxu2 }
 0x83b   : > { %v4204_v14 = vpop.f32.mrf.mxu1  ;;  %v4219_v11 = vadd.f32 %v4218_v5, %v4016_v20 }
 0x83c   : > { %v4236_v27 = vadd.f32 %v4231_v34, %v8453_v31  ;;  %v4205_v30 = vadd.f32 %v4204_v14, %v4191_v29 }
 0x83e   : > { %v4241_v8 = vadd.f32 %v4236_v27, %v4235_v26  ;;  %v4237_v33 = vadd.f32 %v4205_v30, %v8451_v6 }
 0x840   : > { %4242 = vadd.xlane.f32.xlu2 %v4241_v8 }
 0x841   : > { %v4232_v13 = vpop.f32.mrf.mxu3 }
 0x842   : > { %v4233_v32 = vadd.f32 %v4232_v13, %v4219_v11 }
 0x844   : > { %v4238_v35 = vadd.f32 %v4233_v32, %v8455_v63 }
 0x846   : > { %v4244_v36 = vadd.f32 %v4238_v35, %v4237_v33 }
 0x848   : > { %4245 = vadd.xlane.f32.xlu0 %v4244_v36 }
 0x8b3   : > { %v4243_v37 = vpop.xlane.xlu2 %4242 }
 0x8b4   : > { %v4247_v38 = vmul.f32 0.0051020407, %v4243_v37 }
 0x8b6   : > { %v4249_v48 = vsub.f32 %v4235_v26, %v4247_v38  ;;  %v4250_v40 = vsub.f32 %v4236_v27, %v4247_v38 }
 0x8b8   : > { %v4254_v31 = vsel %vm1050_vm0, %v4250_v40, 0.0  ;;  %v4257_v41 = vmul.f32 %v4249_v48, %v4249_v48 }
 0x8b9   : > { %v4258_v42 = vmul.f32 %v4254_v31, %v4254_v31 }
 0x8bb   : > { %v4246_v44 = vpop.xlane.xlu0 %4245  ;;  %v4261_v45 = vadd.f32 %v4258_v42, %v4257_v41 }
 0x8bc   : > { %v4248_v47 = vmul.f32 0.0051020407, %v4246_v44 }
 0x8bd   : > { %4262 = vadd.xlane.f32.xlu1 %v4261_v45 }
 0x8be   : > { %v4251_v39 = vsub.f32 %v4237_v33, %v4248_v47  ;;  %v4252_v43 = vsub.f32 %v4238_v35, %v4248_v47 }
 0x8c0   : > { %v4256_v6 = vsel %vm1050_vm0, %v4252_v43, 0.0  ;;  %v4259_v63 = vmul.f32 %v4251_v39, %v4251_v39 }
 0x8c1   : > { %v4260_v49 = vmul.f32 %v4256_v6, %v4256_v6 }
 0x8c3   : > { %v4264_v50 = vadd.f32 %v4260_v49, %v4259_v63 }
 0x8c5   : > { %4265 = vadd.xlane.f32.xlu2 %v4264_v50 }
 0x930   : > { %v4263_v51 = vpop.xlane.xlu1 %4262 }
 0x931   : > { %v4267_v18 = vmul.f32 0.0051020407, %v4263_v51 }
 0x933   : > { %v4269_v23 = vadd.f32 1e-12, %v4267_v18 }
 0x935   : > { %6729 = vrsqrt.f32 %v4269_v23  ;;  %vm4277_vm15 = vweird.f32 %v4269_v23 }
 0x938   : > { %v4266_v52 = vpop.xlane.xlu2 %4265 }
 0x939   : > { %v4268_v53 = vmul.f32 0.0051020407, %v4266_v52 }
 0x93b   : > { %v6730_v54 = vpop.eup %6729  ;;  %v4270_v55 = vadd.f32 1e-12, %v4268_v53 }
 0x93c   : > { %v4272_v56 = vmul.f32 %v6730_v54, %v4269_v23  ;;  %vm4278_vm14 = vweird.f32 %v6730_v54 }
 0x93d   : > { %6731 = vrsqrt.f32 %v4270_v55  ;;  %vm4279_vm0 = vmor %vm4277_vm15, %vm4278_vm14  ;;  %vm4287_vm2 = vweird.f32 %v4270_v55 }
 0x93e   : > { %v4273_v57 = vmul.f32 %v6730_v54, %v4272_v56 }
 0x940   : > { %v4274_v21 = vmul.f32 0.5, %v4273_v57 }
 0x942   : > { %v4275_v58 = vsub.f32 1.5, %v4274_v21 }
 0x943   : > { %v6732_v60 = vpop.eup %6731 }
 0x944   : > { %v4276_v7 = vmul.f32 %v6730_v54, %v4275_v58  ;;  %v4282_v62 = vmul.f32 %v6732_v60, %v4270_v55  ;;  %vm4288_vm1 = vweird.f32 %v6732_v60 }
 0x945   : > { %vm4289_vm3 = vmor %vm4287_vm2, %vm4288_vm1 }
 0x946   : > { %v4280_v9 = vsel %vm4279_vm0, %v6730_v54, %v4276_v7  ;;  %v4283_v0 = vmul.f32 %v6732_v60, %v4282_v62 }
 0x947   : > { %v4291_v3 = vmul.f32 %v4280_v9, %v4249_v48  ;;  %v4292_v4 = vmul.f32 %v4280_v9, %v4254_v31 }
 0x948   : > { %v4284_v15 = vmul.f32 0.5, %v4283_v0 }
 0x949   : > { %v4300_v16 = vmul.f32 %v4296_v12, %v4291_v3  ;;  %v4301_v17 = vmul.f32 %v4297_v59, %v4292_v4 }
 0x94a   : > { %v4285_v20 = vsub.f32 1.5, %v4284_v15 }
 0x94b   : > { %v4309_v22 = vadd.f32 %v4305_v19, %v4300_v16  ;;  %v4310_v28 = vadd.f32 %v4306_v10, %v4301_v17 }
 0x94c   : > { %v4286_v46 = vmul.f32 %v6732_v60, %v4285_v20 }
 0x94d   : > { %4313 = vst [vmem:[#allocation2 + $0x10] sm:$0xff] %v4309_v22 }
 0x94e   : > { %4314 = vst [vmem:[#allocation2] sm:$0xff] %v4310_v28  ;;  %v4290_v24 = vsel %vm4289_vm3, %v6732_v60, %v4286_v46 }
 0x94f   : > { %v4293_v34 = vmul.f32 %v4290_v24, %v4251_v39  ;;  %v4294_v25 = vmul.f32 %v4290_v24, %v4256_v6 }
 0x951   : > { %v4302_v26 = vmul.f32 %v4296_v12, %v4293_v34  ;;  %v4303_v27 = vmul.f32 %v4297_v59, %v4294_v25 }
 0x952   : > { %4320 = sbr.rel (%p6166_p4) target bundleno = 2825 (0xb09), region = 164 }
 0x953   : > { %v4311_v14 = vadd.f32 %v4305_v19, %v4302_v26  ;;  %v4312_v5 = vadd.f32 %v4306_v10, %v4303_v27 }
 0x955   : > { %4315 = vst [vmem:[#allocation2 + $0x18] sm:$0xff] %v4311_v14 }
 0x956   : > { %4316 = vst [vmem:[#allocation2 + $0x8] sm:$0xff] %v4312_v5 }
 0x957   : > { %v6563_v29 = vld [vmem:[#allocation19 + $0x38] sm:$0xff]  ;;  %v6562_v30 = vld [vmem:[#allocation19 + $0x30] sm:$0xff]  ;;  %v6561_v13 = vld [vmem:[#allocation19 + $0x28] sm:$0xff]  ;;  %v4321_v44 = vpack.c.bf16 %v4311_v14, %v4309_v22  ;;  %v4322_v45 = vpack.c.bf16 %v4312_v5, %v4310_v28  ;;  %vm4483_vm4 = vcmp.lt.s32.totalorder %v7702_v1, 3 }
 0x958   : > { %v6571_v8 = vld [vmem:[#allocation19 + $0x78] sm:$0xff]  ;;  %4455 = vmatpush.bf16.msra.mxu0 %v6563_v29  ;;  %v6570_v11 = vld [vmem:[#allocation19 + $0x70] sm:$0xff]  ;;  %v6569_v32 = vld [vmem:[#allocation19 + $0x68] sm:$0xff] }
 0x959   : > { %4469 = vmatpush.bf16.msra.mxu1 %v6571_v8  ;;  %v6560_v33 = vld [vmem:[#allocation19 + $0x20] sm:$0xff]  ;;  %v6559_v36 = vld [vmem:[#allocation19 + $0x18] sm:$0xff]  ;;  %v6558_v38 = vld [vmem:[#allocation19 + $0x10] sm:$0xff] }
 0x95a   : > { %v6568_v35 = vld [vmem:[#allocation19 + $0x60] sm:$0xff]  ;;  %v6567_v37 = vld [vmem:[#allocation19 + $0x58] sm:$0xff]  ;;  %v6566_v48 = vld [vmem:[#allocation19 + $0x50] sm:$0xff] }
 0x95b   : > { %v6557_v40 = vld [vmem:[#allocation19 + $0x8] sm:$0xff]  ;;  %v6556_v41 = vld [vmem:[#allocation19] sm:$0xff] }
 0x95c   : > { %4456 = vmatpush.bf16.msra.mxu0 %v6562_v30  ;;  %v6565_v31 = vld [vmem:[#allocation19 + $0x48] sm:$0xff]  ;;  %v6564_v42 = vld [vmem:[#allocation19 + $0x40] sm:$0xff] }
 0x95d   : > { %4470 = vmatpush.bf16.msra.mxu1 %v6570_v11  ;;  %v6737_v47 = vld [vmem:[#allocation20] ss:$0 sm:$0xff] }
 0x960   : > { %4457 = vmatpush.bf16.msra.mxu0 %v6561_v13 }
 0x961   : > { %4471 = vmatpush.bf16.msra.mxu1 %v6569_v32 }
 0x964   : > { %4458 = vmatpush.bf16.msra.mxu0 %v6560_v33 }
 0x965   : > { %4472 = vmatpush.bf16.msra.mxu1 %v6568_v35 }
 0x968   : > { %4459 = vmatpush.bf16.msra.mxu0 %v6559_v36 }
 0x969   : > { %4473 = vmatpush.bf16.msra.mxu1 %v6567_v37 }
 0x96c   : > { %4460 = vmatpush.bf16.msra.mxu0 %v6558_v38 }
 0x96d   : > { %4474 = vmatpush.bf16.msra.mxu1 %v6566_v48 }
 0x970   : > { %4461 = vmatpush.bf16.msra.mxu0 %v6557_v40 }
 0x971   : > { %4475 = vmatpush.bf16.msra.mxu1 %v6565_v31 }
 0x974   : > { %4462 = vmatpush.bf16.msra.mxu0 %v6556_v41 }
 0x975   : > { %4476 = vmatpush.bf16.msra.mxu1 %v6564_v42 }
 0x977   : > { %4463 = vmatmul.bf16.vlgmr.msra.gmra.mxu0 %v4321_v44 }
 0x978   : > { %4477 = vmatmul.bf16.vlgmr.msra.gmra.mxu1 %v4322_v45 }
 0x9f4   : > { %v4464_v39 = vpop.f32.mrf.mxu0 }
 0x9f5   : > { %v4478_v43 = vpop.f32.mrf.mxu1  ;;  %v4465_v6 = vadd.f32 %v6737_v47, %v4464_v39 }
 0x9f7   : > { %v4479_v63 = vadd.f32 %v4478_v43, %v4465_v6 }
 0x9f9   : > { %v4486_v49 = vsel %vm4483_vm4, %v4479_v63, -1e+30 }
 0x9fa   : > { %4488 = vmax.xlane.f32.xlu0 %v4486_v49 }
 0x9fc   : > { %v4466_v50 = vpop.f32.mrf.mxu0 }
 0x9fd   : > { %v4467_v51 = vadd.f32 %v6737_v47, %v4466_v50  ;;  %v4480_v18 = vpop.f32.mrf.mxu1 }
 0x9ff   : > { %v4481_v23 = vadd.f32 %v4480_v18, %v4467_v51 }
 0xa01   : > { %v4487_v52 = vsel %vm4483_vm4, %v4481_v23, -1e+30 }
 0xa02   : > { %4490 = vmax.xlane.f32.xlu0 %v4487_v52 }
 0xa6d   : > { %v4489_v53 = vpop.xlane.xlu0 %4488 }
 0xa6e   : > { %v4492_v54 = vsub.f32 %v4486_v49, %v4489_v53 }
 0xa70   : > { %v4494_v55 = vmul.f32 1.442695, %v4492_v54 }
 0xa72   : > { %6738 = vpow2.f32 %v4494_v55 }
 0xa75   : > { %v4491_v56 = vpop.xlane.xlu0 %4490 }
 0xa76   : > { %v4493_v57 = vsub.f32 %v4487_v52, %v4491_v56 }
 0xa78   : > { %v6739_v21 = vpop.eup %6738  ;;  %v4496_v2 = vmul.f32 1.442695, %v4493_v57 }
 0xa79   : > { %4498 = vadd.xlane.f32.xlu1 %v6739_v21 }
 0xa7a   : > { %6740 = vpow2.f32 %v4496_v2 }
 0xa80   : > { %v6741_v1 = vpop.eup %6740 }
 0xa81   : > { %4500 = vadd.xlane.f32.xlu1 %v6741_v1 }
 0xaec   : > { %v4499_v58 = vpop.xlane.xlu1 %4498 }
 0xaed   : > { %6742 = vrcp.f32 %v4499_v58  ;;  %v4513_v12 = vand.u32 2147483648, %v4499_v58  ;;  %v4511_v9 = vand.u32 2147483647, %v4499_v58  ;;  %vm4507_vm6 = vweird.f32 %v4499_v58 }
 0xaef   : > { %v4514_v10 = vor.u32 1.1754944e-38, %v4513_v12  ;;  %vm4512_vm8 = vcmp.eq.f32.partialorder %v4511_v9, 8.507059e+37 }
 0xaf3   : > { %v6743_v60 = vpop.eup %6742 }
 0xaf4   : > { %v4503_v61 = vmul.f32 %v6743_v60, %v4499_v58  ;;  %v4501_v7 = vpop.xlane.xlu1 %4500  ;;  %vm4508_vm5 = vweird.f32 %v6743_v60 }
 0xaf5   : > { %6744 = vrcp.f32 %v4501_v7  ;;  %vm4509_vm7 = vmor %vm4507_vm6, %vm4508_vm5  ;;  %v4528_v20 = vand.u32 2147483648, %v4501_v7  ;;  %v4526_v28 = vand.u32 2147483647, %v4501_v7  ;;  %vm4522_vm10 = vweird.f32 %v4501_v7 }
 0xaf6   : > { %v4504_v62 = vsub.f32 1.0, %v4503_v61 }
 0xaf7   : > { %v4529_v24 = vor.u32 1.1754944e-38, %v4528_v20  ;;  %vm4527_vm12 = vcmp.eq.f32.partialorder %v4526_v28, 8.507059e+37 }
 0xaf8   : > { %v4505_v59 = vmul.f32 %v6743_v60, %v4504_v62 }
 0xafa   : > { %v4506_v0 = vadd.f32 %v6743_v60, %v4505_v59 }
 0xafb   : > { %v6745_v19 = vpop.eup %6744 }
 0xafc   : > { %v4510_v3 = vsel %vm4509_vm7, %v6743_v60, %v4506_v0  ;;  %v4518_v4 = vmul.f32 %v6745_v19, %v4501_v7  ;;  %vm4523_vm9 = vweird.f32 %v6745_v19 }
 0xafd   : > { %v4515_v15 = vsel %vm4512_vm8, %v4514_v10, %v4510_v3  ;;  %vm4524_vm11 = vmor %vm4522_vm10, %vm4523_vm9 }
 0xafe   : > { %v4516_v16 = vmul.f32 %v6739_v21, %v4515_v15  ;;  %v4519_v17 = vsub.f32 1.0, %v4518_v4 }
 0xb00   : > { %4532 = vst [vmem:[%s8647_s15] sm:$0xff] %v4516_v16  ;;  %v4520_v22 = vmul.f32 %v6745_v19, %v4519_v17 }
 0xb02   : > { %v4521_v46 = vadd.f32 %v6745_v19, %v4520_v22 }
 0xb04   : > { %v4525_v34 = vsel %vm4524_vm11, %v6745_v19, %v4521_v46 }
 0xb05   : > { %v4530_v25 = vsel %vm4527_vm12, %v4529_v24, %v4525_v34 }
 0xb06   : > { %v4531_v26 = vmul.f32 %v6741_v1, %v4530_v25 }
 0xb08   : > { %4533 = vst [vmem:[%s8647_s15 + $0x8] sm:$0xff] %v4531_v26 }
 0xb09 PF: > { %s8648_s30 = sld [smem:[#allocation29_spill]]  ;;  %s8651_s28 = smov %s7248_s29 }
 0xb0a   : > { %s8649_s27 = sld [smem:[#allocation27_spill]] }
 0xb0b   : > { %s8650_s20 = sld [smem:[#allocation30_spill]] }
 0xb0f   : > { %p28_p5 = scmp.ge.s32.totalorder %s8648_s30, 4  }
 0xb11   : > { %s8652_s29 = smov %s8650_s20  ;;  %30 = sbr.rel (!%p28_p5) target bundleno = 15 (0xf), region = 272 }
 0xb16   :  { %4545 = vsyncpa [#allocation4], 1 }
 0xb17   :  { %4547 = vsyncpa [#allocation4 + $0x1], 1 }
 0xb18   :  { %4548 = vsyncpa [#allocation6], 1 }
 0xb19   :  { %4549 = vsyncpa [#allocation21], 1 }

</bundles_post_ra>
